<compile_context>
chip_gen: v5e
topology: v5e:2x2
jax: 0.10.0
libtpu: 0.0.40
codegen_flags: <defaults>
</compile_context>

<pallas_src>
import functools

import numpy as np
import jax
import jax.numpy as jnp
from jax.experimental import pallas as pl
from jax.experimental.pallas import tpu as pltpu


BATCH_TILE = 8            # images per grid step -> full (8,128) output tile
C1, C2 = 32, 64           # conv channel counts (fixed by the model)
FC_H, N_OUT_PAD = 128, 128


# ----------------------------- geometry helpers -----------------------------

def _geometry(H, W, Cin):
    Ho1, Wo1 = H - 2, W - 2              # conv1 valid output
    P1h, P1w = Ho1 // 2, Wo1 // 2        # pool1 output (floor mode)
    Ho2, Wo2 = P1h - 2, P1w - 2          # conv2 valid output
    P2h, P2w = Ho2 // 2, Wo2 // 2        # pool2 output (floor mode)
    assert P1h >= 3 and P1w >= 3 and P2h >= 1 and P2w >= 1, "input too small"
    B = BATCH_TILE
    N1 = P1h * P1w                       # pool1 pixels per image (conv2 input rows)
    off2 = 2 * P1w + 2                   # largest conv2 tap offset (wide layout)
    R2 = B * N1 - off2                   # wide conv2 rows for the whole stacked batch
    S2 = R2 - (P1w + 1)                  # rows of pool2 window maxima
    last_t2 = (B - 1) * N1 + (2 * P2h - 2) * P1w + (2 * P2w - 2)
    assert last_t2 < S2                  # every selected window max is a valid row
    K1 = 4 * 9 * Cin                     # conv1 fused K (pool phase x tap x cin)
    return dict(H=H, W=W, Cin=Cin, B=B, P1h=P1h, P1w=P1w, P2h=P2h, P2w=P2w,
                N1=N1, R2=R2, S2=S2, K1=K1)


# ------------------------------ fused kernel --------------------------------

def fused_cnn_kernel(g,
                     lhs1_ref, w1_ref, bn1s_ref, bn1b_ref,
                     w2_ref, bn2s_ref, bn2b_ref, sel2_ref,
                     wf1_ref, bf1_ref, wf2_ref, bf2_ref,
                     out_ref, lhs2_s):
    P1w, R2, S2 = g["P1w"], g["R2"], g["S2"]
    inv_pool2 = 1.0 / float(g["P2h"] * g["P2w"])

    # ---- conv1 + BN1 + ReLU: one K=4*9*Cin bf16 matmul (phases block-diag) ----
    y1 = jnp.dot(lhs1_ref[...], w1_ref[...], preferred_element_type=jnp.float32)
    y1 = jnp.maximum(y1 * bn1s_ref[...] + bn1b_ref[...], 0.0)        # (B*N1, 4*C1)

    # ---- maxpool1 = max over the 4 phase lane-groups -> pooled (B*N1, C1) ----
    p1 = jnp.maximum(jnp.maximum(y1[:, 0 * C1:1 * C1], y1[:, 1 * C1:2 * C1]),
                     jnp.maximum(y1[:, 2 * C1:3 * C1], y1[:, 3 * C1:4 * C1]))

    # ---- conv2: 9 shifted tap views lane-concatenated -> one K=9*C1 matmul ----
    for dy in range(3):
        for dx in range(3):
            k = dy * 3 + dx
            off = dy * P1w + dx
            lhs2_s[:, k * C1:(k + 1) * C1] = p1[off:off + R2, :].astype(jnp.bfloat16)
    y2 = jnp.dot(lhs2_s[...], w2_ref[...], preferred_element_type=jnp.float32)
    y2 = jnp.maximum(y2 * bn2s_ref[...] + bn2b_ref[...], 0.0)        # (R2, C2)

    # ---- maxpool2 window maxima (VPU) ... ----
    t2 = jnp.maximum(jnp.maximum(y2[0:S2, :], y2[1:S2 + 1, :]),
                     jnp.maximum(y2[P1w:P1w + S2, :], y2[P1w + 1:P1w + 1 + S2, :]))
    # ---- ... + AdaptiveAvgPool2d(1): tiny per-image 0/1 bf16 selection matmul;
    #      the 1/(P2h*P2w) factor stays exact in the f32 epilogue.
    pooled = jnp.dot(sel2_ref[...], t2.astype(jnp.bfloat16),
                     preferred_element_type=jnp.float32) * inv_pool2  # (B, C2)

    # ---- fc head: Linear(64,128) + ReLU (+ eval Dropout) + Linear(128,out) ----
    h = jnp.maximum(jnp.dot(pooled.astype(jnp.bfloat16), wf1_ref[...],
                            preferred_element_type=jnp.float32) + bf1_ref[...], 0.0)
    # TODO(synk): Dropout(0.5) is identity in eval mode; train-mode RNG masking
    #             (torch .train() semantics) is not implemented.
    out_ref[...] = jnp.dot(h.astype(jnp.bfloat16), wf2_ref[...],
                           preferred_element_type=jnp.float32) + bf2_ref[...]


# --------------------------------- wrapper ----------------------------------

def my_model_forward(params, x_nchw, *, out_classes):
    x = jnp.transpose(x_nchw, (0, 2, 3, 1)).astype(jnp.float32)      # NCHW -> NHWC
    N, H, W, Cin = x.shape
    g = _geometry(H, W, Cin)
    B, P1h, P1w, N1, K1 = g["B"], g["P1h"], g["P1w"], g["N1"], g["K1"]
    P2h, P2w, R2, S2 = g["P2h"], g["P2w"], g["R2"], g["S2"]

    n_grid = pl.cdiv(N, B)        # keep >= 2 steps when N > 8 so v7x can use both TCs
    n_pad = n_grid * B
    if n_pad != N:
        x = jnp.pad(x, ((0, n_pad - N), (0, 0), (0, 0), (0, 0)))

    # conv1 im2col with the pool1 phase folded into lanes (strided slices, no gather):
    #   row  = b*N1 + i*P1w + j                     (pool1 output pixel)
    #   lane = q*9*Cin + (dy*3+dx)*Cin + cin        (phase q, tap, input channel)
    parts = []
    for q in range(4):
        qh, qw = q // 2, q % 2
        for dy in range(3):
            for dx in range(3):
                h0, w0 = qh + dy, qw + dx
                parts.append(x[:, h0:h0 + 2 * P1h - 1:2, w0:w0 + 2 * P1w - 1:2, :])
    cols = jnp.concatenate(parts, axis=-1)                            # (n_pad,P1h,P1w,K1)
    lhs1 = cols.reshape(n_grid, B * N1, K1).astype(jnp.bfloat16)      # lane-dense DMA

    # pool2 + adaptive-avg row selector (per batch-stacked block), bf16 0/1 matrix
    sel_np = np.zeros((B, S2), np.float32)
    for b in range(B):
        for a in range(P2h):
            for c in range(P2w):
                sel_np[b, b * N1 + 2 * a * P1w + 2 * c] = 1.0
    sel2 = jnp.asarray(sel_np, dtype=jnp.bfloat16)

    kernel = functools.partial(fused_cnn_kernel, g)
    full = lambda a: pl.BlockSpec(a.shape, lambda i: (0, 0))          # all weights are 2-D

    flops = 2 * n_grid * (B * N1 * K1 * 4 * C1 + R2 * 9 * C1 * C2 + B * S2 * C2
                          + B * C2 * FC_H + B * FC_H * N_OUT_PAD)
    bytes_accessed = (lhs1.size * 2 + n_pad * N_OUT_PAD * 4
                      + (params["w_conv1"].size + params["w_conv2"].size
                         + params["w_fc1"].size + params["w_fc2"].size + sel2.size) * 2
                      + (params["scale1"].size + params["shift1"].size
                         + params["scale2"].size + params["shift2"].size
                         + params["b_fc1"].size + params["b_fc2"].size) * 4)
    cost = pl.CostEstimate(flops=int(flops), transcendentals=0,
                           bytes_accessed=int(bytes_accessed))

    out = pl.pallas_call(
        kernel,
        grid=(n_grid,),
        in_specs=[
            pl.BlockSpec((None, B * N1, K1), lambda i: (i, 0, 0)),
            full(params["w_conv1"]),
            full(params["scale1"]), full(params["shift1"]),
            full(params["w_conv2"]),
            full(params["scale2"]), full(params["shift2"]),
            full(sel2),
            full(params["w_fc1"]), full(params["b_fc1"]),
            full(params["w_fc2"]), full(params["b_fc2"]),
        ],
        out_specs=pl.BlockSpec((B, N_OUT_PAD), lambda i: (i, 0)),     # full (8,128) store
        out_shape=jax.ShapeDtypeStruct((n_pad, N_OUT_PAD), jnp.float32),
        scratch_shapes=[pltpu.VMEM((R2, 9 * C1), jnp.bfloat16)],      # fused conv2 lhs
        compiler_params=pltpu.CompilerParams(dimension_semantics=("parallel",)),
        cost_estimate=cost,
    )(lhs1, params["w_conv1"], params["scale1"], params["shift1"],
      params["w_conv2"], params["scale2"], params["shift2"], sel2,
      params["w_fc1"], params["b_fc1"], params["w_fc2"], params["b_fc2"])

    return out[:N, :out_classes]


# ----------------------------- parameter setup ------------------------------

def make_params(key, in_channels, out_classes):
    assert out_classes <= N_OUT_PAD
    ks = jax.random.split(key, 8)
    eps = 1e-5

    def bn_fold(k, c):
        k1, k2, k3, k4 = jax.random.split(k, 4)
        gamma = 1.0 + 0.1 * jax.random.normal(k1, (c,), jnp.float32)
        beta = 0.1 * jax.random.normal(k2, (c,), jnp.float32)
        rmean = 0.1 * jax.random.normal(k3, (c,), jnp.float32)
        rvar = 1.0 + 0.1 * jax.random.uniform(k4, (c,), jnp.float32)
        scale = gamma / jnp.sqrt(rvar + eps)
        shift = beta - rmean * scale
        return scale.reshape(1, c), shift.reshape(1, c)

    # conv weights: PyTorch OIHW -> (tap*Cin, Cout) matmul layout
    w1 = 0.1 * jax.random.normal(ks[0], (C1, in_channels, 3, 3), jnp.float32)
    w2 = 0.1 * jax.random.normal(ks[1], (C2, C1, 3, 3), jnp.float32)
    w1m = jnp.transpose(w1, (2, 3, 1, 0)).reshape(9 * in_channels, C1)
    w2m = jnp.transpose(w2, (2, 3, 1, 0)).reshape(9 * C1, C2)
    # conv1 weight as a pool1-phase block-diagonal (4*9*Cin, 4*C1) matrix
    k1 = 9 * in_channels
    w1bd = jnp.zeros((4 * k1, 4 * C1), jnp.float32)
    for q in range(4):
        w1bd = w1bd.at[q * k1:(q + 1) * k1, q * C1:(q + 1) * C1].set(w1m)

    scale1, shift1 = bn_fold(ks[2], C1)
    scale2, shift2 = bn_fold(ks[3], C2)

    # fc layers: PyTorch (out, in) -> (in, out); pad fc2 to 128 lane-dense logits
    wf1 = 0.1 * jax.random.normal(ks[4], (FC_H, C2), jnp.float32)
    bf1 = 0.1 * jax.random.normal(ks[5], (FC_H,), jnp.float32)
    wf2 = 0.1 * jax.random.normal(ks[6], (out_classes, FC_H), jnp.float32)
    bf2 = 0.1 * jax.random.normal(ks[7], (out_classes,), jnp.float32)
    wf2p = jnp.zeros((FC_H, N_OUT_PAD), jnp.float32).at[:, :out_classes].set(wf2.T)
    bf2p = jnp.zeros((1, N_OUT_PAD), jnp.float32).at[:, :out_classes].set(bf2.reshape(1, -1))

    kernel_params = dict(
        w_conv1=w1bd.astype(jnp.bfloat16),
        w_conv2=w2m.astype(jnp.bfloat16),
        scale1=jnp.tile(scale1, (1, 4)), shift1=jnp.tile(shift1, (1, 4)),
        scale2=scale2, shift2=shift2,
        w_fc1=wf1.T.astype(jnp.bfloat16), b_fc1=bf1.reshape(1, -1),
        w_fc2=wf2p.astype(jnp.bfloat16), b_fc2=bf2p,
    )
    ref_params = dict(w1=w1, w2=w2, wf1=wf1, bf1=bf1, wf2=wf2, bf2=bf2,
                      scale1=scale1, shift1=shift1, scale2=scale2, shift2=shift2)
    return kernel_params, ref_params


# --------------------------- pure-JAX reference ------------------------------

def reference_forward(ref, x_nchw):
    x = jnp.transpose(x_nchw, (0, 2, 3, 1)).astype(jnp.float32)

    def conv(x, w_oihw):
        w = jnp.transpose(w_oihw, (2, 3, 1, 0))
        return jax.lax.conv_general_dilated(
            x, w, window_strides=(1, 1), padding="VALID",
            dimension_numbers=("NHWC", "HWIO", "NHWC"))

    def pool(x):
        N, H, W, C = x.shape
        Ho, Wo = H // 2, W // 2
        return x[:, :Ho * 2, :Wo * 2, :].reshape(N, Ho, 2, Wo, 2, C).max(axis=(2, 4))

    y = jnp.maximum(conv(x, ref["w1"]) * ref["scale1"] + ref["shift1"], 0.0)
    y = pool(y)
    y = jnp.maximum(conv(y, ref["w2"]) * ref["scale2"] + ref["shift2"], 0.0)
    y = pool(y)
    y = y.mean(axis=(1, 2))
    h = jnp.maximum(y @ ref["wf1"].T + ref["bf1"], 0.0)
    return h @ ref["wf2"].T + ref["bf2"]


# ----------------------------------- main ------------------------------------

if __name__ == "__main__":
    in_channels, out_classes = 4, 10
    key = jax.random.PRNGKey(0)
    kx, kp = jax.random.split(key)

    x = jax.random.normal(kx, (2, in_channels, 16, 16), jnp.float32)   # NCHW
    params, ref_params = make_params(kp, in_channels, out_classes)

    fwd = jax.jit(my_model_forward, static_argnames="out_classes")
    out = jax.block_until_ready(fwd(params, x, out_classes=out_classes))

    assert out.shape == (2, out_classes)
    assert bool(jnp.all(jnp.isfinite(out)))

    ref = reference_forward(ref_params, x)
    rel_err = float(jnp.max(jnp.abs(out - ref)) / (jnp.max(jnp.abs(ref)) + 1e-6))
    assert rel_err < 5e-2, f"mismatch vs pure-JAX reference: rel-max-err={rel_err}"
    print("KERNEL_OK")
</pallas_src>

<mosaic_0001>
module attributes {stable_mosaic.version = 11 : i64} {
  func.func @fused_cnn_kernel(%arg0: i32, %arg1: memref<1x392x144xbf16, #tpu.memory_space<vmem>>, %arg2: memref<144x128xbf16, #tpu.memory_space<vmem>>, %arg3: memref<1x128xf32, #tpu.memory_space<vmem>>, %arg4: memref<1x128xf32, #tpu.memory_space<vmem>>, %arg5: memref<288x64xbf16, #tpu.memory_space<vmem>>, %arg6: memref<1x64xf32, #tpu.memory_space<vmem>>, %arg7: memref<1x64xf32, #tpu.memory_space<vmem>>, %arg8: memref<8x368xbf16, #tpu.memory_space<vmem>>, %arg9: memref<64x128xbf16, #tpu.memory_space<vmem>>, %arg10: memref<1x128xf32, #tpu.memory_space<vmem>>, %arg11: memref<128x128xbf16, #tpu.memory_space<vmem>>, %arg12: memref<1x128xf32, #tpu.memory_space<vmem>>, %arg13: memref<8x128xf32, #tpu.memory_space<vmem>>, %arg14: memref<376x288xbf16, #tpu.memory_space<vmem>>) attributes {dimension_semantics = [#tpu.dimension_semantics<parallel>], iteration_bounds = array<i64: 1>, scalar_prefetch = 0 : i64, scratch_operands = 1 : i64, tpu.core_type = #tpu.core_type<tc>, window_params = [{transform_indices = @transform_0, window_bounds = array<i64: 1, 392, 144>}, {pipeline_mode = #tpu.pipeline_mode<synchronous>, transform_indices = @transform_1, window_bounds = array<i64: 144, 128>}, {pipeline_mode = #tpu.pipeline_mode<synchronous>, transform_indices = @transform_2, window_bounds = array<i64: 1, 128>}, {pipeline_mode = #tpu.pipeline_mode<synchronous>, transform_indices = @transform_3, window_bounds = array<i64: 1, 128>}, {pipeline_mode = #tpu.pipeline_mode<synchronous>, transform_indices = @transform_4, window_bounds = array<i64: 288, 64>}, {pipeline_mode = #tpu.pipeline_mode<synchronous>, transform_indices = @transform_5, window_bounds = array<i64: 1, 64>}, {pipeline_mode = #tpu.pipeline_mode<synchronous>, transform_indices = @transform_6, window_bounds = array<i64: 1, 64>}, {pipeline_mode = #tpu.pipeline_mode<synchronous>, transform_indices = @transform_7, window_bounds = array<i64: 8, 368>}, {pipeline_mode = #tpu.pipeline_mode<synchronous>, transform_indices = @transform_8, window_bounds = array<i64: 64, 128>}, {pipeline_mode = #tpu.pipeline_mode<synchronous>, transform_indices = @transform_9, window_bounds = array<i64: 1, 128>}, {pipeline_mode = #tpu.pipeline_mode<synchronous>, transform_indices = @transform_10, window_bounds = array<i64: 128, 128>}, {pipeline_mode = #tpu.pipeline_mode<synchronous>, transform_indices = @transform_11, window_bounds = array<i64: 1, 128>}, {transform_indices = @transform_12, window_bounds = array<i64: 8, 128>}]} {
    %c0 = arith.constant 0 : index
    %c0_0 = arith.constant 0 : index
    %c0_1 = arith.constant 0 : index
    %0 = vector.load %arg1[%c0, %c0_0, %c0_1] : memref<1x392x144xbf16, #tpu.memory_space<vmem>>, vector<1x392x144xbf16>
    %1 = vector.shape_cast %0 : vector<1x392x144xbf16> to vector<392x144xbf16>
    %c0_2 = arith.constant 0 : index
    %c0_3 = arith.constant 0 : index
    %2 = vector.load %arg2[%c0_2, %c0_3] : memref<144x128xbf16, #tpu.memory_space<vmem>>, vector<144x128xbf16>
    %cst = arith.constant dense<0.000000e+00> : vector<392x128xf32>
    %3 = tpu.matmul %1, %2, %cst {dimension_numbers = #tpu.dot_dimension_numbers<[1], [0], [0], [1], [0, 0, 1, 1], [], []>} : vector<392x144xbf16>, vector<144x128xbf16>, vector<392x128xf32> -> vector<392x128xf32>
    %c0_4 = arith.constant 0 : index
    %c0_5 = arith.constant 0 : index
    %4 = vector.load %arg3[%c0_4, %c0_5] : memref<1x128xf32, #tpu.memory_space<vmem>>, vector<1x128xf32>
    %5 = vector.broadcast %4 : vector<1x128xf32> to vector<392x128xf32>
    %6 = arith.mulf %3, %5 : vector<392x128xf32>
    %c0_6 = arith.constant 0 : index
    %c0_7 = arith.constant 0 : index
    %7 = vector.load %arg4[%c0_6, %c0_7] : memref<1x128xf32, #tpu.memory_space<vmem>>, vector<1x128xf32>
    %8 = vector.broadcast %7 : vector<1x128xf32> to vector<392x128xf32>
    %9 = arith.addf %6, %8 : vector<392x128xf32>
    %cst_8 = arith.constant 0.000000e+00 : f32
    %10 = vector.broadcast %cst_8 : f32 to vector<392x128xf32>
    %11 = arith.maximumf %9, %10 : vector<392x128xf32>
    %12 = vector.extract_strided_slice %11 {offsets = [0, 0], sizes = [392, 32], strides = [1, 1]} : vector<392x128xf32> to vector<392x32xf32>
    %13 = vector.extract_strided_slice %11 {offsets = [0, 32], sizes = [392, 32], strides = [1, 1]} : vector<392x128xf32> to vector<392x32xf32>
    %14 = arith.maximumf %12, %13 : vector<392x32xf32>
    %15 = vector.extract_strided_slice %11 {offsets = [0, 64], sizes = [392, 32], strides = [1, 1]} : vector<392x128xf32> to vector<392x32xf32>
    %16 = vector.extract_strided_slice %11 {offsets = [0, 96], sizes = [392, 32], strides = [1, 1]} : vector<392x128xf32> to vector<392x32xf32>
    %17 = arith.maximumf %15, %16 : vector<392x32xf32>
    %18 = arith.maximumf %14, %17 : vector<392x32xf32>
    %19 = vector.extract_strided_slice %18 {offsets = [0, 0], sizes = [376, 32], strides = [1, 1]} : vector<392x32xf32> to vector<376x32xf32>
    %20 = arith.truncf %19 : vector<376x32xf32> to vector<376x32xbf16>
    %c0_9 = arith.constant 0 : index
    %c0_10 = arith.constant 0 : index
    %21 = vector.load %arg14[%c0_9, %c0_10] : memref<376x288xbf16, #tpu.memory_space<vmem>>, vector<376x32xbf16>
    tpu.vector_store %arg14[%c0_9, %c0_10], %20 {strides = array<i32>} : memref<376x288xbf16, #tpu.memory_space<vmem>>, vector<376x32xbf16>,
    %22 = vector.extract_strided_slice %18 {offsets = [1, 0], sizes = [376, 32], strides = [1, 1]} : vector<392x32xf32> to vector<376x32xf32>
    %23 = arith.truncf %22 : vector<376x32xf32> to vector<376x32xbf16>
    %c0_11 = arith.constant 0 : index
    %c32 = arith.constant 32 : index
    %24 = vector.load %arg14[%c0_11, %c32] : memref<376x288xbf16, #tpu.memory_space<vmem>>, vector<376x32xbf16>
    tpu.vector_store %arg14[%c0_11, %c32], %23 {strides = array<i32>} : memref<376x288xbf16, #tpu.memory_space<vmem>>, vector<376x32xbf16>,
    %25 = vector.extract_strided_slice %18 {offsets = [2, 0], sizes = [376, 32], strides = [1, 1]} : vector<392x32xf32> to vector<376x32xf32>
    %26 = arith.truncf %25 : vector<376x32xf32> to vector<376x32xbf16>
    %c0_12 = arith.constant 0 : index
    %c64 = arith.constant 64 : index
    %27 = vector.load %arg14[%c0_12, %c64] : memref<376x288xbf16, #tpu.memory_space<vmem>>, vector<376x32xbf16>
    tpu.vector_store %arg14[%c0_12, %c64], %26 {strides = array<i32>} : memref<376x288xbf16, #tpu.memory_space<vmem>>, vector<376x32xbf16>,
    %28 = vector.extract_strided_slice %18 {offsets = [7, 0], sizes = [376, 32], strides = [1, 1]} : vector<392x32xf32> to vector<376x32xf32>
    %29 = arith.truncf %28 : vector<376x32xf32> to vector<376x32xbf16>
    %c0_13 = arith.constant 0 : index
    %c96 = arith.constant 96 : index
    %30 = vector.load %arg14[%c0_13, %c96] : memref<376x288xbf16, #tpu.memory_space<vmem>>, vector<376x32xbf16>
    tpu.vector_store %arg14[%c0_13, %c96], %29 {strides = array<i32>} : memref<376x288xbf16, #tpu.memory_space<vmem>>, vector<376x32xbf16>,
    %31 = vector.extract_strided_slice %18 {offsets = [8, 0], sizes = [376, 32], strides = [1, 1]} : vector<392x32xf32> to vector<376x32xf32>
    %32 = arith.truncf %31 : vector<376x32xf32> to vector<376x32xbf16>
    %c0_14 = arith.constant 0 : index
    %c128 = arith.constant 128 : index
    %33 = vector.load %arg14[%c0_14, %c128] : memref<376x288xbf16, #tpu.memory_space<vmem>>, vector<376x32xbf16>
    tpu.vector_store %arg14[%c0_14, %c128], %32 {strides = array<i32>} : memref<376x288xbf16, #tpu.memory_space<vmem>>, vector<376x32xbf16>,
    %34 = vector.extract_strided_slice %18 {offsets = [9, 0], sizes = [376, 32], strides = [1, 1]} : vector<392x32xf32> to vector<376x32xf32>
    %35 = arith.truncf %34 : vector<376x32xf32> to vector<376x32xbf16>
    %c0_15 = arith.constant 0 : index
    %c160 = arith.constant 160 : index
    %36 = vector.load %arg14[%c0_15, %c160] : memref<376x288xbf16, #tpu.memory_space<vmem>>, vector<376x32xbf16>
    tpu.vector_store %arg14[%c0_15, %c160], %35 {strides = array<i32>} : memref<376x288xbf16, #tpu.memory_space<vmem>>, vector<376x32xbf16>,
    %37 = vector.extract_strided_slice %18 {offsets = [14, 0], sizes = [376, 32], strides = [1, 1]} : vector<392x32xf32> to vector<376x32xf32>
    %38 = arith.truncf %37 : vector<376x32xf32> to vector<376x32xbf16>
    %c0_16 = arith.constant 0 : index
    %c192 = arith.constant 192 : index
    %39 = vector.load %arg14[%c0_16, %c192] : memref<376x288xbf16, #tpu.memory_space<vmem>>, vector<376x32xbf16>
    tpu.vector_store %arg14[%c0_16, %c192], %38 {strides = array<i32>} : memref<376x288xbf16, #tpu.memory_space<vmem>>, vector<376x32xbf16>,
    %40 = vector.extract_strided_slice %18 {offsets = [15, 0], sizes = [376, 32], strides = [1, 1]} : vector<392x32xf32> to vector<376x32xf32>
    %41 = arith.truncf %40 : vector<376x32xf32> to vector<376x32xbf16>
    %c0_17 = arith.constant 0 : index
    %c224 = arith.constant 224 : index
    %42 = vector.load %arg14[%c0_17, %c224] : memref<376x288xbf16, #tpu.memory_space<vmem>>, vector<376x32xbf16>
    tpu.vector_store %arg14[%c0_17, %c224], %41 {strides = array<i32>} : memref<376x288xbf16, #tpu.memory_space<vmem>>, vector<376x32xbf16>,
    %43 = vector.extract_strided_slice %18 {offsets = [16, 0], sizes = [376, 32], strides = [1, 1]} : vector<392x32xf32> to vector<376x32xf32>
    %44 = arith.truncf %43 : vector<376x32xf32> to vector<376x32xbf16>
    %c0_18 = arith.constant 0 : index
    %c256 = arith.constant 256 : index
    %45 = vector.load %arg14[%c0_18, %c256] : memref<376x288xbf16, #tpu.memory_space<vmem>>, vector<376x32xbf16>
    tpu.vector_store %arg14[%c0_18, %c256], %44 {strides = array<i32>} : memref<376x288xbf16, #tpu.memory_space<vmem>>, vector<376x32xbf16>,
    %c0_19 = arith.constant 0 : index
    %c0_20 = arith.constant 0 : index
    %46 = vector.load %arg14[%c0_19, %c0_20] : memref<376x288xbf16, #tpu.memory_space<vmem>>, vector<376x288xbf16>
    %c0_21 = arith.constant 0 : index
    %c0_22 = arith.constant 0 : index
    %47 = vector.load %arg5[%c0_21, %c0_22] : memref<288x64xbf16, #tpu.memory_space<vmem>>, vector<288x64xbf16>
    %cst_23 = arith.constant dense<0.000000e+00> : vector<376x64xf32>
    %48 = tpu.matmul %46, %47, %cst_23 {dimension_numbers = #tpu.dot_dimension_numbers<[1], [0], [0], [1], [0, 0, 1, 1], [], []>} : vector<376x288xbf16>, vector<288x64xbf16>, vector<376x64xf32> -> vector<376x64xf32>
    %c0_24 = arith.constant 0 : index
    %c0_25 = arith.constant 0 : index
    %49 = vector.load %arg6[%c0_24, %c0_25] : memref<1x64xf32, #tpu.memory_space<vmem>>, vector<1x64xf32>
    %50 = vector.broadcast %49 : vector<1x64xf32> to vector<376x64xf32>
    %51 = arith.mulf %48, %50 : vector<376x64xf32>
    %c0_26 = arith.constant 0 : index
    %c0_27 = arith.constant 0 : index
    %52 = vector.load %arg7[%c0_26, %c0_27] : memref<1x64xf32, #tpu.memory_space<vmem>>, vector<1x64xf32>
    %53 = vector.broadcast %52 : vector<1x64xf32> to vector<376x64xf32>
    %54 = arith.addf %51, %53 : vector<376x64xf32>
    %cst_28 = arith.constant 0.000000e+00 : f32
    %55 = vector.broadcast %cst_28 : f32 to vector<376x64xf32>
    %56 = arith.maximumf %54, %55 : vector<376x64xf32>
    %57 = vector.extract_strided_slice %56 {offsets = [0, 0], sizes = [368, 64], strides = [1, 1]} : vector<376x64xf32> to vector<368x64xf32>
    %58 = vector.extract_strided_slice %56 {offsets = [1, 0], sizes = [368, 64], strides = [1, 1]} : vector<376x64xf32> to vector<368x64xf32>
    %59 = arith.maximumf %57, %58 : vector<368x64xf32>
    %60 = vector.extract_strided_slice %56 {offsets = [7, 0], sizes = [368, 64], strides = [1, 1]} : vector<376x64xf32> to vector<368x64xf32>
    %61 = vector.extract_strided_slice %56 {offsets = [8, 0], sizes = [368, 64], strides = [1, 1]} : vector<376x64xf32> to vector<368x64xf32>
    %62 = arith.maximumf %60, %61 : vector<368x64xf32>
    %63 = arith.maximumf %59, %62 : vector<368x64xf32>
    %c0_29 = arith.constant 0 : index
    %c0_30 = arith.constant 0 : index
    %64 = vector.load %arg8[%c0_29, %c0_30] : memref<8x368xbf16, #tpu.memory_space<vmem>>, vector<8x368xbf16>
    %65 = arith.truncf %63 : vector<368x64xf32> to vector<368x64xbf16>
    %cst_31 = arith.constant dense<0.000000e+00> : vector<8x64xf32>
    %66 = tpu.matmul %64, %65, %cst_31 {dimension_numbers = #tpu.dot_dimension_numbers<[1], [0], [0], [1], [0, 0, 1, 1], [], []>} : vector<8x368xbf16>, vector<368x64xbf16>, vector<8x64xf32> -> vector<8x64xf32>
    %cst_32 = arith.constant 2.500000e-01 : f32
    %67 = vector.broadcast %cst_32 : f32 to vector<8x64xf32>
    %68 = arith.mulf %66, %67 : vector<8x64xf32>
    %69 = arith.truncf %68 : vector<8x64xf32> to vector<8x64xbf16>
    %c0_33 = arith.constant 0 : index
    %c0_34 = arith.constant 0 : index
    %70 = vector.load %arg9[%c0_33, %c0_34] : memref<64x128xbf16, #tpu.memory_space<vmem>>, vector<64x128xbf16>
    %cst_35 = arith.constant dense<0.000000e+00> : vector<8x128xf32>
    %71 = tpu.matmul %69, %70, %cst_35 {dimension_numbers = #tpu.dot_dimension_numbers<[1], [0], [0], [1], [0, 0, 1, 1], [], []>} : vector<8x64xbf16>, vector<64x128xbf16>, vector<8x128xf32> -> vector<8x128xf32>
    %c0_36 = arith.constant 0 : index
    %c0_37 = arith.constant 0 : index
    %72 = vector.load %arg10[%c0_36, %c0_37] : memref<1x128xf32, #tpu.memory_space<vmem>>, vector<1x128xf32>
    %73 = vector.broadcast %72 : vector<1x128xf32> to vector<8x128xf32>
    %74 = arith.addf %71, %73 : vector<8x128xf32>
    %cst_38 = arith.constant 0.000000e+00 : f32
    %75 = vector.broadcast %cst_38 : f32 to vector<8x128xf32>
    %76 = arith.maximumf %74, %75 : vector<8x128xf32>
    %77 = arith.truncf %76 : vector<8x128xf32> to vector<8x128xbf16>
    %c0_39 = arith.constant 0 : index
    %c0_40 = arith.constant 0 : index
    %78 = vector.load %arg11[%c0_39, %c0_40] : memref<128x128xbf16, #tpu.memory_space<vmem>>, vector<128x128xbf16>
    %cst_41 = arith.constant dense<0.000000e+00> : vector<8x128xf32>
    %79 = tpu.matmul %77, %78, %cst_41 {dimension_numbers = #tpu.dot_dimension_numbers<[1], [0], [0], [1], [0, 0, 1, 1], [], []>} : vector<8x128xbf16>, vector<128x128xbf16>, vector<8x128xf32> -> vector<8x128xf32>
    %c0_42 = arith.constant 0 : index
    %c0_43 = arith.constant 0 : index
    %80 = vector.load %arg12[%c0_42, %c0_43] : memref<1x128xf32, #tpu.memory_space<vmem>>, vector<1x128xf32>
    %81 = vector.broadcast %80 : vector<1x128xf32> to vector<8x128xf32>
    %82 = arith.addf %79, %81 : vector<8x128xf32>
    %c0_44 = arith.constant 0 : index
    %c0_45 = arith.constant 0 : index
    %83 = vector.load %arg13[%c0_44, %c0_45] : memref<8x128xf32, #tpu.memory_space<vmem>>, vector<8x128xf32>
    tpu.vector_store %arg13[%c0_44, %c0_45], %82 {strides = array<i32>} : memref<8x128xf32, #tpu.memory_space<vmem>>, vector<8x128xf32>,
    return
  }
  func.func @transform_0(%arg0: i32) -> (i32, i32, i32) {
    %c0_i32 = arith.constant 0 : i32
    %c0_i32_0 = arith.constant 0 : i32
    %c0_i32_1 = arith.constant 0 : i32
    return %arg0, %c0_i32, %c0_i32_0 : i32, i32, i32
  }
  func.func @transform_1(%arg0: i32) -> (i32, i32) {
    %c0_i32 = arith.constant 0 : i32
    %c0_i32_0 = arith.constant 0 : i32
    %c0_i32_1 = arith.constant 0 : i32
    return %c0_i32, %c0_i32_0 : i32, i32
  }
  func.func @transform_2(%arg0: i32) -> (i32, i32) {
    %c0_i32 = arith.constant 0 : i32
    %c0_i32_0 = arith.constant 0 : i32
    %c0_i32_1 = arith.constant 0 : i32
    return %c0_i32, %c0_i32_0 : i32, i32
  }
  func.func @transform_3(%arg0: i32) -> (i32, i32) {
    %c0_i32 = arith.constant 0 : i32
    %c0_i32_0 = arith.constant 0 : i32
    %c0_i32_1 = arith.constant 0 : i32
    return %c0_i32, %c0_i32_0 : i32, i32
  }
  func.func @transform_4(%arg0: i32) -> (i32, i32) {
    %c0_i32 = arith.constant 0 : i32
    %c0_i32_0 = arith.constant 0 : i32
    %c0_i32_1 = arith.constant 0 : i32
    return %c0_i32, %c0_i32_0 : i32, i32
  }
  func.func @transform_5(%arg0: i32) -> (i32, i32) {
    %c0_i32 = arith.constant 0 : i32
    %c0_i32_0 = arith.constant 0 : i32
    %c0_i32_1 = arith.constant 0 : i32
    return %c0_i32, %c0_i32_0 : i32, i32
  }
  func.func @transform_6(%arg0: i32) -> (i32, i32) {
    %c0_i32 = arith.constant 0 : i32
    %c0_i32_0 = arith.constant 0 : i32
    %c0_i32_1 = arith.constant 0 : i32
    return %c0_i32, %c0_i32_0 : i32, i32
  }
  func.func @transform_7(%arg0: i32) -> (i32, i32) {
    %c0_i32 = arith.constant 0 : i32
    %c0_i32_0 = arith.constant 0 : i32
    %c0_i32_1 = arith.constant 0 : i32
    return %c0_i32, %c0_i32_0 : i32, i32
  }
  func.func @transform_8(%arg0: i32) -> (i32, i32) {
    %c0_i32 = arith.constant 0 : i32
    %c0_i32_0 = arith.constant 0 : i32
    %c0_i32_1 = arith.constant 0 : i32
    return %c0_i32, %c0_i32_0 : i32, i32
  }
  func.func @transform_9(%arg0: i32) -> (i32, i32) {
    %c0_i32 = arith.constant 0 : i32
    %c0_i32_0 = arith.constant 0 : i32
    %c0_i32_1 = arith.constant 0 : i32
    return %c0_i32, %c0_i32_0 : i32, i32
  }
  func.func @transform_10(%arg0: i32) -> (i32, i32) {
    %c0_i32 = arith.constant 0 : i32
    %c0_i32_0 = arith.constant 0 : i32
    %c0_i32_1 = arith.constant 0 : i32
    return %c0_i32, %c0_i32_0 : i32, i32
  }
  func.func @transform_11(%arg0: i32) -> (i32, i32) {
    %c0_i32 = arith.constant 0 : i32
    %c0_i32_0 = arith.constant 0 : i32
    %c0_i32_1 = arith.constant 0 : i32
    return %c0_i32, %c0_i32_0 : i32, i32
  }
  func.func @transform_12(%arg0: i32) -> (i32, i32) {
    %c0_i32 = arith.constant 0 : i32
    %c0_i32_0 = arith.constant 0 : i32
    return %arg0, %c0_i32 : i32, i32
  }
}

</mosaic_0001>

<bundles_post_ra>
// kernel: my_model_forward.1
= control target key start
LH: loop header
LB: loop body
LE: loop exit
PB: predicated region body
PF: predicated region fallthrough
CT: control target
= control target key end

     0   :  { %vm385_vm0 = vcmask 130048   ;;  %s6428_s24 = smov 96   ;;  %s6429_s22 = smov 64   ;;  %vm1419_vm1 = vcmask 257024   ;;  %vm3006_vm2 = vcmask 1040384   ;;  %vm3007_vm3 = vcmask 1044484   ;;  %s10592_s1 = inlined_call_operand.vmem [shape: bf16[144,128], index: 1, kind: input, shape index: {}]   ;;  %s10593_s0 = inlined_call_operand.vmem [shape: bf16[1,392,144], index: 0, kind: input, shape index: {}]   ;;  %s10594_s2 = inlined_call_operand.vmem [shape: f32[1,128], index: 2, kind: input, shape index: {}]   ;;  %s10595_s3 = inlined_call_operand.vmem [shape: f32[1,128], index: 3, kind: input, shape index: {}]   ;;  %s10596_s4 = inlined_call_operand.vmem [shape: bf16[288,64], index: 4, kind: input, shape index: {}]   ;;  %s10597_s5 = inlined_call_operand.vmem [shape: f32[1,64], index: 5, kind: input, shape index: {}]   ;;  %s10598_s6 = inlined_call_operand.vmem [shape: f32[1,64], index: 6, kind: input, shape index: {}]   ;;  %s10599_s7 = inlined_call_operand.vmem [shape: bf16[8,368], index: 7, kind: input, shape index: {}]   ;;  %s10600_s8 = inlined_call_operand.vmem [shape: bf16[64,128], index: 8, kind: input, shape index: {}]   ;;  %s10601_s9 = inlined_call_operand.vmem [shape: f32[1,128], index: 9, kind: input, shape index: {}]   ;;  %s10602_s10 = inlined_call_operand.vmem [shape: bf16[128,128], index: 10, kind: input, shape index: {}]   ;;  %s10603_s11 = inlined_call_operand.vmem [shape: f32[1,128], index: 11, kind: input, shape index: {}]   ;;  %s10604_s12 = inlined_call_operand.vmem [shape: f32[8,128], index: 12, kind: output, shape index: {}]  }
   0x1   :  { %v6065_v0 = vld [vmem:[%s10592_s1 + $0x38] sm:$0xff]  ;;  %v6064_v1 = vld [vmem:[%s10592_s1 + $0x30] sm:$0xff]  ;;  %v6063_v2 = vld [vmem:[%s10592_s1 + $0x28] sm:$0xff]  ;;  %vm2182_vm4 = vcmask 1042432   ;;  %vm2183_vm5 = vcmask 1046532   ;;  %vm2086_vm14 = vcmask 519424  }
   0x2   :  { %461 = vmatpush.bf16.msra.mxu0 %v6065_v0  ;;  %v6062_v3 = vld [vmem:[%s10592_s1 + $0x20] sm:$0xff]  ;;  %v6061_v4 = vld [vmem:[%s10592_s1 + $0x18] sm:$0xff]  ;;  %v6060_v5 = vld [vmem:[%s10592_s1 + $0x10] sm:$0xff]  ;;  %vm1468_vm8 = vsmask.f32 3328  ;;  %vm2468_vm15 = vcmask 781824  }
   0x3   :  { %v6059_v6 = vld [vmem:[%s10592_s1 + $0x8] sm:$0xff]  ;;  %v6058_v7 = vld [vmem:[%s10592_s1] sm:$0xff]  ;;  %v5342_v11 = vld [vmem:[%s10593_s0 + $0x10] sm:$0xf]  ;;  %vm1469_vm9 = vsmask.f32 7440 }
   0x4   :  { %v5334_v8 = vld [vmem:[%s10593_s0] sm:$0xf]  ;;  %v6011_v9 = vld [vmem:[%s10593_s0 + $0x4] sm:$0xf0]  ;;  %v6013_v12 = vld [vmem:[%s10593_s0 + $0x14] sm:$0xf0] }
   0x5   :  { %v5335_v10 = vor.u32 %v6011_v9, %v5334_v8  ;;  %v5343_v13 = vor.u32 %v6013_v12, %v5342_v11  ;;  %v5350_v14 = vld [vmem:[%s10593_s0 + $0x20] sm:$0xf]  ;;  %v6015_v15 = vld [vmem:[%s10593_s0 + $0x24] sm:$0xf0]  ;;  %v5358_v17 = vld [vmem:[%s10593_s0 + $0x30] sm:$0xf] }
   0x6   :  { %462 = vmatpush.bf16.msra.mxu0 %v6064_v1  ;;  %v5351_v16 = vor.u32 %v6015_v15, %v5350_v14  ;;  %v6017_v18 = vld [vmem:[%s10593_s0 + $0x34] sm:$0xf0]  ;;  %v6066_v20 = vld [vmem:[%s10592_s1 + $0x40] sm:$0xff]  ;;  %v5384_v22 = vld [vmem:[%s10593_s0 + $0x68] sm:$0xf0] }
   0x7   :  { %v5359_v19 = vor.u32 %v6017_v18, %v5358_v17  ;;  %v6022_v21 = vld [vmem:[%s10593_s0 + $0x64] sm:$0xf]  ;;  %6166 = vmatpush.bf16.msra.mxu1 %v6066_v20  ;;  %6167 = vmatpush.bf16.msra.mxu2 %v6066_v20  ;;  %v5366_v24 = vld [vmem:[%s10593_s0 + $0x40] sm:$0xf]  ;;  %v6019_v25 = vld [vmem:[%s10593_s0 + $0x44] sm:$0xf0] }
   0x8   :  { %v5387_v23 = vor.u32 %v6022_v21, %v5384_v22  ;;  %6168 = vmatpush.bf16.msra.mxu3 %v6066_v20  ;;  %v5367_v26 = vor.u32 %v6019_v25, %v5366_v24  ;;  %v6024_v27 = vld [vmem:[%s10593_s0 + $0x74] sm:$0xf]  ;;  %v5392_v28 = vld [vmem:[%s10593_s0 + $0x78] sm:$0xf0]  ;;  %v5374_v30 = vld [vmem:[%s10593_s0 + $0x50] sm:$0xf] }
   0x9   :  { %v5395_v29 = vor.u32 %v6024_v27, %v5392_v28  ;;  %v6021_v31 = vld [vmem:[%s10593_s0 + $0x54] sm:$0xf0]  ;;  %v6026_v33 = vld [vmem:[%s10593_s0 + $0x84] sm:$0xf]  ;;  %v5400_v34 = vld [vmem:[%s10593_s0 + $0x88] sm:$0xf0] }
   0xa   :  { %463 = vmatpush.bf16.msra.mxu0 %v6063_v2  ;;  %5566 = vmatmul.msk.bf16.vlgmr.msra.gmra.mxu1 %vm385_vm0, %v5387_v23  ;;  %v5375_v32 = vor.u32 %v6021_v31, %v5374_v30  ;;  %v5403_v35 = vor.u32 %v6026_v33, %v5400_v34  ;;  %v5382_v36 = vld [vmem:[%s10593_s0 + $0x60] sm:$0xf]  ;;  %v6023_v37 = vld [vmem:[%s10593_s0 + $0x64] sm:$0xf0]  ;;  %v6028_v39 = vld [vmem:[%s10593_s0 + $0x94] sm:$0xf] }
   0xb   :  { %v5383_v38 = vor.u32 %v6023_v37, %v5382_v36  ;;  %v5408_v40 = vld [vmem:[%s10593_s0 + $0x98] sm:$0xf0]  ;;  %v5390_v42 = vld [vmem:[%s10593_s0 + $0x70] sm:$0xf]  ;;  %v6025_v43 = vld [vmem:[%s10593_s0 + $0x74] sm:$0xf0] }
   0xc   :  { %v5411_v41 = vor.u32 %v6028_v39, %v5408_v40  ;;  %v5391_v44 = vor.u32 %v6025_v43, %v5390_v42  ;;  %v5398_v45 = vld [vmem:[%s10593_s0 + $0x80] sm:$0xf]  ;;  %v6027_v46 = vld [vmem:[%s10593_s0 + $0x84] sm:$0xf0]  ;;  %v6030_v49 = vld [vmem:[%s10593_s0 + $0xa4] sm:$0xf] }
   0xd   :  { %v5399_v47 = vor.u32 %v6027_v46, %v5398_v45  ;;  %v5416_v50 = vld [vmem:[%s10593_s0 + $0xa8] sm:$0xf0]  ;;  %v5406_v53 = vld [vmem:[%s10593_s0 + $0x90] sm:$0xf]  ;;  %v6029_v54 = vld [vmem:[%s10593_s0 + $0x94] sm:$0xf0] }
   0xe   :  { %464 = vmatpush.bf16.msra.mxu0 %v6062_v3  ;;  %v5419_v51 = vor.u32 %v6030_v49, %v5416_v50  ;;  %v5407_v55 = vor.u32 %v6029_v54, %v5406_v53  ;;  %v6032_v57 = vld [vmem:[%s10593_s0 + $0xb4] sm:$0xf]  ;;  %v5424_v58 = vld [vmem:[%s10593_s0 + $0xb8] sm:$0xf0]  ;;  %v5414_v61 = vld [vmem:[%s10593_s0 + $0xa0] sm:$0xf] }
   0xf   :  { %v5427_v59 = vor.u32 %v6032_v57, %v5424_v58  ;;  %v6031_v62 = vld [vmem:[%s10593_s0 + $0xa4] sm:$0xf0]  ;;  %v6034_v1 = vld [vmem:[%s10593_s0 + $0xc4] sm:$0xf]  ;;  %v5432_v2 = vld [vmem:[%s10593_s0 + $0xc8] sm:$0xf0] }
  0x10   :  { %v5415_v63 = vor.u32 %v6031_v62, %v5414_v61  ;;  %v5435_v3 = vor.u32 %v6034_v1, %v5432_v2  ;;  %v6036_v9 = vld [vmem:[%s10593_s0 + $0xd4] sm:$0xf]  ;;  %v6035_v14 = vld [vmem:[%s10593_s0 + $0xc4] sm:$0xf0]  ;;  %v6038_v18 = vld [vmem:[%s10593_s0 + $0xe4] sm:$0xf] }
  0x11   :  { %v5438_v23 = vld [vmem:[%s10593_s0 + $0xd0] sm:$0xf]  ;;  %v6037_v24 = vld [vmem:[%s10593_s0 + $0xd4] sm:$0xf0]  ;;  %v6040_v28 = vld [vmem:[%s10593_s0 + $0xf4] sm:$0xf] }
  0x12   :  { %465 = vmatpush.bf16.msra.mxu0 %v6061_v4  ;;  %v5439_v25 = vor.u32 %v6037_v24, %v5438_v23  ;;  %v6042_v33 = vld [vmem:[%s10593_s0 + $0x104] sm:$0xf]  ;;  %v5464_v34 = vld [vmem:[%s10593_s0 + $0x108] sm:$0xf0]  ;;  %v5446_v36 = vld [vmem:[%s10593_s0 + $0xe0] sm:$0xf] }
  0x13   :  { %v6039_v37 = vld [vmem:[%s10593_s0 + $0xe4] sm:$0xf0]  ;;  %v6717_v42 = vld [vmem:[%s10594_s2] ss:$0 sm:$0xff]  ;;  %v5472_v49 = vld [vmem:[%s10593_s0 + $0x118] sm:$0xf0] }
  0x14   :  { %v5454_v54 = vld [vmem:[%s10593_s0 + $0xf0] sm:$0xf]  ;;  %vm7196_vm6 = vmor %vm3006_vm2, %vm3007_vm3  ;;  %vm2516_vm11 = vsmask.f32 256  ;;  %vm2517_vm12 = vsmask.f32 4368 }
  0x15   :  { %vm7210_vm7 = vmor %vm2182_vm4, %vm2183_vm5  ;;  %vm4035_vm3 = vcmask 261120   ;;  %vm4688_vm4 = vcmask 1046528  }
  0x16   :  { %466 = vmatpush.bf16.msra.mxu0 %v6060_v5  ;;  %v5422_v5 = vld [vmem:[%s10593_s0 + $0xb0] sm:$0xf]  ;;  %vm7233_vm10 = vmor %vm1468_vm8, %vm1469_vm9 }
  0x17   :  { %vm7260_vm13 = vmor %vm2516_vm11, %vm2517_vm12 }
  0x1a   :  { %467 = vmatpush.bf16.msra.mxu0 %v6059_v6  ;;  %5567 = vmatmul.msk.bf16.gmra.mxu1 %vm385_vm0, %v5395_v29  ;;  %v6033_v6 = vld [vmem:[%s10593_s0 + $0xb4] sm:$0xf0]  ;;  %v5456_v29 = vld [vmem:[%s10593_s0 + $0xf8] sm:$0xf0] }
  0x1b   :  { %v5459_v30 = vor.u32 %v6040_v28, %v5456_v29 }
  0x1e   :  { %468 = vmatpush.bf16.msra.mxu0 %v6058_v7  ;;  %v5423_v7 = vor.u32 %v6033_v6, %v5422_v5 }
  0x21   :  { %469 = vmatmul.bf16.vlgmr.msra.gmra.mxu0 %v5335_v10  ;;  %v5440_v10 = vld [vmem:[%s10593_s0 + $0xd8] sm:$0xf0] }
  0x22   :  { %601 = vmatpush.bf16.msrb.mxu0 %v6066_v20  ;;  %v5443_v11 = vor.u32 %v6036_v9, %v5440_v10 }
  0x2a   :  { %5568 = vmatmul.msk.bf16.gmra.mxu1 %vm385_vm0, %v5403_v35  ;;  %v5467_v35 = vor.u32 %v6042_v33, %v5464_v34  ;;  %v6045_v33 = vld [vmem:[%s10593_s0 + $0x114] sm:$0xf0] }
  0x2c   :  { %5576 = vmatmul.msk.bf16.vlgmr.msra.gmra.mxu2 %vm385_vm0, %v5467_v35 }
  0x31   :  { %474 = vmatmul.bf16.gmra.mxu0 %v5343_v13  ;;  %v5430_v13 = vld [vmem:[%s10593_s0 + $0xc0] sm:$0xf] }
  0x3a   :  { %5569 = vmatmul.msk.bf16.gmra.mxu1 %vm385_vm0, %v5411_v41 }
  0x41   :  { %479 = vmatmul.bf16.gmra.mxu0 %v5351_v16  ;;  %v5431_v16 = vor.u32 %v6035_v14, %v5430_v13  ;;  %v6043_v13 = vld [vmem:[%s10593_s0 + $0x104] sm:$0xf0] }
  0x4a   :  { %5570 = vmatmul.msk.bf16.gmra.mxu1 %vm385_vm0, %v5419_v51 }
  0x51   :  { %484 = vmatmul.bf16.gmra.mxu0 %v5359_v19  ;;  %v5448_v19 = vld [vmem:[%s10593_s0 + $0xe8] sm:$0xf0] }
  0x52   :  { %v5451_v20 = vor.u32 %v6038_v18, %v5448_v19 }
  0x5a   :  { %5571 = vmatmul.msk.bf16.gmra.mxu1 %vm385_vm0, %v5427_v59 }
  0x61   :  { %489 = vmatmul.bf16.gmra.mxu0 %v5367_v26 }
  0x6a   :  { %5572 = vmatmul.msk.bf16.gmra.mxu1 %vm385_vm0, %v5435_v3 }
  0x71   :  { %494 = vmatmul.bf16.gmra.mxu0 %v5375_v32 }
  0x7a   :  { %5573 = vmatmul.msk.bf16.gmra.mxu1 %vm385_vm0, %v5443_v11  ;;  %v5462_v11 = vld [vmem:[%s10593_s0 + $0x100] sm:$0xf] }
  0x81   :  { %499 = vmatmul.bf16.gmra.mxu0 %v5383_v38  ;;  %v5447_v38 = vor.u32 %v6039_v37, %v5446_v36 }
  0x87   :  { %v633_v15 = vpop.f32.mrf.mxu1 }
  0x8a   :  { %5574 = vmatmul.msk.bf16.gmra.mxu1 %vm385_vm0, %v5451_v20 }
  0x8f   :  { %v635_v21 = vpop.f32.mrf.mxu1 }
  0x91   :  { %504 = vmatmul.bf16.gmra.mxu0 %v5391_v44  ;;  %v6723_v44 = vld [vmem:[%s10595_s3] ss:$0 sm:$0xff] }
  0x97   :  { %v638_v27 = vpop.f32.mrf.mxu1 }
  0x9a   :  { %5575 = vmatmul.msk.bf16.gmra.mxu1 %vm385_vm0, %v5459_v30 }
  0x9e   :  { %v6605_v48 = vpop.f32.mrf.mxu0 }
  0x9f   :  { %v640_v32 = vpop.f32.mrf.mxu1 }
  0xa1   :  { %509 = vmatmul.bf16.gmra.mxu0 %v5399_v47  ;;  %v6044_v47 = vld [vmem:[%s10593_s0 + $0x114] sm:$0xf] }
  0xa2   :  { %v5475_v53 = vor.u32 %v6044_v47, %v5472_v49 }
  0xa4   :  { %5577 = vmatmul.msk.bf16.gmra.mxu2 %vm385_vm0, %v5475_v53 }
  0xa6   :  { %v6614_v52 = vpop.f32.mrf.mxu0 }
  0xa7   :  { %v643_v40 = vpop.f32.mrf.mxu1 }
  0xae   :  { %v6622_v56 = vpop.f32.mrf.mxu0 }
  0xaf   :  { %v645_v57 = vpop.f32.mrf.mxu1 }
  0xb1   :  { %514 = vmatmul.bf16.gmra.mxu0 %v5407_v55  ;;  %v6041_v55 = vld [vmem:[%s10593_s0 + $0xf4] sm:$0xf0] }
  0xb2   :  { %v5455_v59 = vor.u32 %v6041_v55, %v5454_v54  ;;  %v5478_v55 = vld [vmem:[%s10593_s0 + $0x120] sm:$0xf] }
  0xb6   :  { %v6631_v60 = vpop.f32.mrf.mxu0 }
  0xb7   :  { %v648_v3 = vpop.f32.mrf.mxu1 }
  0xbe   :  { %v6639_v0 = vpop.f32.mrf.mxu0 }
  0xbf   :  { %v650_v20 = vpop.f32.mrf.mxu1 }
  0xc1   :  { %519 = vmatmul.bf16.gmra.mxu0 %v5415_v63 }
  0xc6   :  { %v6648_v4 = vpop.f32.mrf.mxu0 }
  0xce   :  { %v6656_v8 = vpop.f32.mrf.mxu0 }
  0xd1   :  { %524 = vmatmul.bf16.gmra.mxu0 %v5423_v7 }
  0xd6   :  { %v6665_v12 = vpop.f32.mrf.mxu0 }
  0xde   :  { %v6673_v17 = vpop.f32.mrf.mxu0 }
  0xdf   :  { %10671 = vst [vmem:[#allocation3_spill] sm:$0xff] %v6673_v17 }
  0xe1   :  { %529 = vmatmul.bf16.gmra.mxu0 %v5431_v16  ;;  %v5463_v16 = vor.u32 %v6043_v13, %v5462_v11  ;;  %v6048_v13 = vld [vmem:[%s10593_s0 + $0x134] sm:$0xf] }
  0xe6   :  { %v6682_v22 = vpop.f32.mrf.mxu0 }
  0xe7   :  { %10672 = vst [vmem:[#allocation4_spill] sm:$0xff] %v6682_v22 }
  0xee   :  { %v6690_v26 = vpop.f32.mrf.mxu0 }
  0xf1   :  { %534 = vmatmul.bf16.gmra.mxu0 %v5439_v25 }
  0xf6   :  { %v6699_v31 = vpop.f32.mrf.mxu0 }
  0xfe   :  { %v500_v39 = vpop.f32.mrf.mxu0 }
  0xff   :  { %v634_v41 = vadd.f32 %v633_v15, %v500_v39 }
 0x101   :  { %539 = vmatmul.bf16.gmra.mxu0 %v5447_v38  ;;  %v743_v43 = vmul.f32 %v6717_v42, %v634_v41 }
 0x103   :  { %v6733_v51 = vadd.f32 %v6723_v44, %v743_v43 }
 0x105   :  { %v845_v61 = vmax.f32 %v6733_v51, 0.0  ;;  %v5518_v51 = vld [vmem:[%s10593_s0 + $0x170] sm:$0xf] }
 0x106   :  { %v502_v45 = vpop.f32.mrf.mxu0 }
 0x107   :  { %v636_v46 = vadd.f32 %v635_v21, %v502_v45  ;;  %v6046_v45 = vld [vmem:[%s10593_s0 + $0x124] sm:$0xf] }
 0x109   :  { %v744_v50 = vmul.f32 %v6717_v42, %v636_v46  ;;  %v5480_v46 = vld [vmem:[%s10593_s0 + $0x128] sm:$0xf0] }
 0x10a   :  { %v5483_v49 = vor.u32 %v6046_v45, %v5480_v46  ;;  %v5496_v45 = vld [vmem:[%s10593_s0 + $0x148] sm:$0xf0] }
 0x10b   :  { %v6742_v58 = vadd.f32 %v6723_v44, %v744_v50 }
 0x10c   :  { %5578 = vmatmul.msk.bf16.gmra.mxu2 %vm385_vm0, %v5483_v49 }
 0x10d   :  { %v846_v62 = vmax.f32 %v6742_v58, 0.0 }
 0x10e   :  { %v505_v63 = vpop.f32.mrf.mxu0 }
 0x10f   :  { %v6172_v1 = vpack.i.bf16 %v846_v62, %v845_v61  ;;  %v639_v2 = vadd.f32 %v638_v27, %v505_v63  ;;  %v653_v27 = vpop.f32.mrf.mxu1 }
 0x111   :  { %544 = vmatmul.bf16.gmra.mxu0 %v5455_v59  ;;  %6173 = vrot.lane.b32.xlu1 %v6172_v1, %s6428_s24  ;;  %v745_v5 = vmul.f32 %v6717_v42, %v639_v2 }
 0x113   :  { %v6754_v9 = vadd.f32 %v6723_v44, %v745_v5 }
 0x115   :  { %v847_v15 = vmax.f32 %v6754_v9, 0.0 }
 0x116   :  { %v507_v6 = vpop.f32.mrf.mxu0 }
 0x117   :  { %v641_v7 = vadd.f32 %v640_v32, %v507_v6  ;;  %v5470_v32 = vld [vmem:[%s10593_s0 + $0x110] sm:$0xf] }
 0x118   :  { %v5471_v35 = vor.u32 %v6045_v33, %v5470_v32 }
 0x119   :  { %v746_v10 = vmul.f32 %v6717_v42, %v641_v7 }
 0x11b   :  { %v6764_v14 = vadd.f32 %v6723_v44, %v746_v10 }
 0x11d   :  { %v848_v18 = vmax.f32 %v6764_v14, 0.0 }
 0x11e   :  { %v510_v19 = vpop.f32.mrf.mxu0 }
 0x11f   :  { %v6177_v21 = vpack.i.bf16 %v848_v18, %v847_v15  ;;  %v644_v23 = vadd.f32 %v643_v40, %v510_v19  ;;  %v655_v40 = vpop.f32.mrf.mxu1 }
 0x121   :  { %549 = vmatmul.bf16.gmra.mxu0 %v5463_v16  ;;  %6178 = vrot.lane.b32.xlu1 %v6177_v21, %s6428_s24  ;;  %v747_v24 = vmul.f32 %v6717_v42, %v644_v23  ;;  %v5488_v16 = vld [vmem:[%s10593_s0 + $0x138] sm:$0xf0] }
 0x123   :  { %v6776_v30 = vadd.f32 %v6723_v44, %v747_v24 }
 0x125   :  { %v849_v36 = vmax.f32 %v6776_v30, 0.0  ;;  %v90_v30 = vld [vmem:[%s10593_s0 + $0x180] sm:$0xff] }
 0x126   :  { %v512_v25 = vpop.f32.mrf.mxu0 }
 0x127   :  { %v646_v28 = vadd.f32 %v645_v57, %v512_v25  ;;  %v6047_v57 = vld [vmem:[%s10593_s0 + $0x124] sm:$0xf0]  ;;  %v658_v59 = vpop.f32.mrf.mxu1  ;;  %v5486_v25 = vld [vmem:[%s10593_s0 + $0x130] sm:$0xf] }
 0x128   :  { %v5479_v1 = vor.u32 %v6047_v57, %v5478_v55  ;;  %v5494_v57 = vld [vmem:[%s10593_s0 + $0x140] sm:$0xf] }
 0x129   :  { %v748_v29 = vmul.f32 %v6717_v42, %v646_v28 }
 0x12b   :  { %v6785_v34 = vadd.f32 %v6723_v44, %v748_v29 }
 0x12d   :  { %v850_v37 = vmax.f32 %v6785_v34, 0.0 }
 0x12e   :  { %v515_v38 = vpop.f32.mrf.mxu0 }
 0x12f   :  { %v6182_v39 = vpack.i.bf16 %v850_v37, %v849_v36  ;;  %v649_v41 = vadd.f32 %v648_v3, %v515_v38  ;;  %v660_v11 = vpop.f32.mrf.mxu1 }
 0x131   :  { %554 = vmatmul.bf16.gmra.mxu0 %v5471_v35  ;;  %6183 = vrot.lane.b32.xlu2 %v6182_v39, %s6428_s24  ;;  %v749_v43 = vmul.f32 %v6717_v42, %v649_v41 }
 0x133   :  { %v6804_v54 = vadd.f32 %v6723_v44, %v749_v43  ;;  %v6050_v43 = vld [vmem:[%s10593_s0 + $0x144] sm:$0xf] }
 0x135   :  { %v851_v2 = vmax.f32 %v6804_v54, 0.0  ;;  %v5344_v54 = vld [vmem:[%s10593_s0 + $0x18] sm:$0xf0] }
 0x136   :  { %v517_v47 = vpop.f32.mrf.mxu0 }
 0x137   :  { %v651_v50 = vadd.f32 %v650_v20, %v517_v47  ;;  %v5491_v20 = vor.u32 %v6048_v13, %v5488_v16  ;;  %v663_v38 = vpop.f32.mrf.mxu1  ;;  %v5499_v47 = vor.u32 %v6050_v43, %v5496_v45 }
 0x139   :  { %v750_v53 = vmul.f32 %v6717_v42, %v651_v50  ;;  %5579 = vmatmul.msk.bf16.gmra.mxu2 %vm385_vm0, %v5491_v20  ;;  %v6052_v20 = vld [vmem:[%s10593_s0 + $0x154] sm:$0xf] }
 0x13b   :  { %v6813_v63 = vadd.f32 %v6723_v44, %v750_v53 }
 0x13d   :  { %v852_v3 = vmax.f32 %v6813_v63, 0.0  ;;  %v6012_v63 = vld [vmem:[%s10593_s0 + $0x14] sm:$0xf] }
 0x13e   :  { %v520_v5 = vpop.f32.mrf.mxu0 }
 0x13f   :  { %v654_v6 = vadd.f32 %v653_v27, %v520_v5  ;;  %v6187_v7 = vpack.i.bf16 %v852_v3, %v851_v2  ;;  %v6049_v27 = vld [vmem:[%s10593_s0 + $0x134] sm:$0xf0]  ;;  %v665_v53 = vpop.f32.mrf.mxu1 }
 0x140   :  { %v5487_v32 = vor.u32 %v6049_v27, %v5486_v25 }
 0x141   :  { %559 = vmatmul.bf16.gmra.mxu0 %v5479_v1  ;;  %6188 = vrot.lane.b32.xlu0 %v6187_v7, %s6428_s24  ;;  %v751_v10 = vmul.f32 %v6717_v42, %v654_v6 }
 0x143   :  { %v6830_v21 = vadd.f32 %v6723_v44, %v751_v10 }
 0x145   :  { %v853_v28 = vmax.f32 %v6830_v21, 0.0  ;;  %v5352_v21 = vld [vmem:[%s10593_s0 + $0x28] sm:$0xf0] }
 0x146   :  { %v522_v19 = vpop.f32.mrf.mxu0 }
 0x147   :  { %v656_v23 = vadd.f32 %v655_v40, %v522_v19  ;;  %v668_v16 = vpop.f32.mrf.mxu1 }
 0x149   :  { %v752_v24 = vmul.f32 %v6717_v42, %v656_v23  ;;  %5580 = vmatmul.msk.bf16.gmra.mxu2 %vm385_vm0, %v5499_v47  ;;  %v5504_v23 = vld [vmem:[%s10593_s0 + $0x158] sm:$0xf0] }
 0x14a   :  { %v5507_v25 = vor.u32 %v6052_v20, %v5504_v23  ;;  %v5510_v20 = vld [vmem:[%s10593_s0 + $0x160] sm:$0xf]  ;;  %v6055_v23 = vld [vmem:[%s10593_s0 + $0x164] sm:$0xf0] }
 0x14b   :  { %v6842_v29 = vadd.f32 %v6723_v44, %v752_v24 }
 0x14d   :  { %v854_v33 = vmax.f32 %v6842_v29, 0.0  ;;  %v6014_v29 = vld [vmem:[%s10593_s0 + $0x24] sm:$0xf] }
 0x14e   :  { %v525_v35 = vpop.f32.mrf.mxu0 }
 0x14f   :  { %v659_v39 = vadd.f32 %v658_v59, %v525_v35  ;;  %v6192_v40 = vpack.i.bf16 %v854_v33, %v853_v28  ;;  %v6051_v59 = vld [vmem:[%s10593_s0 + $0x144] sm:$0xf0]  ;;  %v670_v43 = vpop.f32.mrf.mxu1 }
 0x150   :  { %v5495_v6 = vor.u32 %v6051_v59, %v5494_v57  ;;  %v6054_v57 = vld [vmem:[%s10593_s0 + $0x164] sm:$0xf]  ;;  %v5512_v59 = vld [vmem:[%s10593_s0 + $0x168] sm:$0xf0] }
 0x151   :  { %564 = vmatmul.bf16.gmra.mxu0 %v5487_v32  ;;  %6193 = vrot.lane.b32.xlu1 %v6192_v40, %s6428_s24  ;;  %v753_v41 = vmul.f32 %v6717_v42, %v659_v39  ;;  %v6053_v39 = vld [vmem:[%s10593_s0 + $0x154] sm:$0xf0] }
 0x153   :  { %v6858_v49 = vadd.f32 %v6723_v44, %v753_v41 }
 0x155   :  { %v855_v1 = vmax.f32 %v6858_v49, 0.0 }
 0x156   :  { %v527_v46 = vpop.f32.mrf.mxu0 }
 0x157   :  { %v661_v50 = vadd.f32 %v660_v11, %v527_v46 }
 0x159   :  { %v754_v55 = vmul.f32 %v6717_v42, %v661_v50  ;;  %5581 = vmatmul.msk.bf16.gmra.mxu2 %vm385_vm0, %v5507_v25 }
 0x15b   :  { %v6870_v5 = vadd.f32 %v6723_v44, %v754_v55 }
 0x15d   :  { %v856_v7 = vmax.f32 %v6870_v5, 0.0 }
 0x15e   :  { %v530_v10 = vpop.f32.mrf.mxu0 }
 0x15f   :  { %v664_v11 = vadd.f32 %v663_v38, %v530_v10  ;;  %v6197_v13 = vpack.i.bf16 %v856_v7, %v855_v1  ;;  %v5502_v38 = vld [vmem:[%s10593_s0 + $0x150] sm:$0xf]  ;;  %v673_v10 = vpop.f32.mrf.mxu1 }
 0x160   :  { %v5503_v45 = vor.u32 %v6053_v39, %v5502_v38 }
 0x161   :  { %569 = vmatmul.bf16.gmra.mxu0 %v5495_v6  ;;  %6198 = vrot.lane.b32.xlu2 %v6197_v13, %s6428_s24  ;;  %v755_v19 = vmul.f32 %v6717_v42, %v664_v11  ;;  %v5515_v11 = vor.u32 %v6054_v57, %v5512_v59  ;;  %v6056_v57 = vld [vmem:[%s10593_s0 + $0x174] sm:$0xf]  ;;  %v5520_v59 = vld [vmem:[%s10593_s0 + $0x178] sm:$0xf0] }
 0x163   :  { %v6886_v27 = vadd.f32 %v6723_v44, %v755_v19 }
 0x165   :  { %v857_v40 = vmax.f32 %v6886_v27, 0.0 }
 0x166   :  { %v532_v24 = vpop.f32.mrf.mxu0 }
 0x167   :  { %v666_v32 = vadd.f32 %v665_v53, %v532_v24 }
 0x169   :  { %v756_v35 = vmul.f32 %v6717_v42, %v666_v32  ;;  %5582 = vmatmul.msk.bf16.gmra.mxu2 %vm385_vm0, %v5515_v11  ;;  %v5511_v32 = vor.u32 %v6055_v23, %v5510_v20 }
 0x16b   :  { %v6898_v41 = vadd.f32 %v6723_v44, %v756_v35 }
 0x16d   :  { %v858_v46 = vmax.f32 %v6898_v41, 0.0  ;;  %v5368_v41 = vld [vmem:[%s10593_s0 + $0x48] sm:$0xf0] }
 0x16e   :  { %v535_v47 = vpop.f32.mrf.mxu0 }
 0x16f   :  { %v669_v50 = vadd.f32 %v668_v16, %v535_v47  ;;  %v6202_v53 = vpack.i.bf16 %v858_v46, %v857_v40 }
 0x171   :  { %574 = vmatmul.bf16.gmra.mxu0 %v5503_v45  ;;  %6203 = vrot.lane.b32.xlu0 %v6202_v53, %s6428_s24  ;;  %v757_v55 = vmul.f32 %v6717_v42, %v669_v50  ;;  %v675_v45 = vpop.f32.mrf.mxu1 }
 0x173   :  { %v6914_v13 = vadd.f32 %v6723_v44, %v757_v55 }
 0x175   :  { %v859_v24 = vmax.f32 %v6914_v13, 0.0  ;;  %v6020_v13 = vld [vmem:[%s10593_s0 + $0x54] sm:$0xf] }
 0x176   :  { %v537_v6 = vpop.f32.mrf.mxu0 }
 0x177   :  { %v671_v16 = vadd.f32 %v670_v43, %v537_v6 }
 0x179   :  { %v758_v19 = vmul.f32 %v6717_v42, %v671_v16  ;;  %v5523_v16 = vor.u32 %v6056_v57, %v5520_v59  ;;  %v678_v58 = vpop.f32.mrf.mxu1 }
 0x17b   :  { %v6926_v25 = vadd.f32 %v6723_v44, %v758_v19  ;;  %5583 = vmatmul.msk.bf16.vlgmr.msra.gmra.mxu3 %vm385_vm0, %v5523_v16 }
 0x17d   :  { %v860_v35 = vmax.f32 %v6926_v25, 0.0 }
 0x17e   :  { %v540_v38 = vpop.f32.mrf.mxu0 }
 0x17f   :  { %v674_v39 = vadd.f32 %v673_v10, %v540_v38  ;;  %v6207_v43 = vpack.i.bf16 %v860_v35, %v859_v24 }
 0x181   :  { %579 = vmatmul.bf16.gmra.mxu0 %v5511_v32  ;;  %6208 = vrot.lane.b32.xlu1 %v6207_v43, %s6428_s24  ;;  %v759_v47 = vmul.f32 %v6717_v42, %v674_v39 }
 0x183   :  { %v6174_v50 = vpop.permute.xlu1 %6173  ;;  %v6950_v19 = vadd.f32 %v6723_v44, %v759_v47 }
 0x184   :  { %v6176_v53 = vunpack.i.h.bf16 %v6174_v50  ;;  %v6175_v55 = vunpack.i.l.bf16 %v6174_v50 }
 0x186   :  { %v6943_v6 = vmax.f32 %v846_v62, %v6176_v53  ;;  %v6947_v10 = vmax.f32 %v845_v61, %v6175_v55  ;;  %v542_v11 = vpop.f32.mrf.mxu0  ;;  %v6057_v61 = vld [vmem:[%s10593_s0 + $0x174] sm:$0xf0]  ;;  %v10613_v62 = vmax.f32 %v6950_v19, 0.0 }
 0x187   :  { %v676_v20 = vadd.f32 %v675_v45, %v542_v11  ;;  %v5519_v43 = vor.u32 %v6057_v61, %v5518_v51 }
 0x188   :  { %v6212_v23 = vpack.i.bf16 %v6943_v6, %v6947_v10 }
 0x189   :  { %v760_v32 = vmul.f32 %v6717_v42, %v676_v20 }
 0x18a   :  { %6213 = vrot.lane.b32.xlu0 %v6212_v23, %s6429_s22 }
 0x18b   :  { %v6965_v38 = vadd.f32 %v6723_v44, %v760_v32  ;;  %v6184_v39 = vpop.permute.xlu2 %6183 }
 0x18c   :  { %v6186_v50 = vunpack.i.h.bf16 %v6184_v39  ;;  %v6185_v53 = vunpack.i.l.bf16 %v6184_v39 }
 0x18d   :  { %v10614_v45 = vmax.f32 %v6965_v38, 0.0 }
 0x18e   :  { %v545_v47 = vpop.f32.mrf.mxu0  ;;  %v6975_v59 = vmax.f32 %v850_v37, %v6186_v50  ;;  %v6979_v11 = vmax.f32 %v849_v36, %v6185_v53  ;;  %v683_v37 = vpop.f32.mrf.mxu2  ;;  %v255_v50 = vunpack.c.h.b16 %v90_v30 }
 0x18f   :  { %v679_v55 = vadd.f32 %v678_v58, %v545_v47  ;;  %v6217_v57 = vpack.i.bf16 %v10614_v45, %v10613_v62  ;;  %v680_v58 = vpop.f32.mrf.mxu1 }
 0x191   :  { %584 = vmatmul.bf16.gmra.mxu0 %v5519_v43  ;;  %6218 = vrot.lane.b32.xlu2 %v6217_v57, %s6428_s24  ;;  %v761_v16 = vmul.f32 %v6717_v42, %v679_v55  ;;  %v6232_v43 = vpack.i.bf16 %v6975_v59, %v6979_v11 }
 0x193   :  { %v6179_v20 = vpop.permute.xlu1 %6178  ;;  %v6994_v36 = vadd.f32 %v6723_v44, %v761_v16  ;;  %v305_v16 = vpack.c.b16 %v255_v50, %v255_v50 }
 0x194   :  { %v6181_v23 = vunpack.i.h.bf16 %v6179_v20  ;;  %v6180_v32 = vunpack.i.l.bf16 %v6179_v20 }
 0x195   :  { %10673 = vst [vmem:[#allocation5_spill] sm:$0xff] %v6994_v36  ;;  %5584 = vmatmul.msk.bf16.gmra.mxu3 %vm385_vm0, %v305_v16 }
 0x196   :  { %v6984_v51 = vmax.f32 %v848_v18, %v6181_v23  ;;  %v6988_v61 = vmax.f32 %v847_v15, %v6180_v32  ;;  %v547_v34 = vpop.f32.mrf.mxu0  ;;  %v254_v15 = vunpack.c.l.b16 %v90_v30  ;;  %v10611_v18 = vmax.f32 %v6994_v36, 0.0  ;;  %v685_v32 = vpop.f32.mrf.mxu2 }
 0x197   :  { %v681_v39 = vadd.f32 %v680_v58, %v547_v34 }
 0x198   :  { %v6222_v14 = vpack.i.bf16 %v6984_v51, %v6988_v61  ;;  %v304_v53 = vpack.c.b16 %v254_v15, %v254_v15 }
 0x199   :  { %v762_v9 = vmul.f32 %v6717_v42, %v681_v39  ;;  %6233 = vrot.lane.b32.xlu2 %v6232_v43, %s6429_s22 }
 0x19a   :  { %6223 = vrot.lane.b32.xlu1 %v6222_v14, %s6429_s22  ;;  %v6010_v14 = vld [vmem:[%s10593_s0 + $0x4] sm:$0xf] }
 0x19b   :  { %v7005_v47 = vadd.f32 %v6723_v44, %v762_v9  ;;  %v5336_v9 = vld [vmem:[%s10593_s0 + $0x8] sm:$0xf0] }
 0x19d   :  { %10674 = vst [vmem:[#allocation6_spill] sm:$0xff] %v7005_v47  ;;  %v10612_v55 = vmax.f32 %v7005_v47, 0.0 }
 0x19e   :  { %v550_v57 = vpop.f32.mrf.mxu0  ;;  %v688_v43 = vpop.f32.mrf.mxu2 }
 0x19f   :  { %v684_v20 = vadd.f32 %v683_v37, %v550_v57  ;;  %v6227_v23 = vpack.i.bf16 %v10612_v55, %v10611_v18  ;;  %v5339_v57 = vor.u32 %v6010_v14, %v5336_v9 }
 0x1a1   :  { %589 = vmatmul.bf16.gmra.mxu0 %v304_v53  ;;  %6228 = vrot.lane.b32.xlu0 %v6227_v23, %s6428_s24  ;;  %v763_v58 = vmul.f32 %v6717_v42, %v684_v20 }
 0x1a3   :  { %v7016_v30 = vadd.f32 %v6723_v44, %v763_v58 }
 0x1a5   :  { %10675 = vst [vmem:[#allocation7_spill] sm:$0xff] %v7016_v30  ;;  %v10607_v15 = vmax.f32 %v7016_v30, 0.0 }
 0x1a6   :  { %v552_v34 = vpop.f32.mrf.mxu0 }
 0x1a7   :  { %v686_v39 = vadd.f32 %v685_v32, %v552_v34 }
 0x1a9   :  { %v764_v37 = vmul.f32 %v6717_v42, %v686_v39 }
 0x1ab   :  { %v7027_v50 = vadd.f32 %v6723_v44, %v764_v37  ;;  %v690_v37 = vpop.f32.mrf.mxu2 }
 0x1ad   :  { %10676 = vst [vmem:[#allocation8_spill] sm:$0xff] %v7027_v50  ;;  %v10608_v53 = vmax.f32 %v7027_v50, 0.0 }
 0x1ae   :  { %v555_v16 = vpop.f32.mrf.mxu0 }
 0x1af   :  { %v689_v20 = vadd.f32 %v688_v43, %v555_v16  ;;  %v6237_v23 = vpack.i.bf16 %v10608_v53, %v10607_v15 }
 0x1b1   :  { %6238 = vrot.lane.b32.xlu1 %v6237_v23, %s6428_s24  ;;  %5560 = vmatmul.msk.bf16.vlgmr.msrb.gmra.mxu0 %vm385_vm0, %v5339_v57  ;;  %v765_v32 = vmul.f32 %v6717_v42, %v689_v20 }
 0x1b3   :  { %v6189_v58 = vpop.permute.xlu0 %6188  ;;  %v7046_v16 = vadd.f32 %v6723_v44, %v765_v32 }
 0x1b4   :  { %v6191_v34 = vunpack.i.h.bf16 %v6189_v58  ;;  %v6190_v39 = vunpack.i.l.bf16 %v6189_v58 }
 0x1b5   :  { %10677 = vst [vmem:[#allocation9_spill] sm:$0xff] %v7046_v16 }
 0x1b6   :  { %v7039_v14 = vmax.f32 %v852_v3, %v6191_v34  ;;  %v7043_v43 = vmax.f32 %v851_v2, %v6190_v39  ;;  %v557_v9 = vpop.f32.mrf.mxu0  ;;  %v10605_v2 = vmax.f32 %v7046_v16, 0.0  ;;  %v5347_v34 = vor.u32 %v6012_v63, %v5344_v54 }
 0x1b7   :  { %v691_v23 = vadd.f32 %v690_v37, %v557_v9 }
 0x1b8   :  { %v6242_v57 = vpack.i.bf16 %v7039_v14, %v7043_v43 }
 0x1b9   :  { %v766_v20 = vmul.f32 %v6717_v42, %v691_v23 }
 0x1ba   :  { %6243 = vrot.lane.b32.xlu0 %v6242_v57, %s6429_s22 }
 0x1bb   :  { %v7060_v3 = vadd.f32 %v6723_v44, %v766_v20  ;;  %v6199_v32 = vpop.permute.xlu2 %6198 }
 0x1bc   :  { %v6201_v39 = vunpack.i.h.bf16 %v6199_v32  ;;  %v6200_v37 = vunpack.i.l.bf16 %v6199_v32 }
 0x1bd   :  { %10678 = vst [vmem:[#allocation10_spill] sm:$0xff] %v7060_v3  ;;  %v10606_v58 = vmax.f32 %v7060_v3, 0.0 }
 0x1be   :  { %v7063_v42 = vpop.f32.mrf.mxu0  ;;  %v7073_v44 = vmax.f32 %v856_v7, %v6201_v39  ;;  %v7077_v23 = vmax.f32 %v855_v1, %v6200_v37  ;;  %v6016_v7 = vld [vmem:[%s10593_s0 + $0x34] sm:$0xf]  ;;  %v5360_v39 = vld [vmem:[%s10593_s0 + $0x38] sm:$0xf0] }
 0x1bf   :  { %10679 = vst [vmem:[#allocation11_spill] sm:$0xff] %v7063_v42  ;;  %v6247_v9 = vpack.i.bf16 %v10606_v58, %v10605_v2  ;;  %v5363_v37 = vor.u32 %v6016_v7, %v5360_v39 }
 0x1c0   :  { %v6257_v5 = vpack.i.bf16 %v7073_v44, %v7077_v23 }
 0x1c1   :  { %6248 = vrot.lane.b32.xlu2 %v6247_v9, %s6428_s24  ;;  %5561 = vmatmul.msk.bf16.gmra.mxu0 %vm385_vm0, %v5347_v34 }
 0x1c3   :  { %v6194_v57 = vpop.permute.xlu1 %6193 }
 0x1c4   :  { %v6196_v20 = vunpack.i.h.bf16 %v6194_v57  ;;  %v6195_v63 = vunpack.i.l.bf16 %v6194_v57 }
 0x1c6   :  { %v7081_v54 = vmax.f32 %v854_v33, %v6196_v20  ;;  %v7085_v32 = vmax.f32 %v853_v28, %v6195_v63  ;;  %v7087_v34 = vpop.f32.mrf.mxu0  ;;  %v5355_v28 = vor.u32 %v6014_v29, %v5352_v21 }
 0x1c7   :  { %10680 = vst [vmem:[#allocation12_spill] sm:$0xff] %v7087_v34 }
 0x1c8   :  { %v6252_v49 = vpack.i.bf16 %v7081_v54, %v7085_v32 }
 0x1c9   :  { %6258 = vrot.lane.b32.xlu2 %v6257_v5, %s6429_s22 }
 0x1ca   :  { %6253 = vrot.lane.b32.xlu1 %v6252_v49, %s6429_s22 }
 0x1ce   :  { %v7101_v33 = vpop.f32.mrf.mxu0 }
 0x1cf   :  { %10681 = vst [vmem:[#allocation13_spill] sm:$0xff] %v7101_v33 }
 0x1d1   :  { %5562 = vmatmul.msk.bf16.gmra.mxu0 %vm385_vm0, %v5355_v28  ;;  %v6018_v28 = vld [vmem:[%s10593_s0 + $0x44] sm:$0xf] }
 0x1d2   :  { %v5371_v27 = vor.u32 %v6018_v28, %v5368_v41 }
 0x1d6   :  { %v7104_v1 = vpop.f32.mrf.mxu0 }
 0x1d7   :  { %10682 = vst [vmem:[#allocation14_spill] sm:$0xff] %v7104_v1 }
 0x1de   :  { %v7112_v9 = vpop.f32.mrf.mxu0 }
 0x1df   :  { %10683 = vst [vmem:[#allocation15_spill] sm:$0xff] %v7112_v9 }
 0x1e1   :  { %5563 = vmatmul.msk.bf16.gmra.mxu0 %vm385_vm0, %v5363_v37 }
 0x1e3   :  { %v6204_v57 = vpop.permute.xlu0 %6203 }
 0x1e4   :  { %v6206_v20 = vunpack.i.h.bf16 %v6204_v57  ;;  %v6205_v63 = vunpack.i.l.bf16 %v6204_v57 }
 0x1e6   :  { %v7117_v5 = vmax.f32 %v858_v46, %v6206_v20  ;;  %v7121_v49 = vmax.f32 %v857_v40, %v6205_v63  ;;  %v7123_v29 = vpop.f32.mrf.mxu0 }
 0x1e7   :  { %10684 = vst [vmem:[#allocation16_spill] sm:$0xff] %v7123_v29 }
 0x1e8   :  { %v6262_v21 = vpack.i.bf16 %v7117_v5, %v7121_v49 }
 0x1ea   :  { %6263 = vrot.lane.b32.xlu0 %v6262_v21, %s6429_s22 }
 0x1eb   :  { %v7134_v46 = vpop.permute.xlu2 %6218 }
 0x1ee   :  { %v7136_v40 = vpop.f32.mrf.mxu0 }
 0x1ef   :  { %10685 = vst [vmem:[#allocation17_spill] sm:$0xff] %v7136_v40 }
 0x1f1   :  { %5564 = vmatmul.msk.bf16.gmra.mxu0 %vm385_vm0, %v5371_v27 }
 0x1f3   :  { %v6209_v7 = vpop.permute.xlu1 %6208  ;;  %v6234_v39 = vpop.permute.xlu2 %6233 }
 0x1f4   :  { %v6211_v37 = vunpack.i.h.bf16 %v6209_v7  ;;  %v6210_v57 = vunpack.i.l.bf16 %v6209_v7  ;;  %v6236_v20 = vunpack.i.h.bf16 %v6234_v39  ;;  %v6235_v63 = vunpack.i.l.bf16 %v6234_v39 }
 0x1f6   :  { %v7141_v21 = vmax.f32 %v860_v35, %v6211_v37  ;;  %v7145_v2 = vmax.f32 %v859_v24, %v6210_v57  ;;  %v1340_v28 = vmax.f32 %v6975_v59, %v6236_v20  ;;  %v1339_v41 = vmax.f32 %v6979_v11, %v6235_v63  ;;  %v7149_v58 = vpop.f32.mrf.mxu0  ;;  %v5376_v24 = vld [vmem:[%s10593_s0 + $0x58] sm:$0xf0]  ;;  %s6430_s0 = smov 32  }
 0x1f7   :  { %10686 = vst [vmem:[#allocation18_spill] sm:$0xff] %v7149_v58  ;;  %v5379_v39 = vor.u32 %v6020_v13, %v5376_v24 }
 0x1f8   :  { %v7151_v27 = vpack.c.bf16 %v1340_v28, %v1340_v28  ;;  %v7153_v7 = vpack.c.bf16 %v1339_v41, %v1339_v41  ;;  %v6267_v25 = vpack.i.bf16 %v7141_v21, %v7145_v2 }
 0x1fa   :  { %3410 = vst.msk [vmem:[#allocation2 + $0xbc] sm:$0xf] %vm1419_vm1, %v7151_v27  ;;  %6268 = vrot.lane.b32.xlu1 %v6267_v25, %s6429_s22 }
 0x1fb   :  { %3409 = vst.msk [vmem:[#allocation2 + $0xb0] sm:$0xf] %vm1419_vm1, %v7153_v7 }
 0x1fc   :  { %1436 = vst.msk [vmem:[#allocation2 + $0xc0] sm:$0xf] %vm1419_vm1, %v7153_v7  ;;  %v6214_v35 = vpop.permute.xlu0 %6213 }
 0x1fd   :  { %1437 = vst.msk [vmem:[#allocation2 + $0xcc] sm:$0xf] %vm1419_vm1, %v7151_v27  ;;  %v6216_v59 = vunpack.i.h.bf16 %v6214_v35  ;;  %v6215_v11 = vunpack.i.l.bf16 %v6214_v35 }
 0x1fe   :  { %2914 = vst.msk [vmem:[#allocation2 + $0xb8] sm:$0xf] %vm1419_vm1, %v7153_v7  ;;  %v7174_v37 = vpop.f32.mrf.mxu0  ;;  %v718_v40 = vpop.f32.mrf.mxu3 }
 0x1ff   :  { %10687 = vst [vmem:[#allocation19_spill] sm:$0xff] %v7174_v37  ;;  %v1336_v57 = vmax.f32 %v6943_v6, %v6216_v59  ;;  %v1335_v20 = vmax.f32 %v6947_v10, %v6215_v11 }
 0x200   :  { %2915 = vst.msk [vmem:[#allocation2 + $0xc4] sm:$0xf] %vm1419_vm1, %v7151_v27 }
 0x201   :  { %v7180_v63 = vpack.c.bf16 %v1336_v57, %v1336_v57  ;;  %v7182_v28 = vpack.c.bf16 %v1335_v20, %v1335_v20  ;;  %5565 = vmatmul.msk.bf16.gmra.mxu0 %vm385_vm0, %v5379_v39  ;;  %vm2851_vm0 = vcmask 1044224  }
 0x203   :  { %10688 = vst [vmem:[#allocation20_spill] sm:$0xff] %v7182_v28  ;;  %v10609_v41 = vrot.slane %v7182_v28, 7  ;;  %v10610_v25 = vrot.slane %v7182_v28, 5  ;;  %v1591_v6 = vshll.u32 %v7182_v28, 16  ;;  %v1595_v10 = vshrl.u32 %v7182_v28, 16 }
 0x204   :  { %3406 = vst.msk [vmem:[#allocation2 + $0x8c] sm:$0xf] %vm1419_vm1, %v7180_v63  ;;  %v3044_v35 = vrot.slane %v7180_v63, 7  ;;  %v10615_v11 = vrot.slane %v7180_v63, 5  ;;  %v1601_v53 = vshll.u32 %v7180_v63, 16  ;;  %v10616_v55 = vshrl.u32 %v7180_v63, 16 }
 0x205   :  { %3405 = vst.msk [vmem:[#allocation2 + $0x80] sm:$0xf] %vm1419_vm1, %v7182_v28  ;;  %v3043_v24 = vrot.slane %v10609_v41, 4  ;;  %v2222_v59 = vrot.slane %v10610_v25, 4  ;;  %v7214_v20 = vrot.slane %v1591_v6, 5  ;;  %v1597_v15 = vrot.slane %v1595_v10, 4 }
 0x206   :  { %1432 = vst.msk [vmem:[#allocation2 + $0x90] sm:$0xf] %vm1419_vm1, %v7182_v28  ;;  %v7208_v39 = vpop.f32.mrf.mxu0  ;;  %v2565_v62 = vrot.slane %v1595_v10, 7  ;;  %v7231_v45 = vrot.slane %v1601_v53, 5  ;;  %v7333_v16 = vpop.f32.mrf.mxu3  ;;  %v10706_v30 = vrot.slane %v7180_v63, 5 }
 0x207   :  { %1433 = vst.msk [vmem:[#allocation2 + $0x9c] sm:$0xf] %vm1419_vm1, %v7180_v63  ;;  %v3045_v41 = vsel %vm7196_vm6, %v3043_v24, %v3044_v35  ;;  %v2224_v25 = vsel %vm7210_vm7, %v2222_v59, %v10615_v11  ;;  %v1598_v18 = vor.u32 %v1597_v15, %v7214_v20 }
 0x208   :  { %10691 = vst [vmem:[#allocation21_spill] sm:$0xff] %v7208_v39  ;;  %3173 = vrot.lane.b32.xlu0 %v3045_v41, %s6429_s22  ;;  %2351 = vrot.lane.b32.xlu1 %v2224_v25, %s6429_s22  ;;  %v7242_v25 = vrot.slane %v10616_v55, 7  ;;  %v7244_v15 = vor.u32 %v2565_v62, %v1591_v6  ;;  %v2225_v50 = vrot.slane %v10706_v30, 4 }
 0x209   :  { %10694 = vst [vmem:[#allocation22_spill] sm:$0xff] %v7214_v20  ;;  %v1599_v24 = vrot.slane %v1598_v18, 4 }
 0x20a   :  { %2910 = vst.msk [vmem:[#allocation2 + $0x88] sm:$0xf] %vm1419_vm1, %v7182_v28  ;;  %v2570_v29 = vor.u32 %v7242_v25, %v1601_v53 }
 0x20b   :  { %2911 = vst.msk [vmem:[#allocation2 + $0x94] sm:$0xf] %vm1419_vm1, %v7180_v63  ;;  %v1604_v41 = vsel %vm7233_vm10, %v1599_v24, %v7231_v45  ;;  %v2568_v24 = vrot.slane %v2565_v62, 4  ;;  %v3046_v62 = vrot.slane %v3044_v35, 4 }
 0x20c   :  { %v6224_v59 = vpop.permute.xlu1 %6223  ;;  %10697 = vst [vmem:[#allocation23_spill] sm:$0xff] %v7244_v15  ;;  %1969 = vrot.lane.b32.xlu2 %v1604_v41, %s6430_s0  ;;  %v6220_v41 = vunpack.i.l.bf16 %v7134_v46 }
 0x20d   :  { %v6226_v11 = vunpack.i.h.bf16 %v6224_v59  ;;  %v6225_v10 = vunpack.i.l.bf16 %v6224_v59  ;;  %v6221_v59 = vunpack.i.h.bf16 %v7134_v46  ;;  %10705 = vst [vmem:[#allocation27_spill] sm:$0xff] %v7333_v16 }
 0x20e   :  { %v585_v18 = vpop.f32.mrf.mxu0 }
 0x20f   :  { %v1338_v37 = vmax.f32 %v6984_v51, %v6226_v11  ;;  %v1337_v58 = vmax.f32 %v6988_v61, %v6225_v10  ;;  %v7250_v55 = vadd.f32 %v718_v40, %v585_v18  ;;  %v10701_v18 = vmax.f32 %v6965_v38, 0.0 }
 0x211   :  { %10698 = vst [vmem:[#allocation24_spill] sm:$0xff] %v7250_v55  ;;  %v7252_v6 = vpack.c.bf16 %v1338_v37, %v1338_v37  ;;  %v7254_v9 = vpack.c.bf16 %v1337_v58, %v1337_v58  ;;  %v2571_v58 = vsel %vm7260_vm13, %v2568_v24, %v2570_v29  ;;  %v7283_v55 = vmax.f32 %v10701_v18, %v6221_v59 }
 0x212   :  { %v10702_v29 = vmax.f32 %v6950_v19, 0.0 }
 0x213   :  { %3408 = vst.msk [vmem:[#allocation2 + $0xa4] sm:$0xf] %vm1419_vm1, %v7252_v6  ;;  %v3047_v61 = vrot.slane %v7254_v9, 7  ;;  %v10617_v53 = vshll.u32 %v7254_v9, 16  ;;  %v1615_v40 = vshrl.u32 %v7254_v9, 16  ;;  %v3050_v46 = vrot.slane %v7252_v6, 7  ;;  %v7343_v20 = vpop.permute.xlu0 %6228 }
 0x214   :  { %3407 = vst.msk [vmem:[#allocation2 + $0x98] sm:$0xf] %vm1419_vm1, %v7254_v9  ;;  %2734 = vrot.lane.b32.xlu2 %v2571_v58, %s6428_s24  ;;  %v7287_v24 = vmax.f32 %v10702_v29, %v6220_v41  ;;  %v1621_v19 = vshll.u32 %v7252_v6, 16  ;;  %v1635_v41 = vshrl.u32 %v7153_v7, 16  ;;  %v10708_v28 = vrot.slane %v7254_v9, 5 }
 0x215   :  { %1434 = vst.msk [vmem:[#allocation2 + $0xa8] sm:$0xf] %vm1419_vm1, %v7254_v9  ;;  %v3048_v37 = vsel %vm7196_vm6, %v3046_v62, %v3047_v61  ;;  %v3049_v35 = vrot.slane %v3047_v61, 4  ;;  %v7279_v11 = vrot.slane %v10617_v53, 5  ;;  %v1617_v10 = vrot.slane %v1615_v40, 4 }
 0x216   :  { %1435 = vst.msk [vmem:[#allocation2 + $0xb4] sm:$0xf] %vm1419_vm1, %v7252_v6  ;;  %3175 = vrot.lane.b32.xlu0 %v3048_v37, %s6429_s22  ;;  %v7292_v62 = vpop.f32.mrf.mxu0  ;;  %v10618_v61 = vshll.u32 %v7153_v7, 16  ;;  %v1625_v37 = vshrl.u32 %v7252_v6, 16  ;;  %v6272_v18 = vpack.i.bf16 %v7283_v55, %v7287_v24  ;;  %v7321_v1 = vrot.slane %v1615_v40, 7 }
 0x217   :  { %10703 = vst [vmem:[#allocation25_spill] sm:$0xff] %v7292_v62  ;;  %v3051_v38 = vsel %vm7196_vm6, %v3049_v35, %v3050_v46  ;;  %v1618_v59 = vor.u32 %v1617_v10, %v7279_v11  ;;  %v7310_v35 = vrot.slane %v1621_v19, 5  ;;  %v3052_v10 = vrot.slane %v3050_v46, 4 }
 0x218   :  { %2912 = vst.msk [vmem:[#allocation2 + $0xa0] sm:$0xf] %vm1419_vm1, %v7254_v9  ;;  %3177 = vrot.lane.b32.xlu1 %v3051_v38, %s6429_s22  ;;  %v7314_v53 = vrot.slane %v10618_v61, 5  ;;  %v1637_v62 = vrot.slane %v1635_v41, 4  ;;  %v7323_v33 = vrot.slane %v1625_v37, 7  ;;  %v2576_v40 = vrot.slane %v7321_v1, 4 }
 0x219   :  { %2913 = vst.msk [vmem:[#allocation2 + $0xac] sm:$0xf] %vm1419_vm1, %v7252_v6  ;;  %v1619_v58 = vrot.slane %v1618_v59, 4  ;;  %v10624_v59 = vrot.slane %v7153_v7, 7 }
 0x21a   :  { %v2578_v3 = vor.u32 %v7323_v33, %v1621_v19  ;;  %v2227_v19 = vsel %vm7210_vm7, %v2225_v50, %v10708_v28  ;;  %v2581_v28 = vrot.slane %v1635_v41, 7 }
 0x21b   :  { %v7308_v29 = vpop.permute.xlu2 %6248  ;;  %v1624_v38 = vsel %vm7233_vm10, %v1619_v58, %v7310_v35  ;;  %v3054_v61 = vsel %vm7196_vm6, %v3052_v10, %v10624_v59 }
 0x21c   :  { %10704 = vst [vmem:[#allocation26_spill] sm:$0xff] %v7308_v29  ;;  %6273 = vrot.lane.b32.xlu2 %v6272_v18, %s6429_s22  ;;  %v1638_v18 = vor.u32 %v1637_v62, %v7314_v53  ;;  %v10707_v29 = vshrl.u32 %v7180_v63, 16  ;;  %v2579_v30 = vsel %vm7260_vm13, %v2576_v40, %v2578_v3  ;;  %v10709_v3 = vshrl.u32 %v7151_v27, 16 }
 0x21e   :  { %1973 = vrot.lane.b32.xlu0 %v1624_v38, %s6430_s0  ;;  %v590_v46 = vpop.f32.mrf.mxu0  ;;  %v1641_v38 = vshll.u32 %v7151_v27, 16  ;;  %v1607_v10 = vrot.slane %v10707_v29, 4  ;;  %v1639_v62 = vrot.slane %v1638_v18, 4  ;;  %v7364_v40 = vrot.slane %v10709_v3, 7 }
 0x220   :  { %3179 = vrot.lane.b32.xlu1 %v3054_v61, %s6429_s22  ;;  %v7352_v63 = vrot.slane %v1641_v38, 5  ;;  %v1608_v34 = vor.u32 %v1607_v10, %v7231_v45  ;;  %v1627_v45 = vrot.slane %v1625_v37, 4  ;;  %v2232_v10 = vrot.slane %v7153_v7, 5 }
 0x222   :  { %v1644_v50 = vsel %vm7233_vm10, %v1639_v62, %v7352_v63  ;;  %v1609_v41 = vrot.slane %v1608_v34, 4  ;;  %v2584_v62 = vrot.slane %v2581_v28, 4 }
 0x223   :  { %v6259_v59 = vpop.permute.xlu2 %6258 }
 0x224   :  { %v6261_v58 = vunpack.i.h.bf16 %v6259_v59  ;;  %v6260_v16 = vunpack.i.l.bf16 %v6259_v59  ;;  %2353 = vrot.lane.b32.xlu2 %v2227_v19, %s6429_s22  ;;  %v1614_v37 = vsel %vm7233_vm10, %v1609_v41, %v7279_v11 }
 0x226   :  { %v1346_v18 = vmax.f32 %v7073_v44, %v6261_v58  ;;  %v1345_v61 = vmax.f32 %v7077_v23, %v6260_v16  ;;  %2738 = vrot.lane.b32.xlu0 %v2579_v30, %s6428_s24  ;;  %v592_v59 = vpop.f32.mrf.mxu0  ;;  %v723_v16 = vpop.f32.mrf.mxu3  ;;  %v10710_v44 = vrot.slane %v7252_v6, 5 }
 0x227   :  { %v7373_v58 = vadd.f32 %v723_v16, %v590_v46 }
 0x228   :  { %v7366_v19 = vpack.c.bf16 %v1346_v18, %v1346_v18  ;;  %v7368_v29 = vpack.c.bf16 %v1345_v61, %v1345_v61  ;;  %1977 = vrot.lane.b32.xlu1 %v1644_v50, %s6430_s0  ;;  %v2231_v23 = vrot.slane %v10710_v44, 4  ;;  %v2586_v61 = vor.u32 %v7364_v40, %v1641_v38 }
 0x229   :  { %10711 = vst [vmem:[#allocation28_spill] sm:$0xff] %v7373_v58  ;;  %v1628_v18 = vor.u32 %v1627_v45, %v7310_v35  ;;  %v10712_v35 = vshll.u32 %v7254_v9, 16 }
 0x22a   :  { %3416 = vst.msk [vmem:[#allocation2 + $0x104] sm:$0xf] %vm1419_vm1, %v7366_v19  ;;  %v2233_v38 = vsel %vm7210_vm7, %v2231_v23, %v2232_v10  ;;  %v2587_v3 = vsel %vm7260_vm13, %v2584_v62, %v2586_v61  ;;  %v7418_v62 = vpop.permute.xlu1 %6238  ;;  %v10726_v22 = vshll.u32 %v7368_v29, 16 }
 0x22b   :  { %3415 = vst.msk [vmem:[#allocation2 + $0xf8] sm:$0xf] %vm1419_vm1, %v7368_v29  ;;  %v2574_v16 = vor.u32 %v7321_v1, %v10712_v35  ;;  %v1629_v41 = vrot.slane %v1628_v18, 4  ;;  %v10715_v18 = vrot.slane %v7254_v9, 5  ;;  %v10630_v9 = vrot.slane %v7366_v19, 5 }
 0x22c   :  { %1442 = vst.msk [vmem:[#allocation2 + $0x108] sm:$0xf] %vm1419_vm1, %v7368_v29  ;;  %v6244_v30 = vpop.permute.xlu0 %6243  ;;  %1971 = vrot.lane.b32.xlu2 %v1614_v37, %s6430_s0  ;;  %v10714_v37 = vshrl.u32 %v7151_v27, 16 }
 0x22d   :  { %1443 = vst.msk [vmem:[#allocation2 + $0x114] sm:$0xf] %vm1419_vm1, %v7366_v19  ;;  %v6246_v34 = vunpack.i.h.bf16 %v6244_v30  ;;  %v6245_v46 = vunpack.i.l.bf16 %v6244_v30  ;;  %v2235_v30 = vrot.slane %v7151_v27, 5 }
 0x22e   :  { %2920 = vst.msk [vmem:[#allocation2 + $0x100] sm:$0xf] %vm1419_vm1, %v7368_v29  ;;  %2357 = vrot.lane.b32.xlu0 %v2233_v38, %s6429_s22  ;;  %v7397_v11 = vpop.f32.mrf.mxu0  ;;  %v725_v44 = vpop.f32.mrf.mxu3 }
 0x22f   :  { %2921 = vst.msk [vmem:[#allocation2 + $0x10c] sm:$0xf] %vm1419_vm1, %v7366_v19  ;;  %v1342_v59 = vmax.f32 %v7039_v14, %v6246_v34  ;;  %v1341_v50 = vmax.f32 %v7043_v43, %v6245_v46  ;;  %v2572_v14 = vrot.slane %v7242_v25, 4  ;;  %v1634_v25 = vsel %vm7233_vm10, %v1629_v41, %v7314_v53 }
 0x230   :  { %2742 = vrot.lane.b32.xlu1 %v2587_v3, %s6428_s24  ;;  %10713 = vst [vmem:[#allocation29_spill] sm:$0xff] %v7418_v62  ;;  %v2237_v61 = vrot.slane %v2235_v30, 4  ;;  %v1647_v34 = vrot.slane %v10714_v37, 4  ;;  %v2580_v3 = vrot.slane %v7323_v33, 4  ;;  %v3071_v62 = vrot.slane %v7368_v29, 7 }
 0x231   :  { %v7409_v23 = vpack.c.bf16 %v1342_v59, %v1342_v59  ;;  %v7411_v45 = vpack.c.bf16 %v1341_v50, %v1341_v50  ;;  %v2575_v1 = vsel %vm7260_vm13, %v2572_v14, %v2574_v16  ;;  %v2228_v59 = vrot.slane %v10715_v18, 4 }
 0x232   :  { %v10628_v50 = vrot.slane %v7368_v29, 5  ;;  %v1648_v35 = vor.u32 %v1647_v34, %v7352_v63  ;;  %v10716_v16 = vshll.u32 %v7153_v7, 16 }
 0x233   :  { %3412 = vst.msk [vmem:[#allocation2 + $0xd4] sm:$0xf] %vm1419_vm1, %v7409_v23  ;;  %v2238_v43 = vrot.slane %v7411_v45, 5  ;;  %v1651_v53 = vshll.u32 %v7411_v45, 16  ;;  %v1655_v14 = vshrl.u32 %v7411_v45, 16 }
 0x234   :  { %3411 = vst.msk [vmem:[#allocation2 + $0xc8] sm:$0xf] %vm1419_vm1, %v7411_v45  ;;  %2736 = vrot.lane.b32.xlu2 %v2575_v1, %s6428_s24  ;;  %v2582_v44 = vor.u32 %v2581_v28, %v10716_v16  ;;  %v2252_v37 = vrot.slane %v10628_v50, 4  ;;  %v1649_v28 = vrot.slane %v1648_v35, 4  ;;  %v1705_v50 = vshrl.u32 %v7366_v19, 16 }
 0x235   :  { %1438 = vst.msk [vmem:[#allocation2 + $0xd8] sm:$0xf] %vm1419_vm1, %v7411_v45  ;;  %v2239_v38 = vsel %vm7210_vm7, %v2237_v61, %v2238_v43  ;;  %v1653_v41 = vrot.slane %v1651_v53, 5 }
 0x236   :  { %1439 = vst.msk [vmem:[#allocation2 + $0xe4] sm:$0xf] %vm1419_vm1, %v7409_v23  ;;  %1975 = vrot.lane.b32.xlu0 %v1634_v25, %s6430_s0  ;;  %v605_v46 = vpop.f32.mrf.mxu0  ;;  %v10717_v25 = vrot.slane %v7252_v6, 5  ;;  %v2583_v63 = vsel %vm7260_vm13, %v2580_v3, %v2582_v44  ;;  %v7470_v6 = vsel %vm7210_vm7, %v2252_v37, %v10630_v9  ;;  %v10719_v3 = vrot.slane %v7153_v7, 7 }
 0x237   :  { %2916 = vst.msk [vmem:[#allocation2 + $0xd0] sm:$0xf] %vm1419_vm1, %v7411_v45  ;;  %v1654_v16 = vsel %vm7233_vm10, %v1649_v28, %v1653_v41  ;;  %v2240_v28 = vrot.slane %v2238_v43, 4  ;;  %v7605_v15 = vrot.slane %v1705_v50, 7 }
 0x238   :  { %2917 = vst.msk [vmem:[#allocation2 + $0xdc] sm:$0xf] %vm1419_vm1, %v7409_v23  ;;  %2361 = vrot.lane.b32.xlu1 %v2239_v38, %s6429_s22  ;;  %v2230_v61 = vsel %vm7210_vm7, %v2228_v59, %v10717_v25  ;;  %v3055_v35 = vrot.slane %v10719_v3, 4 }
 0x239   :  { %10718 = vst [vmem:[#allocation30_spill] sm:$0xff] %v7470_v6 }
 0x23c   :  { %v6254_v1 = vpop.permute.xlu1 %6253  ;;  %2355 = vrot.lane.b32.xlu2 %v2230_v61, %s6429_s22  ;;  %v2234_v61 = vrot.slane %v2232_v10, 4  ;;  %v3059_v10 = vrot.slane %v7411_v45, 7 }
 0x23d   :  { %v6256_v33 = vunpack.i.h.bf16 %v6254_v1  ;;  %v6255_v38 = vunpack.i.l.bf16 %v6254_v1  ;;  %v7476_v1 = vrot.slane %v1655_v14, 7 }
 0x23e   :  { %2740 = vrot.lane.b32.xlu0 %v2583_v63, %s6428_s24  ;;  %v7464_v34 = vpop.f32.mrf.mxu0  ;;  %v2236_v7 = vsel %vm7210_vm7, %v2234_v61, %v2235_v30  ;;  %v3061_v30 = vrot.slane %v3059_v10, 4  ;;  %v3062_v63 = vrot.slane %v7409_v23, 7  ;;  %v1665_v61 = vshrl.u32 %v7409_v23, 16 }
 0x23f   :  { %v1344_v18 = vmax.f32 %v7081_v54, %v6256_v33  ;;  %v1343_v59 = vmax.f32 %v7085_v32, %v6255_v38  ;;  %v3056_v54 = vrot.slane %v7151_v27, 7  ;;  %v2590_v32 = vor.u32 %v7476_v1, %v1651_v53 }
 0x240   :  { %1979 = vrot.lane.b32.xlu1 %v1654_v16, %s6430_s0  ;;  %v2588_v27 = vrot.slane %v7364_v40, 4  ;;  %v1657_v40 = vrot.slane %v1655_v14, 4  ;;  %v3063_v3 = vsel %vm7196_vm6, %v3061_v30, %v3062_v63  ;;  %v10632_v14 = vrot.slane %v7409_v23, 5 }
 0x241   :  { %v7481_v44 = vpack.c.bf16 %v1344_v18, %v1344_v18  ;;  %v7483_v25 = vpack.c.bf16 %v1343_v59, %v1343_v59  ;;  %v3057_v37 = vsel %vm7196_vm6, %v3055_v35, %v3056_v54  ;;  %v3058_v38 = vrot.slane %v3056_v54, 4 }
 0x242   :  { %v2591_v33 = vsel %vm7260_vm13, %v2588_v27, %v2590_v32  ;;  %v606_v18 = vadd.f32 %v605_v46, %v6614_v52  ;;  %v1658_v16 = vor.u32 %v1657_v40, %v1653_v41  ;;  %v604_v35 = vadd.f32 %v7397_v11, %v6605_v48  ;;  %v7538_v41 = vld [vmem:[%s10594_s2] ss:$0 sm:$0xff] }
 0x243   :  { %3414 = vst.msk [vmem:[#allocation2 + $0xec] sm:$0xf] %vm1419_vm1, %v7481_v44  ;;  %v3060_v59 = vsel %vm7196_vm6, %v3058_v38, %v3059_v10  ;;  %v1661_v52 = vshll.u32 %v7409_v23, 16  ;;  %v2242_v43 = vsel %vm7210_vm7, %v2240_v28, %v10632_v14  ;;  %v3065_v46 = vrot.slane %v7483_v25, 7  ;;  %v7550_v10 = vld [vmem:[%s10595_s3] ss:$0 sm:$0xff] }
 0x244   :  { %3413 = vst.msk [vmem:[#allocation2 + $0xe0] sm:$0xf] %vm1419_vm1, %v7483_v25  ;;  %3181 = vrot.lane.b32.xlu2 %v3057_v37, %s6429_s22  ;;  %v732_v48 = vmul.f32 %v7538_v41, %v606_v18  ;;  %v1659_v11 = vrot.slane %v1658_v16, 4  ;;  %v731_v54 = vmul.f32 %v7538_v41, %v604_v35  ;;  %v3064_v37 = vrot.slane %v3062_v63, 4 }
 0x245   :  { %1440 = vst.msk [vmem:[#allocation2 + $0xf0] sm:$0xf] %vm1419_vm1, %v7483_v25  ;;  %v7544_v32 = vrot.slane %v1661_v52, 5  ;;  %v10629_v27 = vshll.u32 %v7368_v29, 16  ;;  %v7558_v30 = vrot.slane %v1665_v61, 7  ;;  %v1695_v38 = vshrl.u32 %v7368_v29, 16 }
 0x246   :  { %1441 = vst.msk [vmem:[#allocation2 + $0xfc] sm:$0xf] %vm1419_vm1, %v7481_v44  ;;  %2359 = vrot.lane.b32.xlu0 %v2236_v7, %s6429_s22  ;;  %v7505_v53 = vpop.f32.mrf.mxu0  ;;  %v3067_v7 = vrot.slane %v3065_v46, 4  ;;  %v3066_v63 = vsel %vm7196_vm6, %v3064_v37, %v3065_v46  ;;  %v3068_v28 = vrot.slane %v7481_v44, 7  ;;  %v10631_v18 = vshll.u32 %v7483_v25, 16 }
 0x247   :  { %2918 = vst.msk [vmem:[#allocation2 + $0xe8] sm:$0xf] %vm1419_vm1, %v7483_v25  ;;  %v1664_v40 = vsel %vm7233_vm10, %v1659_v11, %v7544_v32  ;;  %v7568_v16 = vadd.f32 %v7550_v10, %v731_v54  ;;  %v2594_v11 = vor.u32 %v7558_v30, %v1661_v52  ;;  %v1697_v54 = vrot.slane %v1695_v38, 4 }
 0x248   :  { %2919 = vst.msk [vmem:[#allocation2 + $0xf4] sm:$0xf] %vm1419_vm1, %v7481_v44  ;;  %2744 = vrot.lane.b32.xlu1 %v2591_v33, %s6428_s24  ;;  %v7553_v33 = vadd.f32 %v7550_v10, %v732_v48  ;;  %v3069_v35 = vsel %vm7196_vm6, %v3067_v7, %v3068_v28  ;;  %v2592_v48 = vrot.slane %v7476_v1, 4  ;;  %v7585_v37 = vrot.slane %v10631_v18, 5 }
 0x249   :  { %10721 = vst [vmem:[#allocation32_spill] sm:$0xff] %v7568_v16  ;;  %v10634_v7 = vmax.f32 %v7568_v16, 0.0  ;;  %v7597_v18 = vrot.slane %v1695_v38, 7 }
 0x24a   :  { %10720 = vst [vmem:[#allocation31_spill] sm:$0xff] %v7553_v33  ;;  %v10635_v46 = vmax.f32 %v7553_v33, 0.0 }
 0x24c   :  { %3183 = vrot.lane.b32.xlu2 %v3060_v59, %s6429_s22  ;;  %v1675_v59 = vshrl.u32 %v7483_v25, 16  ;;  %v6277_v1 = vpack.i.bf16 %v10635_v46, %v10634_v7  ;;  %v1707_v7 = vrot.slane %v1705_v50, 4 }
 0x24e   :  { %3185 = vrot.lane.b32.xlu0 %v3063_v3, %s6429_s22  ;;  %v7527_v45 = vpop.f32.mrf.mxu0 }
 0x250   :  { %2363 = vrot.lane.b32.xlu1 %v2242_v43, %s6429_s22  ;;  %v7577_v43 = vrot.slane %v10629_v27, 5  ;;  %v3070_v27 = vrot.slane %v3068_v28, 4 }
 0x252   :  { %v1698_v52 = vor.u32 %v1697_v54, %v7577_v43 }
 0x254   :  { %1981 = vrot.lane.b32.xlu2 %v1664_v40, %s6430_s0  ;;  %v1677_v40 = vrot.slane %v1675_v59, 4  ;;  %v1699_v46 = vrot.slane %v1698_v52, 4 }
 0x256   :  { %3187 = vrot.lane.b32.xlu0 %v3066_v63, %s6429_s22  ;;  %v7571_v3 = vpop.f32.mrf.mxu0  ;;  %v1701_v63 = vshll.u32 %v7366_v19, 16  ;;  %v1678_v28 = vor.u32 %v1677_v40, %v7585_v37 }
 0x258   :  { %3189 = vrot.lane.b32.xlu1 %v3069_v35, %s6429_s22  ;;  %v2595_v35 = vsel %vm7260_vm13, %v2592_v48, %v2594_v11  ;;  %v1703_v48 = vrot.slane %v1701_v63, 5  ;;  %v1667_v11 = vrot.slane %v1665_v61, 4  ;;  %v1679_v50 = vrot.slane %v1678_v28, 4 }
 0x259   :  { %v3073_v28 = vrot.slane %v3071_v62, 4 }
 0x25a   :  { %v1708_v40 = vor.u32 %v1707_v7, %v1703_v48 }
 0x25c   :  { %v6264_v9 = vpop.permute.xlu0 %6263  ;;  %2746 = vrot.lane.b32.xlu2 %v2595_v35, %s6428_s24  ;;  %v1681_v35 = vshll.u32 %v7481_v44, 16 }
 0x25d   :  { %v6266_v14 = vunpack.i.h.bf16 %v6264_v9  ;;  %v6265_v58 = vunpack.i.l.bf16 %v6264_v9  ;;  %v3072_v9 = vsel %vm7196_vm6, %v3070_v27, %v3071_v62  ;;  %v10723_v27 = vrot.slane %v7366_v19, 5 }
 0x25e   :  { %v7602_v42 = vpop.f32.mrf.mxu0  ;;  %6278 = vrot.lane.b32.xlu0 %v6277_v1, %s6428_s24  ;;  %v2608_v1 = vrot.slane %v7597_v18, 4  ;;  %v7629_v52 = vrot.slane %v1681_v35, 5 }
 0x25f   :  { %v1348_v38 = vmax.f32 %v7117_v5, %v6266_v14  ;;  %v1347_v54 = vmax.f32 %v7121_v49, %v6265_v58  ;;  %v1685_v5 = vshrl.u32 %v7481_v44, 16  ;;  %v10722_v49 = vrot.slane %v7409_v23, 5 }
 0x260   :  { %3191 = vrot.lane.b32.xlu1 %v3072_v9, %s6429_s22  ;;  %v2610_v14 = vor.u32 %v7605_v15, %v1701_v63  ;;  %v7625_v9 = vrot.slane %v10723_v27, 4  ;;  %v10724_v23 = vrot.slane %v7483_v25, 5  ;;  %v1684_v62 = vsel %vm7233_vm10, %v1679_v50, %v7629_v52 }
 0x261   :  { %v7615_v61 = vpack.c.bf16 %v1348_v38, %v1348_v38  ;;  %v7617_v16 = vpack.c.bf16 %v1347_v54, %v1347_v54  ;;  %v2243_v58 = vrot.slane %v10722_v49, 4  ;;  %v1668_v38 = vor.u32 %v1667_v11, %v7544_v32 }
 0x262   :  { %v2597_v49 = vrot.slane %v1675_v59, 7  ;;  %v1704_v32 = vsel %vm7233_vm10, %v1699_v46, %v1703_v48  ;;  %v7649_v11 = vrot.slane %v1685_v5, 7  ;;  %v2611_v50 = vsel %vm7260_vm13, %v2608_v1, %v2610_v14 }
 0x263   :  { %3418 = vst.msk [vmem:[#allocation2 + $0x11c] sm:$0xf] %vm1419_vm1, %v7615_v61  ;;  %v2245_v63 = vsel %vm7210_vm7, %v2243_v58, %v10724_v23  ;;  %v10637_v7 = vshrl.u32 %v7617_v16, 16  ;;  %v1721_v27 = vshll.u32 %v7615_v61, 16  ;;  %v1725_v59 = vshrl.u32 %v7615_v61, 16 }
 0x264   :  { %3417 = vst.msk [vmem:[#allocation2 + $0x110] sm:$0xf] %vm1419_vm1, %v7617_v16  ;;  %2365 = vrot.lane.b32.xlu2 %v2245_v63, %s6429_s22  ;;  %v609_v58 = vadd.f32 %v7464_v34, %v6622_v56  ;;  %v611_v48 = vadd.f32 %v7505_v53, %v6631_v60  ;;  %v1669_v34 = vrot.slane %v1668_v38, 4  ;;  %v2600_v1 = vrot.slane %v2597_v49, 4 }
 0x265   :  { %1444 = vst.msk [vmem:[#allocation2 + $0x120] sm:$0xf] %vm1419_vm1, %v7617_v16  ;;  %v7663_v46 = vrot.slane %v10637_v7, 7  ;;  %v7669_v63 = vrot.slane %v1721_v27, 5  ;;  %v7671_v54 = vrot.slane %v1725_v59, 7  ;;  %v2602_v53 = vor.u32 %v7649_v11, %v1681_v35 }
 0x266   :  { %1445 = vst.msk [vmem:[#allocation2 + $0x12c] sm:$0xf] %vm1419_vm1, %v7615_v61  ;;  %v7656_v23 = vpop.f32.mrf.mxu0  ;;  %1985 = vrot.lane.b32.xlu0 %v1684_v62, %s6430_s0  ;;  %v1970_v56 = vpop.permute.xlu2 %1969  ;;  %v2256_v62 = vrot.slane %v7617_v16, 5  ;;  %v1687_v38 = vrot.slane %v1685_v5, 4  ;;  %v1727_v33 = vrot.slane %v1725_v59, 4  ;;  %v733_v6 = vmul.f32 %v7538_v41, %v609_v58 }
 0x267   :  { %2922 = vst.msk [vmem:[#allocation2 + $0x118] sm:$0xf] %vm1419_vm1, %v7617_v16  ;;  %v2616_v60 = vrot.slane %v7663_v46, 4  ;;  %v2618_v7 = vor.u32 %v7671_v54, %v1721_v27  ;;  %v10725_v14 = vrot.slane %v7366_v19, 7  ;;  %v7695_v35 = vor.u32 %v7597_v18, %v10726_v22 }
 0x268   :  { %2923 = vst.msk [vmem:[#allocation2 + $0x124] sm:$0xf] %vm1419_vm1, %v7615_v61  ;;  %1989 = vrot.lane.b32.xlu1 %v1704_v32, %s6430_s0  ;;  %v7684_v32 = vrot.slane %v1708_v40, 4  ;;  %v734_v5 = vmul.f32 %v7538_v41, %v611_v48  ;;  %v1674_v27 = vsel %vm7233_vm10, %v1669_v34, %v7585_v37  ;;  %v1728_v59 = vor.u32 %v1727_v33, %v7669_v63 }
 0x269   :  { %2099 = vst.msk [vmem:[#allocation2 + $0x90] sm:$0xf] %vm2086_vm14, %v1970_v56  ;;  %v7690_v17 = vsel %vm7196_vm6, %v3073_v28, %v10725_v14  ;;  %v7703_v40 = vsel %vm7260_vm13, %v2616_v60, %v2618_v7  ;;  %v10727_v28 = vshll.u32 %v7483_v25, 16  ;;  %v10728_v14 = vrot.slane %v7481_v44, 5 }
 0x26a   :  { %2969 = vst.msk [vmem:[#allocation2 + $0x88] sm:$0xf] %vm2086_vm14, %v1970_v56  ;;  %v2259_v18 = vrot.slane %v7615_v61, 5  ;;  %v2258_v48 = vrot.slane %v2256_v62, 4  ;;  %v2603_v37 = vsel %vm7260_vm13, %v2600_v1, %v2602_v53  ;;  %v1688_v7 = vor.u32 %v1687_v38, %v7629_v52 }
 0x26b   :  { %v2598_v56 = vor.u32 %v2597_v49, %v10727_v28  ;;  %v2249_v22 = vrot.slane %v10728_v14, 4  ;;  %v2596_v49 = vrot.slane %v7558_v30, 4  ;;  %v10642_v34 = vshll.u32 %v7617_v16, 16 }
 0x26c   :  { %v6269_v58 = vpop.permute.xlu1 %6268  ;;  %1983 = vrot.lane.b32.xlu2 %v1674_v27, %s6430_s0  ;;  %v7726_v27 = vadd.f32 %v7550_v10, %v733_v6  ;;  %v10730_v38 = vrot.slane %v7483_v25, 5  ;;  %v7735_v28 = vadd.f32 %v7550_v10, %v734_v5  ;;  %v10731_v6 = vrot.slane %v7368_v29, 5 }
 0x26d   :  { %v6271_v36 = vunpack.i.h.bf16 %v6269_v58  ;;  %v6270_v47 = vunpack.i.l.bf16 %v6269_v58  ;;  %v7723_v58 = vsel %vm7210_vm7, %v2258_v48, %v2259_v18  ;;  %v2599_v14 = vsel %vm7260_vm13, %v2596_v49, %v2598_v56 }
 0x26e   :  { %v7715_v33 = vpop.f32.mrf.mxu0  ;;  %2750 = vrot.lane.b32.xlu0 %v2603_v37, %s6428_s24  ;;  %10729 = vst [vmem:[#allocation33_spill] sm:$0xff] %v7723_v58  ;;  %v7730_v53 = vpop.permute.xlu2 %2734  ;;  %v2246_v30 = vrot.slane %v10730_v38, 4  ;;  %v7751_v5 = vrot.slane %v1688_v7, 4  ;;  %v7758_v29 = vrot.slane %v10642_v34, 5  ;;  %v7763_v48 = vrot.slane %v1728_v59, 4 }
 0x26f   :  { %v1350_v1 = vmax.f32 %v7141_v21, %v6271_v36  ;;  %v1349_v52 = vmax.f32 %v7145_v2, %v6270_v47  ;;  %v2251_v36 = vsel %vm7210_vm7, %v2249_v22, %v10731_v6  ;;  %v10641_v47 = vrot.slane %v7615_v61, 7 }
 0x270   :  { %2754 = vrot.lane.b32.xlu1 %v2611_v50, %s6428_s24  ;;  %v7747_v2 = vadd.f32 %v7527_v45, %v6639_v0  ;;  %v2257_v50 = vsel %vm7210_vm7, %v7625_v9, %v2256_v62  ;;  %v2261_v45 = vrot.slane %v2259_v18, 4 }
 0x271   :  { %v7749_v21 = vpack.c.bf16 %v1350_v1, %v1350_v1  ;;  %v1398_v25 = vpack.c.bf16 %v1349_v52, %v1349_v52  ;;  %v3082_v9 = vrot.slane %v10641_v47, 4  ;;  %v2620_v52 = vrot.slane %v7671_v54, 4 }
 0x273   :  { %3420 = vst.msk [vmem:[#allocation2 + $0x134] sm:$0xf] %vm1419_vm1, %v7749_v21  ;;  %v1731_v0 = vshll.u32 %v1398_v25, 16  ;;  %v2262_v56 = vrot.slane %v1398_v25, 5  ;;  %v1735_v22 = vshrl.u32 %v1398_v25, 16  ;;  %v3083_v62 = vrot.slane %v1398_v25, 7 }
 0x274   :  { %3419 = vst.msk [vmem:[#allocation2 + $0x128] sm:$0xf] %vm1419_vm1, %v1398_v25  ;;  %v1745_v37 = vshrl.u32 %v7749_v21, 16  ;;  %2748 = vrot.lane.b32.xlu2 %v2599_v14, %s6428_s24  ;;  %v1741_v59 = vshll.u32 %v7749_v21, 16  ;;  %v2265_v54 = vrot.slane %v7749_v21, 5 }
 0x275   :  { %1446 = vst.msk [vmem:[#allocation2 + $0x138] sm:$0xf] %vm1419_vm1, %v1398_v25  ;;  %v7770_v7 = vrot.slane %v1731_v0, 5  ;;  %v7774_v18 = vsel %vm7210_vm7, %v2261_v45, %v2262_v56  ;;  %v1737_v49 = vrot.slane %v1735_v22, 4  ;;  %v2621_v38 = vrot.slane %v1735_v22, 7 }
 0x276   :  { %10733 = vst [vmem:[#allocation35_spill] sm:$0xff] %v7774_v18  ;;  %v7779_v1 = vpop.f32.mrf.mxu0  ;;  %2369 = vrot.lane.b32.xlu0 %v2251_v36, %s6429_s22  ;;  %v7785_v14 = vsel %vm7196_vm6, %v3082_v9, %v3083_v62  ;;  %v7787_v6 = vrot.slane %v1745_v37, 7  ;;  %v6274_v45 = vpop.permute.xlu2 %6273  ;;  %v2264_v36 = vrot.slane %v2262_v56, 4 }
 0x277   :  { %10732 = vst [vmem:[#allocation34_spill] sm:$0xff] %v7770_v7  ;;  %v1738_v60 = vor.u32 %v1737_v49, %v7770_v7  ;;  %v6276_v22 = vunpack.i.h.bf16 %v6274_v45  ;;  %v6275_v9 = vunpack.i.l.bf16 %v6274_v45  ;;  %v2622_v34 = vor.u32 %v2621_v38, %v1731_v0 }
 0x278   :  { %1447 = vst.msk [vmem:[#allocation2 + $0x144] sm:$0xf] %vm1419_vm1, %v7749_v21  ;;  %2373 = vrot.lane.b32.xlu1 %v2257_v50, %s6429_s22  ;;  %v2626_v47 = vor.u32 %v7787_v6, %v1741_v59  ;;  %v7806_v56 = vsel %vm7210_vm7, %v2264_v36, %v2265_v54  ;;  %v10735_v0 = vrot.slane %v7481_v44, 5  ;;  %v1694_v44 = vsel %vm7233_vm10, %v7751_v5, %v7577_v43 }
 0x279   :  { %10734 = vst [vmem:[#allocation36_spill] sm:$0xff] %v7785_v14  ;;  %v7799_v58 = vrot.slane %v1738_v60, 4  ;;  %v7801_v14 = vrot.slane %v1741_v59, 5  ;;  %v1352_v49 = vmax.f32 %v7283_v55, %v6276_v22  ;;  %v1351_v18 = vmax.f32 %v7287_v24, %v6275_v9 }
 0x27a   :  { %2924 = vst.msk [vmem:[#allocation2 + $0x130] sm:$0xf] %vm1419_vm1, %v1398_v25  ;;  %v2624_v25 = vrot.slane %v2621_v38, 4  ;;  %v3174_v7 = vpop.permute.xlu0 %3173  ;;  %v2352_v45 = vpop.permute.xlu1 %2351  ;;  %v7812_v50 = vsel %vm7260_vm13, %v2620_v52, %v2622_v34  ;;  %v3085_v60 = vrot.slane %v3083_v62, 4  ;;  %v2248_v59 = vsel %vm7210_vm7, %v2246_v30, %v10735_v0 }
 0x27b   :  { %2925 = vst.msk [vmem:[#allocation2 + $0x13c] sm:$0xf] %vm1419_vm1, %v7749_v21  ;;  %v3086_v34 = vrot.slane %v7749_v21, 7  ;;  %v7828_v52 = vpack.c.bf16 %v1352_v49, %v1352_v49  ;;  %v7830_v62 = vpack.c.bf16 %v1351_v18, %v1351_v18  ;;  %v1747_v30 = vrot.slane %v1745_v37, 4 }
 0x27c   :  { %3303 = vst.msk [vmem:[#allocation2 + $0x88] sm:$0xf] %vm2468_vm15, %v3174_v7  ;;  %v7825_v24 = vsel %vm7260_vm13, %v2624_v25, %v2626_v47  ;;  %v735_v7 = vmul.f32 %v7538_v41, %v7747_v2  ;;  %v616_v47 = vadd.f32 %v7571_v3, %v6648_v4  ;;  %2367 = vrot.lane.b32.xlu2 %v2248_v59, %s6429_s22  ;;  %v2604_v21 = vrot.slane %v7649_v11, 4 }
 0x27d   :  { %3359 = vst.msk [vmem:[#allocation2 + $0x88] sm:$0xf] %vm2851_vm0, %v7730_v53  ;;  %v7847_v18 = vsel %vm7196_vm6, %v3085_v60, %v3086_v34  ;;  %v1714_v4 = vsel %vm7233_vm10, %v7684_v32, %v7758_v29  ;;  %v1748_v3 = vor.u32 %v1747_v30, %v7801_v14  ;;  %v1751_v11 = vshll.u32 %v7830_v62, 16 }
 0x27e   :  { %2481 = vst.msk [vmem:[#allocation2 + $0x90] sm:$0xf] %vm2468_vm15, %v2352_v45  ;;  %v7851_v43 = vpop.f32.mrf.mxu0  ;;  %1987 = vrot.lane.b32.xlu0 %v1694_v44, %s6430_s0  ;;  %v3089_v2 = vrot.slane %v7830_v62, 7  ;;  %v2354_v5 = vpop.permute.xlu2 %2353  ;;  %v2267_v37 = vrot.slane %v2265_v54, 4  ;;  %v2268_v38 = vrot.slane %v7830_v62, 5  ;;  %v1755_v36 = vshrl.u32 %v7830_v62, 16 }
 0x27f   :  { %3422 = vst.msk [vmem:[#allocation2 + $0x14c] sm:$0xf] %vm1419_vm1, %v7828_v52  ;;  %v3088_v22 = vrot.slane %v3086_v34, 4  ;;  %v7868_v32 = vrot.slane %v1748_v3, 4  ;;  %v7870_v9 = vrot.slane %v1751_v11, 5  ;;  %v10644_v49 = vrot.slane %v7828_v52, 7 }
 0x280   :  { %3421 = vst.msk [vmem:[#allocation2 + $0x140] sm:$0xf] %vm1419_vm1, %v7830_v62  ;;  %1991 = vrot.lane.b32.xlu1 %v1714_v4, %s6430_s0  ;;  %v3091_v25 = vrot.slane %v3089_v2, 4  ;;  %v7877_v54 = vsel %vm7210_vm7, %v2267_v37, %v2268_v38  ;;  %v1757_v45 = vrot.slane %v1755_v36, 4  ;;  %v1761_v60 = vshll.u32 %v7828_v52, 16 }
 0x281   :  { %1448 = vst.msk [vmem:[#allocation2 + $0x150] sm:$0xf] %vm1419_vm1, %v7830_v62  ;;  %v1765_v0 = vshrl.u32 %v7828_v52, 16  ;;  %v736_v59 = vmul.f32 %v7538_v41, %v616_v47  ;;  %v2629_v30 = vrot.slane %v1755_v36, 7  ;;  %v836_v4 = vmax.f32 %v7735_v28, 0.0 }
 0x282   :  { %1449 = vst.msk [vmem:[#allocation2 + $0x15c] sm:$0xf] %vm1419_vm1, %v7828_v52  ;;  %v7892_v44 = vsel %vm7196_vm6, %v3091_v25, %v10644_v49  ;;  %v10736_v47 = vshll.u32 %v7617_v16, 16  ;;  %v1758_v3 = vor.u32 %v1757_v45, %v7870_v9  ;;  %v7903_v37 = vsel %vm7196_vm6, %v3088_v22, %v3089_v2 }
 0x283   :  { %2926 = vst.msk [vmem:[#allocation2 + $0x148] sm:$0xf] %vm1419_vm1, %v7830_v62  ;;  %v2628_v36 = vrot.slane %v7787_v6, 4  ;;  %v2630_v25 = vor.u32 %v2629_v30, %v1751_v11  ;;  %v2632_v34 = vrot.slane %v2629_v30, 4  ;;  %v7910_v55 = vrot.slane %v1765_v0, 7 }
 0x284   :  { %2927 = vst.msk [vmem:[#allocation2 + $0x154] sm:$0xf] %vm1419_vm1, %v7828_v52  ;;  %v2614_v62 = vor.u32 %v7663_v46, %v10736_v47  ;;  %v7913_v49 = vadd.f32 %v7550_v10, %v735_v7  ;;  %3193 = vrot.lane.b32.xlu2 %v7690_v17, %s6429_s22  ;;  %v2607_v46 = vsel %vm7260_vm13, %v2604_v21, %v7695_v35  ;;  %v7920_v2 = vrot.slane %v1758_v3, 4 }
 0x285   :  { %2864 = vst.msk [vmem:[#allocation2 + $0x90] sm:$0xf] %vm2851_vm0, %v7730_v53  ;;  %v7922_v53 = vrot.slane %v1761_v60, 5  ;;  %v7925_v6 = vadd.f32 %v7550_v10, %v736_v59  ;;  %v621_v11 = vadd.f32 %v7656_v23, %v6665_v12  ;;  %v7932_v7 = vsel %vm7260_vm13, %v2628_v36, %v2630_v25 }
 0x286   :  { %2752 = vrot.lane.b32.xlu0 %v2607_v46, %s6428_s24  ;;  %v2634_v17 = vor.u32 %v7910_v55, %v1761_v60  ;;  %v619_v35 = vadd.f32 %v7602_v42, %v6656_v8  ;;  %v1972_v21 = vpop.permute.xlu2 %1971  ;;  %v10737_v22 = vrot.slane %v7605_v15, 4  ;;  %v3077_v59 = vrot.slane %v7617_v16, 7  ;;  %v630_v23 = vpop.f32.mrf.mxu0 }
 0x287   :  { %2100 = vst.msk [vmem:[#allocation2 + $0x9c] sm:$0xf] %vm2086_vm14, %v1972_v21  ;;  %v10738_v8 = vshrl.u32 %v7617_v16, 16  ;;  %v2271_v30 = vrot.slane %v7828_v52, 5  ;;  %v2270_v47 = vrot.slane %v2268_v38, 4  ;;  %v838_v3 = vmax.f32 %v7925_v6, 0.0 }
 0x288   :  { %v2615_v45 = vsel %vm7260_vm13, %v10737_v22, %v2614_v62  ;;  %v3176_v60 = vpop.permute.xlu0 %3175  ;;  %v7952_v15 = vsel %vm7260_vm13, %v2632_v34, %v2634_v17  ;;  %v835_v62 = vmax.f32 %v7726_v27, 0.0  ;;  %2970 = vst.msk [vmem:[#allocation2 + $0x94] sm:$0xf] %vm2086_vm14, %v1972_v21  ;;  %v738_v36 = vmul.f32 %v7538_v41, %v621_v11 }
 0x289   :  { %2756 = vrot.lane.b32.xlu1 %v2615_v45, %s6428_s24  ;;  %v1717_v42 = vrot.slane %v10738_v8, 4  ;;  %2482 = vst.msk [vmem:[#allocation2 + $0x9c] sm:$0xf] %vm2468_vm15, %v2354_v5  ;;  %v10739_v46 = vrot.slane %v7366_v19, 7  ;;  %v7966_v34 = vsel %vm7210_vm7, %v2270_v47, %v2271_v30  ;;  %v6231_v38 = vunpack.i.h.bf16 %v7343_v20  ;;  %v10740_v47 = vld [vmem:[#allocation6_spill] sm:$0xff] }
 0x28a   :  { %v3178_v25 = vpop.permute.xlu1 %3177  ;;  %v6230_v17 = vunpack.i.l.bf16 %v7343_v20  ;;  %v631_v21 = vadd.f32 %v630_v23, %v6699_v31  ;;  %3304 = vst.msk [vmem:[#allocation2 + $0x94] sm:$0xf] %vm2468_vm15, %v3176_v60  ;;  %v6282_v19 = vpack.i.bf16 %v836_v4, %v835_v62  ;;  %v837_v5 = vmax.f32 %v7913_v49, 0.0 }
 0x28b   :  { %v3076_v22 = vrot.slane %v10739_v46, 4  ;;  %v737_v11 = vmul.f32 %v7538_v41, %v619_v35  ;;  %v1718_v20 = vor.u32 %v1717_v42, %v7758_v29  ;;  %v629_v31 = vadd.f32 %v7851_v43, %v6690_v26  ;;  %v10742_v26 = vld [vmem:[#allocation5_spill] sm:$0xff] }
 0x28c   :  { %v7987_v23 = vadd.f32 %v7550_v10, %v738_v36  ;;  %v6292_v35 = vpack.i.bf16 %v838_v3, %v837_v5  ;;  %v742_v60 = vmul.f32 %v7538_v41, %v631_v21  ;;  %v10741_v29 = vmax.f32 %v10740_v47, 0.0 }
 0x28d   :  { %v3078_v45 = vsel %vm7196_vm6, %v3076_v22, %v3077_v59  ;;  %v10743_v43 = vmax.f32 %v10742_v26, 0.0  ;;  %v8004_v36 = vadd.f32 %v7550_v10, %v737_v11  ;;  %v741_v21 = vmul.f32 %v7538_v41, %v629_v31 }
 0x28e   :  { %3195 = vrot.lane.b32.xlu2 %v3078_v45, %s6429_s22  ;;  %6283 = vrot.lane.b32.xlu0 %v6282_v19, %s6428_s24  ;;  %v2737_v8 = vpop.permute.xlu2 %2736  ;;  %v7997_v42 = vmax.f32 %v10741_v29, %v6231_v38  ;;  %v1719_v19 = vrot.slane %v1718_v20, 4  ;;  %v840_v38 = vmax.f32 %v7987_v23, 0.0  ;;  %v1767_v28 = vrot.slane %v1765_v0, 4 }
 0x28f   :  { %v8001_v46 = vmax.f32 %v10743_v43, %v6230_v17  ;;  %2865 = vst.msk [vmem:[#allocation2 + $0x9c] sm:$0xf] %vm2851_vm0, %v2737_v8  ;;  %v8013_v17 = vadd.f32 %v7550_v10, %v742_v60  ;;  %v839_v11 = vmax.f32 %v8004_v36, 0.0  ;;  %v10744_v43 = vld [vmem:[#allocation4_spill] sm:$0xff] }
 0x290   :  { %v1974_v22 = vpop.permute.xlu0 %1973  ;;  %3360 = vst.msk [vmem:[#allocation2 + $0x94] sm:$0xf] %vm2851_vm0, %v2737_v8  ;;  %v1724_v20 = vsel %vm7233_vm10, %v1719_v19, %v7669_v63  ;;  %v10745_v19 = vld [vmem:[#allocation3_spill] sm:$0xff]  ;;  %v1768_v49 = vor.u32 %v1767_v28, %v7922_v53 }
 0x291   :  { %6293 = vrot.lane.b32.xlu1 %v6292_v35, %s6428_s24  ;;  %2101 = vst.msk [vmem:[#allocation2 + $0xa8] sm:$0xf] %vm2086_vm14, %v1974_v22  ;;  %v6287_v31 = vpack.i.bf16 %v7997_v42, %v8001_v46  ;;  %v8024_v35 = vadd.f32 %v7550_v10, %v741_v21  ;;  %v6297_v60 = vpack.i.bf16 %v840_v38, %v839_v11 }
 0x292   :  { %v3180_v45 = vpop.permute.xlu1 %3179  ;;  %2971 = vst.msk [vmem:[#allocation2 + $0xa0] sm:$0xf] %vm2086_vm14, %v1974_v22  ;;  %v626_v22 = vadd.f32 %v7779_v1, %v10744_v43  ;;  %v624_v21 = vadd.f32 %v7715_v33, %v10745_v19  ;;  %v10747_v33 = vrot.slane %v7615_v61, 7  ;;  %v8178_v28 = vrot.slane %v1768_v49, 4 }
 0x293   :  { %3305 = vst.msk [vmem:[#allocation2 + $0xa0] sm:$0xf] %vm2468_vm15, %v3178_v25  ;;  %v844_v25 = vmax.f32 %v8013_v17, 0.0  ;;  %v843_v47 = vmax.f32 %v8024_v35, 0.0 }
 0x294   :  { %v739_v1 = vmul.f32 %v7538_v41, %v624_v21 }
 0x295   :  { %v6307_v26 = vpack.i.bf16 %v844_v25, %v843_v47 }
 0x296   :  { %1993 = vrot.lane.b32.xlu2 %v1724_v20, %s6430_s0  ;;  %6288 = vrot.lane.b32.xlu0 %v6287_v31, %s6429_s22  ;;  %v2356_v8 = vpop.permute.xlu2 %2355  ;;  %v10746_v20 = vld [vmem:[#allocation30_spill] sm:$0xff] }
 0x297   :  { %2483 = vst.msk [vmem:[#allocation2 + $0xa8] sm:$0xf] %vm2468_vm15, %v2356_v8 }
 0x298   :  { %v2739_v63 = vpop.permute.xlu0 %2738 }
 0x299   :  { %6298 = vrot.lane.b32.xlu1 %v6297_v60, %s6428_s24  ;;  %2866 = vst.msk [vmem:[#allocation2 + $0xa8] sm:$0xf] %vm2851_vm0, %v2739_v63  ;;  %v740_v60 = vmul.f32 %v7538_v41, %v626_v22  ;;  %v8065_v22 = vadd.f32 %v7550_v10, %v739_v1 }
 0x29a   :  { %3361 = vst.msk [vmem:[#allocation2 + $0xa0] sm:$0xf] %vm2851_vm0, %v2739_v63  ;;  %v1978_v29 = vpop.permute.xlu1 %1977  ;;  %v3079_v63 = vrot.slane %v3077_v59, 4 }
 0x29b   :  { %2103 = vst.msk [vmem:[#allocation2 + $0xc0] sm:$0xf] %vm2086_vm14, %v1978_v29  ;;  %v841_v19 = vmax.f32 %v8065_v22, 0.0 }
 0x29c   :  { %2973 = vst.msk [vmem:[#allocation2 + $0xb8] sm:$0xf] %vm2086_vm14, %v1978_v29  ;;  %v3081_v43 = vsel %vm7196_vm6, %v3079_v63, %v10747_v33 }
 0x29e   :  { %6308 = vrot.lane.b32.xlu2 %v6307_v26, %s6428_s24  ;;  %2371 = vrot.lane.b32.xlu0 %v10746_v20, %s6429_s22  ;;  %v3182_v31 = vpop.permute.xlu2 %3181  ;;  %v8058_v26 = vadd.f32 %v7550_v10, %v740_v60 }
 0x29f   :  { %3307 = vst.msk [vmem:[#allocation2 + $0xb8] sm:$0xf] %vm2468_vm15, %v3182_v31 }
 0x2a0   :  { %v2358_v8 = vpop.permute.xlu0 %2357  ;;  %v842_v59 = vmax.f32 %v8058_v26, 0.0 }
 0x2a2   :  { %v2743_v29 = vpop.permute.xlu1 %2742  ;;  %v6302_v10 = vpack.i.bf16 %v842_v59, %v841_v19 }
 0x2a3   :  { %3363 = vst.msk [vmem:[#allocation2 + $0xb8] sm:$0xf] %vm2851_vm0, %v2743_v29 }
 0x2a6   :  { %3197 = vrot.lane.b32.xlu0 %v3081_v43, %s6429_s22  ;;  %v3184_v16 = vpop.permute.xlu2 %3183 }
 0x2a8   :  { %v1976_v41 = vpop.permute.xlu0 %1975 }
 0x2a9   :  { %2102 = vst.msk [vmem:[#allocation2 + $0xb4] sm:$0xf] %vm2086_vm14, %v1976_v41 }
 0x2aa   :  { %2972 = vst.msk [vmem:[#allocation2 + $0xac] sm:$0xf] %vm2086_vm14, %v1976_v41  ;;  %v2362_v21 = vpop.permute.xlu1 %2361 }
 0x2ab   :  { %2484 = vst.msk [vmem:[#allocation2 + $0xb4] sm:$0xf] %vm2468_vm15, %v2358_v8 }
 0x2ac   :  { %3306 = vst.msk [vmem:[#allocation2 + $0xac] sm:$0xf] %vm2468_vm15, %v3180_v45 }
 0x2ae   :  { %6303 = vrot.lane.b32.xlu0 %v6302_v10, %s6428_s24  ;;  %v1982_v61 = vpop.permute.xlu2 %1981 }
 0x2af   :  { %2105 = vst.msk [vmem:[#allocation2 + $0xd8] sm:$0xf] %vm2086_vm14, %v1982_v61 }
 0x2b0   :  { %v2741_v20 = vpop.permute.xlu0 %2740  ;;  %2975 = vst.msk [vmem:[#allocation2 + $0xd0] sm:$0xf] %vm2086_vm14, %v1982_v61 }
 0x2b1   :  { %2867 = vst.msk [vmem:[#allocation2 + $0xb4] sm:$0xf] %vm2851_vm0, %v2741_v20 }
 0x2b2   :  { %v1980_v31 = vpop.permute.xlu1 %1979  ;;  %3362 = vst.msk [vmem:[#allocation2 + $0xac] sm:$0xf] %vm2851_vm0, %v2741_v20 }
 0x2b3   :  { %2104 = vst.msk [vmem:[#allocation2 + $0xcc] sm:$0xf] %vm2086_vm14, %v1980_v31 }
 0x2b4   :  { %2974 = vst.msk [vmem:[#allocation2 + $0xc4] sm:$0xf] %vm2086_vm14, %v1980_v31  ;;  %v10748_v31 = vld [vmem:[#allocation31_spill] sm:$0xff] }
 0x2b5   :  { %2486 = vst.msk [vmem:[#allocation2 + $0xcc] sm:$0xf] %vm2468_vm15, %v2362_v21 }
 0x2b6   :  { %3308 = vst.msk [vmem:[#allocation2 + $0xc4] sm:$0xf] %vm2468_vm15, %v3184_v16  ;;  %v2747_v45 = vpop.permute.xlu2 %2746 }
 0x2b8   :  { %v2360_v60 = vpop.permute.xlu0 %2359 }
 0x2b9   :  { %2485 = vst.msk [vmem:[#allocation2 + $0xc0] sm:$0xf] %vm2468_vm15, %v2360_v60 }
 0x2ba   :  { %2868 = vst.msk [vmem:[#allocation2 + $0xc0] sm:$0xf] %vm2851_vm0, %v2743_v29  ;;  %v2745_v8 = vpop.permute.xlu1 %2744 }
 0x2bb   :  { %2869 = vst.msk [vmem:[#allocation2 + $0xcc] sm:$0xf] %vm2851_vm0, %v2745_v8 }
 0x2bc   :  { %3364 = vst.msk [vmem:[#allocation2 + $0xc4] sm:$0xf] %vm2851_vm0, %v2745_v8  ;;  %v10750_v8 = vld [vmem:[#allocation32_spill] sm:$0xff] }
 0x2be   :  { %v2366_v63 = vpop.permute.xlu2 %2365 }
 0x2c0   :  { %v3186_v1 = vpop.permute.xlu0 %3185 }
 0x2c1   :  { %3309 = vst.msk [vmem:[#allocation2 + $0xd0] sm:$0xf] %vm2468_vm15, %v3186_v1  ;;  %v10751_v1 = vmax.f32 %v10750_v8, 0.0 }
 0x2c2   :  { %3365 = vst.msk [vmem:[#allocation2 + $0xd0] sm:$0xf] %vm2851_vm0, %v2747_v45  ;;  %v2364_v33 = vpop.permute.xlu1 %2363 }
 0x2c3   :  { %2487 = vst.msk [vmem:[#allocation2 + $0xd8] sm:$0xf] %vm2468_vm15, %v2364_v33 }
 0x2c4   :  { %2870 = vst.msk [vmem:[#allocation2 + $0xd8] sm:$0xf] %vm2851_vm0, %v2747_v45  ;;  %v10749_v45 = vmax.f32 %v10748_v31, 0.0 }
 0x2c6   :  { %v1984_v43 = vpop.permute.xlu2 %1983 }
 0x2c7   :  { %2106 = vst.msk [vmem:[#allocation2 + $0xe4] sm:$0xf] %vm2086_vm14, %v1984_v43 }
 0x2c8   :  { %v3188_v29 = vpop.permute.xlu0 %3187  ;;  %2976 = vst.msk [vmem:[#allocation2 + $0xdc] sm:$0xf] %vm2086_vm14, %v1984_v43 }
 0x2c9   :  { %2488 = vst.msk [vmem:[#allocation2 + $0xe4] sm:$0xf] %vm2468_vm15, %v2366_v63 }
 0x2ca   :  { %v3190_v16 = vpop.permute.xlu1 %3189  ;;  %3310 = vst.msk [vmem:[#allocation2 + $0xdc] sm:$0xf] %vm2468_vm15, %v3188_v29 }
 0x2ce   :  { %v2749_v41 = vpop.permute.xlu2 %2748 }
 0x2cf   :  { %2871 = vst.msk [vmem:[#allocation2 + $0xe4] sm:$0xf] %vm2851_vm0, %v2749_v41 }
 0x2d0   :  { %v6279_v21 = vpop.permute.xlu0 %6278  ;;  %3366 = vst.msk [vmem:[#allocation2 + $0xdc] sm:$0xf] %vm2851_vm0, %v2749_v41 }
 0x2d1   :  { %v6281_v10 = vunpack.i.h.bf16 %v6279_v21  ;;  %v6280_v61 = vunpack.i.l.bf16 %v6279_v21 }
 0x2d2   :  { %v3192_v20 = vpop.permute.xlu1 %3191 }
 0x2d3   :  { %v8103_v60 = vmax.f32 %v10749_v45, %v6281_v10  ;;  %v8107_v33 = vmax.f32 %v10751_v1, %v6280_v61 }
 0x2d5   :  { %v6312_v63 = vpack.i.bf16 %v8103_v60, %v8107_v33 }
 0x2d6   :  { %v2368_v43 = vpop.permute.xlu2 %2367 }
 0x2d7   :  { %6313 = vrot.lane.b32.xlu2 %v6312_v63, %s6429_s22 }
 0x2d8   :  { %v1986_v29 = vpop.permute.xlu0 %1985 }
 0x2d9   :  { %2107 = vst.msk [vmem:[#allocation2 + $0xf0] sm:$0xf] %vm2086_vm14, %v1986_v29 }
 0x2da   :  { %2977 = vst.msk [vmem:[#allocation2 + $0xe8] sm:$0xf] %vm2086_vm14, %v1986_v29  ;;  %v1990_v41 = vpop.permute.xlu1 %1989 }
 0x2db   :  { %2489 = vst.msk [vmem:[#allocation2 + $0xf0] sm:$0xf] %vm2468_vm15, %v2368_v43 }
 0x2dc   :  { %3311 = vst.msk [vmem:[#allocation2 + $0xe8] sm:$0xf] %vm2468_vm15, %v3190_v16 }
 0x2dd   :  { %2109 = vst.msk [vmem:[#allocation2 + $0x108] sm:$0xf] %vm2086_vm14, %v1990_v41 }
 0x2de   :  { %2979 = vst.msk [vmem:[#allocation2 + $0x100] sm:$0xf] %vm2086_vm14, %v1990_v41  ;;  %v3194_v21 = vpop.permute.xlu2 %3193 }
 0x2df   :  { %3313 = vst.msk [vmem:[#allocation2 + $0x100] sm:$0xf] %vm2468_vm15, %v3194_v21 }
 0x2e0   :  { %v2751_v10 = vpop.permute.xlu0 %2750 }
 0x2e1   :  { %2872 = vst.msk [vmem:[#allocation2 + $0xf0] sm:$0xf] %vm2851_vm0, %v2751_v10 }
 0x2e2   :  { %3367 = vst.msk [vmem:[#allocation2 + $0xe8] sm:$0xf] %vm2851_vm0, %v2751_v10  ;;  %v8121_v61 = vpop.permute.xlu1 %2754 }
 0x2e3   :  { %3369 = vst.msk [vmem:[#allocation2 + $0x100] sm:$0xf] %vm2851_vm0, %v8121_v61 }
 0x2e8   :  { %v3196_v31 = vpop.permute.xlu2 %3195  ;;  %v2370_v45 = vpop.permute.xlu0 %2369 }
 0x2ea   :  { %v2374_v16 = vpop.permute.xlu1 %2373 }
 0x2f0   :  { %v1994_v8 = vpop.permute.xlu2 %1993  ;;  %v1988_v1 = vpop.permute.xlu0 %1987 }
 0x2f1   :  { %2111 = vst.msk [vmem:[#allocation2 + $0x120] sm:$0xf] %vm2086_vm14, %v1994_v8 }
 0x2f2   :  { %2981 = vst.msk [vmem:[#allocation2 + $0x118] sm:$0xf] %vm2086_vm14, %v1994_v8  ;;  %v1992_v63 = vpop.permute.xlu1 %1991 }
 0x2f3   :  { %2108 = vst.msk [vmem:[#allocation2 + $0xfc] sm:$0xf] %vm2086_vm14, %v1988_v1 }
 0x2f4   :  { %2978 = vst.msk [vmem:[#allocation2 + $0xf4] sm:$0xf] %vm2086_vm14, %v1988_v1 }
 0x2f5   :  { %2490 = vst.msk [vmem:[#allocation2 + $0xfc] sm:$0xf] %vm2468_vm15, %v2370_v45 }
 0x2f6   :  { %3312 = vst.msk [vmem:[#allocation2 + $0xf4] sm:$0xf] %vm2468_vm15, %v3192_v20 }
 0x2f7   :  { %2110 = vst.msk [vmem:[#allocation2 + $0x114] sm:$0xf] %vm2086_vm14, %v1992_v63 }
 0x2f8   :  { %2980 = vst.msk [vmem:[#allocation2 + $0x10c] sm:$0xf] %vm2086_vm14, %v1992_v63  ;;  %v2753_v43 = vpop.permute.xlu0 %2752 }
 0x2f9   :  { %2492 = vst.msk [vmem:[#allocation2 + $0x114] sm:$0xf] %vm2468_vm15, %v2374_v16 }
 0x2fa   :  { %3314 = vst.msk [vmem:[#allocation2 + $0x10c] sm:$0xf] %vm2468_vm15, %v3196_v31 }
 0x2fb   :  { %2873 = vst.msk [vmem:[#allocation2 + $0xfc] sm:$0xf] %vm2851_vm0, %v2753_v43  ;;  %v2757_v29 = vpop.permute.xlu1 %2756 }
 0x2fc   :  { %3368 = vst.msk [vmem:[#allocation2 + $0xf4] sm:$0xf] %vm2851_vm0, %v2753_v43 }
 0x2fd   :  { %2875 = vst.msk [vmem:[#allocation2 + $0x114] sm:$0xf] %vm2851_vm0, %v2757_v29 }
 0x2fe   :  { %3370 = vst.msk [vmem:[#allocation2 + $0x10c] sm:$0xf] %vm2851_vm0, %v2757_v29 }
 0x300   :  { %v6284_v41 = vpop.permute.xlu0 %6283 }
 0x301   :  { %v6286_v20 = vunpack.i.h.bf16 %v6284_v41  ;;  %v6285_v21 = vunpack.i.l.bf16 %v6284_v41 }
 0x303   :  { %v6294_v10 = vpop.permute.xlu1 %6293  ;;  %v8141_v45 = vmax.f32 %v836_v4, %v6286_v20  ;;  %v8145_v31 = vmax.f32 %v835_v62, %v6285_v21 }
 0x304   :  { %v6296_v16 = vunpack.i.h.bf16 %v6294_v10  ;;  %v6295_v8 = vunpack.i.l.bf16 %v6294_v10 }
 0x305   :  { %v6317_v43 = vpack.i.bf16 %v8141_v45, %v8145_v31 }
 0x306   :  { %v8149_v1 = vmax.f32 %v838_v3, %v6296_v16  ;;  %v8153_v63 = vmax.f32 %v837_v5, %v6295_v8  ;;  %v10752_v8 = vrot.slane %v7828_v52, 7 }
 0x307   :  { %6318 = vrot.lane.b32.xlu2 %v6317_v43, %s6429_s22 }
 0x308   :  { %v6322_v27 = vpack.i.bf16 %v8149_v1, %v8153_v63  ;;  %v6289_v4 = vpop.permute.xlu0 %6288  ;;  %v3094_v43 = vrot.slane %v10752_v8, 4 }
 0x309   :  { %v6291_v62 = vunpack.i.h.bf16 %v6289_v4  ;;  %v6290_v6 = vunpack.i.l.bf16 %v6289_v4 }
 0x30a   :  { %6323 = vrot.lane.b32.xlu1 %v6322_v27, %s6429_s22 }
 0x30b   :  { %v6299_v3 = vpop.permute.xlu1 %6298  ;;  %v1354_v5 = vmax.f32 %v7997_v42, %v6291_v62  ;;  %v1353_v29 = vmax.f32 %v8001_v46, %v6290_v6  ;;  %v2273_v42 = vrot.slane %v2271_v30, 4  ;;  %v2636_v46 = vrot.slane %v7910_v55, 4 }
 0x30c   :  { %v6301_v41 = vunpack.i.h.bf16 %v6299_v3  ;;  %v6300_v20 = vunpack.i.l.bf16 %v6299_v3 }
 0x30d   :  { %v8166_v0 = vpack.c.bf16 %v1354_v5, %v1354_v5  ;;  %v1402_v21 = vpack.c.bf16 %v1353_v29, %v1353_v29 }
 0x30e   :  { %v8170_v10 = vmax.f32 %v840_v38, %v6301_v41  ;;  %v8174_v16 = vmax.f32 %v839_v11, %v6300_v20 }
 0x30f   :  { %3424 = vst.msk [vmem:[#allocation2 + $0x164] sm:$0xf] %vm1419_vm1, %v8166_v0  ;;  %v1771_v38 = vshll.u32 %v1402_v21, 16  ;;  %v1775_v36 = vshrl.u32 %v1402_v21, 16  ;;  %v1781_v11 = vshll.u32 %v8166_v0, 16  ;;  %v3095_v4 = vrot.slane %v1402_v21, 7 }
 0x310   :  { %v6327_v23 = vpack.i.bf16 %v8170_v10, %v8174_v16  ;;  %3423 = vst.msk [vmem:[#allocation2 + $0x158] sm:$0xf] %vm1419_vm1, %v1402_v21  ;;  %v2372_v27 = vpop.permute.xlu0 %2371  ;;  %v1785_v62 = vshrl.u32 %v8166_v0, 16  ;;  %v2274_v52 = vrot.slane %v1402_v21, 5  ;;  %v10645_v30 = vrot.slane %v8166_v0, 7 }
 0x311   :  { %1450 = vst.msk [vmem:[#allocation2 + $0x168] sm:$0xf] %vm1419_vm1, %v1402_v21  ;;  %v8193_v55 = vrot.slane %v1771_v38, 5  ;;  %v1777_v6 = vrot.slane %v1775_v36, 4  ;;  %v8195_v3 = vrot.slane %v1781_v11, 5  ;;  %v2637_v49 = vrot.slane %v1775_v36, 7 }
 0x312   :  { %6328 = vrot.lane.b32.xlu0 %v6327_v23, %s6429_s22  ;;  %1451 = vst.msk [vmem:[#allocation2 + $0x174] sm:$0xf] %vm1419_vm1, %v8166_v0  ;;  %v8201_v5 = vsel %vm7196_vm6, %v3094_v43, %v3095_v4  ;;  %v8203_v29 = vrot.slane %v1785_v62, 7  ;;  %v8207_v41 = vsel %vm7210_vm7, %v2273_v42, %v2274_v52  ;;  %v3097_v20 = vrot.slane %v3095_v4, 4 }
 0x313   :  { %2928 = vst.msk [vmem:[#allocation2 + $0x160] sm:$0xf] %vm1419_vm1, %v1402_v21  ;;  %v1778_v8 = vor.u32 %v1777_v6, %v8193_v55  ;;  %v2640_v23 = vrot.slane %v2637_v49, 4  ;;  %v2638_v12 = vor.u32 %v2637_v49, %v1771_v38  ;;  %v8224_v21 = vrot.slane %v1785_v62, 4 }
 0x314   :  { %10753 = vst [vmem:[#allocation6_spill] sm:$0xff] %v8203_v29  ;;  %v2642_v43 = vor.u32 %v8203_v29, %v1781_v11  ;;  %v8222_v42 = vsel %vm7196_vm6, %v3097_v20, %v10645_v30  ;;  %v10646_v62 = vrot.slane %v8166_v0, 5  ;;  %v2276_v49 = vrot.slane %v2274_v52, 4 }
 0x315   :  { %2929 = vst.msk [vmem:[#allocation2 + $0x16c] sm:$0xf] %vm1419_vm1, %v8166_v0  ;;  %v8227_v4 = vrot.slane %v1778_v8, 4  ;;  %v8231_v38 = vsel %vm7260_vm13, %v2636_v46, %v2638_v12 }
 0x316   :  { %2491 = vst.msk [vmem:[#allocation2 + $0x108] sm:$0xf] %vm2468_vm15, %v2372_v27  ;;  %v8237_v11 = vsel %vm7260_vm13, %v2640_v23, %v2642_v43  ;;  %v6309_v23 = vpop.permute.xlu2 %6308 }
 0x317   :  { %2874 = vst.msk [vmem:[#allocation2 + $0x108] sm:$0xf] %vm2851_vm0, %v8121_v61  ;;  %v8250_v61 = vsel %vm7210_vm7, %v2276_v49, %v10646_v62  ;;  %v6311_v30 = vunpack.i.h.bf16 %v6309_v23  ;;  %v6310_v6 = vunpack.i.l.bf16 %v6309_v23 }
 0x318   :  { %v3198_v12 = vpop.permute.xlu0 %3197  ;;  %10754 = vst [vmem:[#allocation5_spill] sm:$0xff] %v8250_v61 }
 0x319   :  { %3315 = vst.msk [vmem:[#allocation2 + $0x118] sm:$0xf] %vm2468_vm15, %v3198_v12  ;;  %v8266_v12 = vmax.f32 %v844_v25, %v6311_v30  ;;  %v8270_v26 = vmax.f32 %v843_v47, %v6310_v6 }
 0x31b   :  { %v6337_v22 = vpack.i.bf16 %v8266_v12, %v8270_v26 }
 0x320   :  { %v6304_v46 = vpop.permute.xlu0 %6303 }
 0x321   :  { %v6306_v20 = vunpack.i.h.bf16 %v6304_v46  ;;  %v6305_v8 = vunpack.i.l.bf16 %v6304_v46 }
 0x323   :  { %v8255_v52 = vmax.f32 %v842_v59, %v6306_v20  ;;  %v8259_v43 = vmax.f32 %v841_v19, %v6305_v8 }
 0x325   :  { %v6332_v49 = vpack.i.bf16 %v8255_v52, %v8259_v43 }
 0x327   :  { %6333 = vrot.lane.b32.xlu2 %v6332_v49, %s6429_s22 }
 0x32f   :  { %6338 = vrot.lane.b32.xlu2 %v6337_v22, %s6429_s22 }
 0x331   :  { %v6314_v59 = vpop.permute.xlu2 %6313 }
 0x332   :  { %v6316_v19 = vunpack.i.h.bf16 %v6314_v59  ;;  %v6315_v46 = vunpack.i.l.bf16 %v6314_v59 }
 0x334   :  { %v1324_v20 = vmax.f32 %v8103_v60, %v6316_v19  ;;  %v1323_v8 = vmax.f32 %v8107_v33, %v6315_v46 }
 0x336   :  { %v1373_v23 = vpack.c.bf16 %v1324_v20, %v1324_v20  ;;  %v1372_v17 = vpack.c.bf16 %v1323_v8, %v1323_v8 }
 0x338   :  { %1420 = vst.msk [vmem:[#allocation2] sm:$0xf] %vm1419_vm1, %v1372_v17  ;;  %v5585_v25 = vrot.slane %v1372_v17, 9  ;;  %v2187_v35 = vrot.slane %v1373_v23, 5  ;;  %v1472_v47 = vshrl.u32 %v1372_v17, 16  ;;  %v1485_v30 = vshrl.u32 %v1373_v23, 16 }
 0x339   :  { %1421 = vst.msk [vmem:[#allocation2 + $0xc] sm:$0xf] %vm1419_vm1, %v1373_v23  ;;  %v1475_v6 = vshll.u32 %v1372_v17, 16  ;;  %v1481_v60 = vshll.u32 %v1373_v23, 16 }
 0x33a   :  { %2899 = vst.msk [vmem:[#allocation2 + $0x4] sm:$0xf] %vm1419_vm1, %v1373_v23  ;;  %v2188_v49 = vsel %vm7210_vm7, %v5585_v25, %v2187_v35  ;;  %v1474_v22 = vrot.slane %v1472_v47, 4  ;;  %v2521_v33 = vrot.slane %v1485_v30, 7  ;;  %v5586_v19 = vrot.slane %v1472_v47, 11  ;;  %v6153_v25 = vld [vmem:[%s10596_s4 + $0x88] sm:$0xff] }
 0x33b   :  { %2327 = vrot.lane.b32.xlu0 %v2188_v49, %s6429_s22  ;;  %v1477_v59 = vrot.slane %v1475_v6, 5  ;;  %v1483_v17 = vrot.slane %v1481_v60, 5  ;;  %4370 = vmatpush.bf16.msrb.mxu1 %v6153_v25  ;;  %v6152_v47 = vld [vmem:[%s10596_s4 + $0x80] sm:$0xff] }
 0x33c   :  { %v2522_v46 = vor.u32 %v2521_v33, %v1481_v60 }
 0x33d   :  { %v1478_v20 = vor.u32 %v1477_v59, %v1474_v22 }
 0x33e   :  { %v2523_v8 = vsel %vm7260_vm13, %v5586_v19, %v2522_v46  ;;  %v5587_v19 = vrot.slane %v1373_v23, 11 }
 0x33f   :  { %v1479_v62 = vrot.slane %v1478_v20, 4  ;;  %2710 = vrot.lane.b32.xlu1 %v2523_v8, %s6428_s24  ;;  %4371 = vmatpush.bf16.msrb.mxu1 %v6152_v47  ;;  %v2189_v20 = vrot.slane %v2187_v35, 4  ;;  %v1487_v47 = vrot.slane %v1485_v30, 4 }
 0x341   :  { %v1484_v36 = vsel %vm7233_vm10, %v1479_v62, %v1483_v17 }
 0x343   :  { %1945 = vrot.lane.b32.xlu0 %v1484_v36, %s6430_s0 }
 0x361   :  { %v6319_v6 = vpop.permute.xlu2 %6318 }
 0x362   :  { %v6321_v49 = vunpack.i.h.bf16 %v6319_v6  ;;  %v6320_v22 = vunpack.i.l.bf16 %v6319_v6 }
 0x364   :  { %v1326_v60 = vmax.f32 %v8141_v45, %v6321_v49  ;;  %v1325_v59 = vmax.f32 %v8145_v31, %v6320_v22 }
 0x366   :  { %v8297_v62 = vpack.c.bf16 %v1326_v60, %v1326_v60  ;;  %v1374_v36 = vpack.c.bf16 %v1325_v59, %v1325_v59  ;;  %v1488_v59 = vor.u32 %v1487_v47, %v1483_v17 }
 0x368   :  { %3396 = vst.msk [vmem:[#allocation2 + $0x14] sm:$0xf] %vm1419_vm1, %v8297_v62  ;;  %v3011_v46 = vrot.slane %v1374_v36, 7  ;;  %v2190_v8 = vrot.slane %v1374_v36, 5  ;;  %v1495_v25 = vshrl.u32 %v1374_v36, 16  ;;  %v10647_v6 = vshrl.u32 %v8297_v62, 16 }
 0x369   :  { %3395 = vst.msk [vmem:[#allocation2 + $0x8] sm:$0xf] %vm1419_vm1, %v1374_v36  ;;  %v3014_v23 = vrot.slane %v8297_v62, 7  ;;  %v1491_v35 = vshll.u32 %v1374_v36, 16 }
 0x36a   :  { %1422 = vst.msk [vmem:[#allocation2 + $0x18] sm:$0xf] %vm1419_vm1, %v1374_v36  ;;  %v3012_v45 = vsel %vm7196_vm6, %v5587_v19, %v3011_v46  ;;  %v2191_v31 = vsel %vm7210_vm7, %v2189_v20, %v2190_v8  ;;  %v3013_v49 = vrot.slane %v3011_v46, 4  ;;  %v2525_v30 = vrot.slane %v1495_v25, 7 }
 0x36b   :  { %1423 = vst.msk [vmem:[#allocation2 + $0x24] sm:$0xf] %vm1419_vm1, %v8297_v62  ;;  %3151 = vrot.lane.b32.xlu2 %v3012_v45, %s6429_s22  ;;  %2329 = vrot.lane.b32.xlu1 %v2191_v31, %s6429_s22  ;;  %v8318_v60 = vrot.slane %v10647_v6, 7  ;;  %v1501_v46 = vshll.u32 %v8297_v62, 16  ;;  %v1493_v45 = vrot.slane %v1491_v35, 5  ;;  %v1489_v6 = vrot.slane %v1488_v59, 4 }
 0x36c   :  { %2900 = vst.msk [vmem:[#allocation2 + $0x10] sm:$0xf] %vm1419_vm1, %v1374_v36  ;;  %v3015_v22 = vsel %vm7196_vm6, %v3013_v49, %v3014_v23  ;;  %v2526_v19 = vor.u32 %v2525_v30, %v1491_v35  ;;  %v2524_v36 = vrot.slane %v2521_v33, 4  ;;  %v2528_v27 = vrot.slane %v2525_v30, 4 }
 0x36d   :  { %2901 = vst.msk [vmem:[#allocation2 + $0x1c] sm:$0xf] %vm1419_vm1, %v8297_v62  ;;  %3153 = vrot.lane.b32.xlu0 %v3015_v22, %s6429_s22  ;;  %v2530_v49 = vor.u32 %v8318_v60, %v1501_v46  ;;  %v1494_v17 = vsel %vm7233_vm10, %v1489_v6, %v1493_v45  ;;  %v1497_v47 = vrot.slane %v1495_v25, 4  ;;  %v2192_v35 = vrot.slane %v2190_v8, 4 }
 0x36e   :  { %v2527_v29 = vsel %vm7260_vm13, %v2524_v36, %v2526_v19  ;;  %v2193_v30 = vrot.slane %v8297_v62, 5 }
 0x36f   :  { %v6069_v20 = vld [vmem:[#allocation2 + $0x10] sm:$0xf0]  ;;  %v2531_v33 = vsel %vm7260_vm13, %v2528_v27, %v2530_v49  ;;  %v1498_v22 = vor.u32 %v1497_v47, %v1493_v45  ;;  %v3016_v49 = vrot.slane %v3014_v23, 4 }
 0x370   :  { %v5598_v31 = vld [vmem:[#allocation2 + $0x8] sm:$0xf] }
 0x371   :  { %v5599_v61 = vor.u32 %v6069_v20, %v5598_v31  ;;  %v1499_v19 = vrot.slane %v1498_v22, 4  ;;  %v1503_v31 = vrot.slane %v1501_v46, 5  ;;  %v2195_v46 = vrot.slane %v2193_v30, 4 }
 0x372   :  { %v10755_v22 = vshrl.u32 %v8297_v62, 16 }
 0x373   :  { %5936 = vmatmul.msk.bf16.vlgmr.msrb.gmra.mxu1 %vm4035_vm3, %v5599_v61  ;;  %2712 = vrot.lane.b32.xlu2 %v2527_v29, %s6428_s24  ;;  %v2194_v61 = vsel %vm7210_vm7, %v2192_v35, %v2193_v30  ;;  %v1504_v45 = vsel %vm7233_vm10, %v1499_v19, %v1503_v31 }
 0x374   :  { %1947 = vrot.lane.b32.xlu1 %v1494_v17, %s6430_s0 }
 0x375   :  { %2714 = vrot.lane.b32.xlu0 %v2531_v33, %s6428_s24 }
 0x37b   :  { %2331 = vrot.lane.b32.xlu2 %v2194_v61, %s6429_s22  ;;  %v1507_v61 = vrot.slane %v10755_v22, 4 }
 0x37c   :  { %v6324_v59 = vpop.permute.xlu1 %6323 }
 0x37d   :  { %v6326_v29 = vunpack.i.h.bf16 %v6324_v59  ;;  %v6325_v6 = vunpack.i.l.bf16 %v6324_v59 }
 0x37f   :  { %v1328_v20 = vmax.f32 %v8149_v1, %v6326_v29  ;;  %v1327_v27 = vmax.f32 %v8153_v63, %v6325_v6 }
 0x381   :  { %v8341_v36 = vpack.c.bf16 %v1328_v20, %v1328_v20  ;;  %v8343_v8 = vpack.c.bf16 %v1327_v27, %v1327_v27  ;;  %v6334_v25 = vpop.permute.xlu2 %6333 }
 0x382   :  { %v6336_v17 = vunpack.i.h.bf16 %v6334_v25  ;;  %v6335_v33 = vunpack.i.l.bf16 %v6334_v25 }
 0x383   :  { %3398 = vst.msk [vmem:[#allocation2 + $0x2c] sm:$0xf] %vm1419_vm1, %v8341_v36  ;;  %v3017_v47 = vrot.slane %v8343_v8, 7  ;;  %v2196_v1 = vrot.slane %v8343_v8, 5  ;;  %1949 = vrot.lane.b32.xlu2 %v1504_v45, %s6430_s0  ;;  %v1511_v35 = vshll.u32 %v8343_v8, 16  ;;  %v1515_v23 = vshrl.u32 %v8343_v8, 16 }
 0x384   :  { %3397 = vst.msk [vmem:[#allocation2 + $0x20] sm:$0xf] %vm1419_vm1, %v8343_v8  ;;  %v6329_v63 = vpop.permute.xlu0 %6328  ;;  %v1332_v59 = vmax.f32 %v8255_v52, %v6336_v17  ;;  %v1331_v29 = vmax.f32 %v8259_v43, %v6335_v33  ;;  %v1521_v33 = vshll.u32 %v8341_v36, 16 }
 0x385   :  { %1424 = vst.msk [vmem:[#allocation2 + $0x30] sm:$0xf] %vm1419_vm1, %v8343_v8  ;;  %v6331_v6 = vunpack.i.h.bf16 %v6329_v63  ;;  %v6330_v19 = vunpack.i.l.bf16 %v6329_v63  ;;  %v3018_v30 = vsel %vm7196_vm6, %v3016_v49, %v3017_v47  ;;  %v2197_v62 = vsel %vm7210_vm7, %v2195_v46, %v2196_v1 }
 0x386   :  { %1425 = vst.msk [vmem:[#allocation2 + $0x3c] sm:$0xf] %vm1419_vm1, %v8341_v36  ;;  %v3019_v20 = vrot.slane %v3017_v47, 4  ;;  %v1513_v27 = vrot.slane %v1511_v35, 5  ;;  %v8374_v52 = vpack.c.bf16 %v1332_v59, %v1332_v59  ;;  %v8376_v43 = vpack.c.bf16 %v1331_v29, %v1331_v29  ;;  %3155 = vrot.lane.b32.xlu1 %v3018_v30, %s6429_s22  ;;  %2333 = vrot.lane.b32.xlu0 %v2197_v62, %s6429_s22 }
 0x387   :  { %2902 = vst.msk [vmem:[#allocation2 + $0x28] sm:$0xf] %vm1419_vm1, %v8343_v8  ;;  %v1330_v25 = vmax.f32 %v8170_v10, %v6331_v6  ;;  %v1329_v45 = vmax.f32 %v8174_v16, %v6330_v19  ;;  %v3020_v49 = vrot.slane %v8341_v36, 7  ;;  %v1517_v17 = vrot.slane %v1515_v23, 4 }
 0x388   :  { %2903 = vst.msk [vmem:[#allocation2 + $0x34] sm:$0xf] %vm1419_vm1, %v8341_v36  ;;  %v1508_v47 = vor.u32 %v1507_v61, %v1503_v31  ;;  %v1525_v31 = vshrl.u32 %v8341_v36, 16 }
 0x389   :  { %3402 = vst.msk [vmem:[#allocation2 + $0x5c] sm:$0xf] %vm1419_vm1, %v8374_v52  ;;  %v8390_v10 = vpack.c.bf16 %v1329_v45, %v1329_v45  ;;  %v6339_v16 = vpop.permute.xlu2 %6338  ;;  %v3021_v63 = vsel %vm7196_vm6, %v3019_v20, %v3020_v49  ;;  %v1518_v22 = vor.u32 %v1517_v17, %v1513_v27  ;;  %v8396_v59 = vpack.c.bf16 %v1330_v25, %v1330_v25 }
 0x38a   :  { %3401 = vst.msk [vmem:[#allocation2 + $0x50] sm:$0xf] %vm1419_vm1, %v8376_v43  ;;  %v6072_v46 = vld [vmem:[#allocation2 + $0x28] sm:$0xf0]  ;;  %v6341_v29 = vunpack.i.h.bf16 %v6339_v16  ;;  %v6340_v6 = vunpack.i.l.bf16 %v6339_v16  ;;  %v8405_v20 = vrot.slane %v1521_v33, 5  ;;  %v1509_v25 = vrot.slane %v1508_v47, 4 }
 0x38b   :  { %1428 = vst.msk [vmem:[#allocation2 + $0x60] sm:$0xf] %vm1419_vm1, %v8376_v43  ;;  %v5610_v19 = vld [vmem:[#allocation2 + $0x20] sm:$0xf]  ;;  %3157 = vrot.lane.b32.xlu2 %v3021_v63, %s6429_s22  ;;  %v1519_v30 = vrot.slane %v1518_v22, 4  ;;  %v2533_v17 = vrot.slane %v1515_v23, 7 }
 0x38c   :  { %1429 = vst.msk [vmem:[#allocation2 + $0x6c] sm:$0xf] %vm1419_vm1, %v8374_v52  ;;  %v5611_v61 = vor.u32 %v6072_v46, %v5610_v19  ;;  %v1334_v62 = vmax.f32 %v8266_v12, %v6341_v29  ;;  %v1333_v45 = vmax.f32 %v8270_v26, %v6340_v6  ;;  %v1531_v16 = vshll.u32 %v8390_v10, 16 }
 0x38d   :  { %2906 = vst.msk [vmem:[#allocation2 + $0x58] sm:$0xf] %vm1419_vm1, %v8376_v43  ;;  %v1535_v63 = vshrl.u32 %v8390_v10, 16  ;;  %v1524_v12 = vsel %vm7233_vm10, %v1519_v30, %v8405_v20  ;;  %v1514_v47 = vsel %vm7233_vm10, %v1509_v25, %v1513_v27  ;;  %v3023_v46 = vrot.slane %v8390_v10, 7 }
 0x38e   :  { %2907 = vst.msk [vmem:[#allocation2 + $0x64] sm:$0xf] %vm1419_vm1, %v8374_v52  ;;  %5937 = vmatmul.msk.bf16.gmra.mxu1 %vm4035_vm3, %v5611_v61  ;;  %v8423_v26 = vrot.slane %v1525_v31, 7  ;;  %1953 = vrot.lane.b32.xlu1 %v1524_v12, %s6430_s0  ;;  %v8431_v23 = vrot.slane %v1531_v16, 5  ;;  %v8435_v27 = vpack.c.bf16 %v1334_v62, %v1334_v62  ;;  %v3022_v29 = vrot.slane %v3020_v49, 4 }
 0x38f   :  { %3400 = vst.msk [vmem:[#allocation2 + $0x44] sm:$0xf] %vm1419_vm1, %v8396_v59  ;;  %1951 = vrot.lane.b32.xlu0 %v1514_v47, %s6430_s0  ;;  %v1537_v22 = vrot.slane %v1535_v63, 4  ;;  %v8439_v6 = vpack.c.bf16 %v1333_v45, %v1333_v45  ;;  %v2536_v19 = vrot.slane %v2533_v17, 4  ;;  %v2534_v25 = vor.u32 %v2533_v17, %v1511_v35 }
 0x390   :  { %3399 = vst.msk [vmem:[#allocation2 + $0x38] sm:$0xf] %vm1419_vm1, %v8390_v10  ;;  %v3024_v61 = vsel %vm7196_vm6, %v3022_v29, %v3023_v46  ;;  %v2538_v30 = vor.u32 %v8423_v26, %v1521_v33  ;;  %v1541_v49 = vshll.u32 %v8396_v59, 16  ;;  %v2532_v45 = vrot.slane %v8318_v60, 4 }
 0x391   :  { %1426 = vst.msk [vmem:[#allocation2 + $0x48] sm:$0xf] %vm1419_vm1, %v8390_v10  ;;  %v1538_v62 = vor.u32 %v1537_v22, %v8431_v23  ;;  %v1545_v12 = vshrl.u32 %v8396_v59, 16  ;;  %v2199_v47 = vrot.slane %v8341_v36, 5 }
 0x392   :  { %1427 = vst.msk [vmem:[#allocation2 + $0x54] sm:$0xf] %vm1419_vm1, %v8396_v59  ;;  %v2539_v35 = vsel %vm7260_vm13, %v2536_v19, %v2538_v30  ;;  %v2535_v33 = vsel %vm7260_vm13, %v2532_v45, %v2534_v25  ;;  %v1543_v60 = vrot.slane %v1541_v49, 5  ;;  %v2202_v19 = vrot.slane %v8390_v10, 5 }
 0x393   :  { %2904 = vst.msk [vmem:[#allocation2 + $0x40] sm:$0xf] %vm1419_vm1, %v8390_v10  ;;  %3159 = vrot.lane.b32.xlu2 %v3024_v61, %s6429_s22  ;;  %v1539_v17 = vrot.slane %v1538_v62, 4  ;;  %v2198_v30 = vrot.slane %v2196_v1, 4  ;;  %v2541_v25 = vrot.slane %v1535_v63, 7  ;;  %v8479_v62 = vrot.slane %v1545_v12, 7 }
 0x394   :  { %2905 = vst.msk [vmem:[#allocation2 + $0x4c] sm:$0xf] %vm1419_vm1, %v8396_v59 }
 0x395   :  { %3404 = vst.msk [vmem:[#allocation2 + $0x74] sm:$0xf] %vm1419_vm1, %v8435_v27  ;;  %v1544_v61 = vsel %vm7233_vm10, %v1539_v17, %v1543_v60  ;;  %v2200_v8 = vsel %vm7210_vm7, %v2198_v30, %v2199_v47  ;;  %v2544_v1 = vrot.slane %v2541_v25, 4  ;;  %v2546_v63 = vor.u32 %v8479_v62, %v1541_v49 }
 0x396   :  { %3403 = vst.msk [vmem:[#allocation2 + $0x68] sm:$0xf] %vm1419_vm1, %v8439_v6  ;;  %2718 = vrot.lane.b32.xlu1 %v2539_v35, %s6428_s24  ;;  %v6075_v29 = vld [vmem:[#allocation2 + $0x40] sm:$0xf0]  ;;  %v2201_v35 = vrot.slane %v2199_v47, 4  ;;  %v2548_v10 = vrot.slane %v8479_v62, 4 }
 0x397   :  { %1430 = vst.msk [vmem:[#allocation2 + $0x78] sm:$0xf] %vm1419_vm1, %v8439_v6  ;;  %2716 = vrot.lane.b32.xlu0 %v2535_v33, %s6428_s24  ;;  %v5622_v22 = vld [vmem:[#allocation2 + $0x38] sm:$0xf]  ;;  %v1527_v33 = vrot.slane %v1525_v31, 4  ;;  %v3025_v31 = vrot.slane %v3023_v46, 4 }
 0x398   :  { %1431 = vst.msk [vmem:[#allocation2 + $0x84] sm:$0xf] %vm1419_vm1, %v8435_v27  ;;  %v5623_v45 = vor.u32 %v6075_v29, %v5622_v22  ;;  %v2203_v17 = vsel %vm7210_vm7, %v2201_v35, %v2202_v19  ;;  %v2205_v22 = vrot.slane %v8396_v59, 5  ;;  %v2547_v29 = vsel %vm7260_vm13, %v2544_v1, %v2546_v63  ;;  %v6078_v1 = vld [vmem:[#allocation2 + $0x58] sm:$0xf0] }
 0x399   :  { %2908 = vst.msk [vmem:[#allocation2 + $0x70] sm:$0xf] %vm1419_vm1, %v8439_v6  ;;  %v1528_v36 = vor.u32 %v1527_v33, %v8405_v20  ;;  %v1547_v46 = vrot.slane %v1545_v12, 4  ;;  %v1551_v35 = vshll.u32 %v8376_v43, 16  ;;  %v1555_v33 = vshrl.u32 %v8376_v43, 16 }
 0x39a   :  { %2909 = vst.msk [vmem:[#allocation2 + $0x7c] sm:$0xf] %vm1419_vm1, %v8435_v27  ;;  %v2207_v30 = vrot.slane %v2205_v22, 4 }
 0x39b   :  { %1957 = vrot.lane.b32.xlu2 %v1544_v61, %s6430_s0  ;;  %v3026_v61 = vrot.slane %v8396_v59, 7  ;;  %v1529_v47 = vrot.slane %v1528_v36, 4 }
 0x39d   :  { %v3027_v49 = vsel %vm7196_vm6, %v3025_v31, %v3026_v61  ;;  %v1534_v20 = vsel %vm7233_vm10, %v1529_v47, %v8431_v23  ;;  %v2542_v23 = vor.u32 %v2541_v25, %v1531_v16  ;;  %v3028_v12 = vrot.slane %v3026_v61, 4 }
 0x39e   :  { %5938 = vmatmul.msk.bf16.gmra.mxu1 %vm4035_vm3, %v5623_v45  ;;  %2337 = vrot.lane.b32.xlu1 %v2203_v17, %s6429_s22  ;;  %v10649_v45 = vshrl.u32 %v8435_v27, 16  ;;  %v2208_v17 = vrot.slane %v8376_v43, 5  ;;  %v1548_v31 = vor.u32 %v1547_v46, %v1543_v60  ;;  %v1557_v47 = vrot.slane %v1555_v33, 4 }
 0x39f   :  { %2335 = vrot.lane.b32.xlu0 %v2200_v8, %s6429_s22  ;;  %v5634_v8 = vld [vmem:[#allocation2 + $0x50] sm:$0xf]  ;;  %v2540_v16 = vrot.slane %v8423_v26, 4  ;;  %v3029_v25 = vrot.slane %v8376_v43, 7  ;;  %v6143_v26 = vld [vmem:[%s10596_s4 + $0x38] sm:$0xff]  ;;  %v6140_v43 = vld [vmem:[%s10596_s4 + $0x20] sm:$0xff] }
 0x3a0   :  { %v8512_v59 = vrot.slane %v10649_v45, 7  ;;  %v2209_v36 = vsel %vm7210_vm7, %v2207_v30, %v2208_v17  ;;  %v1549_v46 = vrot.slane %v1548_v31, 4  ;;  %4108 = vmatpush.bf16.msrb.mxu2 %v6143_v26  ;;  %v1565_v31 = vshrl.u32 %v8374_v52, 16 }
 0x3a1   :  { %v2543_v60 = vsel %vm7260_vm13, %v2540_v16, %v2542_v23  ;;  %v3030_v30 = vsel %vm7196_vm6, %v3028_v12, %v3029_v25  ;;  %v2204_v12 = vrot.slane %v2202_v19, 4  ;;  %v3031_v26 = vrot.slane %v3029_v25, 4 }
 0x3a2   :  { %v2564_v63 = vrot.slane %v8512_v59, 4  ;;  %v8559_v19 = vrot.slane %v1565_v31, 7 }
 0x3a3   :  { %2722 = vrot.lane.b32.xlu2 %v2547_v29, %s6428_s24  ;;  %v1553_v29 = vrot.slane %v1551_v35, 5  ;;  %v2206_v16 = vsel %vm7210_vm7, %v2204_v12, %v2205_v22  ;;  %v6142_v22 = vld [vmem:[%s10596_s4 + $0x30] sm:$0xff]  ;;  %v6149_v12 = vld [vmem:[%s10596_s4 + $0x68] sm:$0xff] }
 0x3a4   :  { %4109 = vmatpush.bf16.msrb.mxu2 %v6142_v22  ;;  %v2214_v22 = vrot.slane %v8439_v6, 5 }
 0x3a5   :  { %v1554_v23 = vsel %vm7233_vm10, %v1549_v46, %v1553_v29  ;;  %v6081_v46 = vld [vmem:[#allocation2 + $0x70] sm:$0xf0] }
 0x3a6   :  { %1955 = vrot.lane.b32.xlu1 %v1534_v20, %s6430_s0  ;;  %v10756_v20 = vld [vmem:[#allocation23_spill] sm:$0xff] }
 0x3a7   :  { %3161 = vrot.lane.b32.xlu0 %v3027_v49, %s6429_s22  ;;  %v5635_v49 = vor.u32 %v6078_v1, %v5634_v8  ;;  %v8526_v45 = vsel %vm7260_vm13, %v2564_v63, %v10756_v20  ;;  %v1558_v8 = vor.u32 %v1557_v47, %v1553_v29  ;;  %v6151_v1 = vld [vmem:[%s10596_s4 + $0x78] sm:$0xff]  ;;  %v1561_v63 = vshll.u32 %v8374_v52, 16 }
 0x3a8   :  { %4236 = vmatpush.bf16.msrb.mxu3 %v6151_v1 }
 0x3a9   :  { %v8550_v47 = vrot.slane %v1561_v63, 5 }
 0x3ab   :  { %2341 = vrot.lane.b32.xlu2 %v2209_v36, %s6429_s22  ;;  %v1559_v36 = vrot.slane %v1558_v8, 4  ;;  %v6141_v8 = vld [vmem:[%s10596_s4 + $0x28] sm:$0xff] }
 0x3ac   :  { %4110 = vmatpush.bf16.msrb.mxu2 %v6141_v8 }
 0x3ad   :  { %v2328_v61 = vpop.permute.xlu0 %2327 }
 0x3ae   :  { %5939 = vmatmul.msk.bf16.gmra.mxu1 %vm4035_vm3, %v5635_v49  ;;  %2720 = vrot.lane.b32.xlu1 %v2543_v60, %s6428_s24  ;;  %v2549_v49 = vrot.slane %v1555_v33, 7  ;;  %v1564_v60 = vsel %vm7233_vm10, %v1559_v36, %v8550_v47  ;;  %v6150_v33 = vld [vmem:[%s10596_s4 + $0x70] sm:$0xff]  ;;  %v3032_v36 = vrot.slane %v8374_v52, 7 }
 0x3af   :  { %3163 = vrot.lane.b32.xlu0 %v3030_v30, %s6429_s22  ;;  %v5646_v30 = vld [vmem:[#allocation2 + $0x68] sm:$0xf]  ;;  %4237 = vmatpush.bf16.msrb.mxu3 %v6150_v33 }
 0x3b0   :  { %v2550_v62 = vor.u32 %v2549_v49, %v1551_v35  ;;  %v2552_v1 = vrot.slane %v2549_v49, 4  ;;  %v5647_v35 = vor.u32 %v6081_v46, %v5646_v30  ;;  %v3033_v25 = vsel %vm7196_vm6, %v3031_v26, %v3032_v36  ;;  %4111 = vmatpush.bf16.msrb.mxu2 %v6140_v43  ;;  %v6147_v30 = vld [vmem:[%s10596_s4 + $0x58] sm:$0xff] }
 0x3b1   :  { %v2711_v29 = vpop.permute.xlu1 %2710  ;;  %v1571_v49 = vshll.u32 %v8439_v6, 16  ;;  %v3034_v46 = vrot.slane %v3032_v36, 4  ;;  %v693_v36 = vpop.f32.mrf.mxu2 }
 0x3b3   :  { %1959 = vrot.lane.b32.xlu2 %v1554_v23, %s6430_s0  ;;  %v2554_v23 = vor.u32 %v8559_v19, %v1561_v63  ;;  %4238 = vmatpush.bf16.msrb.mxu3 %v6149_v12  ;;  %v1573_v33 = vrot.slane %v1571_v49, 5 }
 0x3b5   :  { %v1946_v20 = vpop.permute.xlu0 %1945  ;;  %v2555_v63 = vsel %vm7260_vm13, %v2552_v1, %v2554_v23 }
 0x3b6   :  { %2087 = vst.msk [vmem:[#allocation2] sm:$0xf] %vm2086_vm14, %v1946_v20  ;;  %2339 = vrot.lane.b32.xlu1 %v2206_v16, %s6429_s22  ;;  %v2210_v20 = vrot.slane %v2208_v17, 4  ;;  %v1575_v16 = vshrl.u32 %v8439_v6, 16  ;;  %v6148_v17 = vld [vmem:[%s10596_s4 + $0x60] sm:$0xff] }
 0x3b7   :  { %1961 = vrot.lane.b32.xlu0 %v1564_v60, %s6430_s0  ;;  %2469 = vst.msk [vmem:[#allocation2] sm:$0xf] %vm2468_vm15, %v2328_v61  ;;  %v2551_v61 = vsel %vm7260_vm13, %v2548_v10, %v2550_v62  ;;  %v2211_v60 = vrot.slane %v8374_v52, 5  ;;  %4239 = vmatpush.bf16.msrb.mxu3 %v6148_v17  ;;  %v6139_v52 = vld [vmem:[%s10596_s4 + $0x18] sm:$0xff] }
 0x3b8   :  { %2852 = vst.msk [vmem:[#allocation2] sm:$0xf] %vm2851_vm0, %v2711_v29  ;;  %v3035_v29 = vrot.slane %v8439_v6, 7  ;;  %v1577_v62 = vrot.slane %v1575_v16, 4  ;;  %4112 = vmatpush.bf16.msrb.mxu2 %v6139_v52  ;;  %v6138_v52 = vld [vmem:[%s10596_s4 + $0x10] sm:$0xff] }
 0x3b9   :  { %v2212_v10 = vsel %vm7210_vm7, %v2210_v20, %v2211_v60  ;;  %v2213_v8 = vrot.slane %v2211_v60, 4  ;;  %v5658_v20 = vld [vmem:[#allocation2 + $0x80] sm:$0xf] }
 0x3ba   :  { %v3036_v1 = vsel %vm7196_vm6, %v3034_v46, %v3035_v29  ;;  %v3037_v12 = vrot.slane %v3035_v29, 4 }
 0x3bb   :  { %2724 = vrot.lane.b32.xlu2 %v2551_v61, %s6428_s24  ;;  %v1567_v61 = vrot.slane %v1565_v31, 4  ;;  %v2215_v23 = vsel %vm7210_vm7, %v2213_v8, %v2214_v22  ;;  %4240 = vmatpush.bf16.msrb.mxu3 %v6147_v30  ;;  %v3038_v31 = vrot.slane %v8435_v27, 7  ;;  %v6146_v30 = vld [vmem:[%s10596_s4 + $0x50] sm:$0xff] }
 0x3bc   :  { %4113 = vmatpush.bf16.msrb.mxu2 %v6138_v52  ;;  %v10759_v52 = vld [vmem:[#allocation20_spill] sm:$0xff] }
 0x3bd   :  { %v1568_v60 = vor.u32 %v1567_v61, %v8550_v47  ;;  %v3039_v43 = vsel %vm7196_vm6, %v3037_v12, %v3038_v31  ;;  %v2217_v61 = vrot.slane %v8435_v27, 5  ;;  %v6145_v12 = vld [vmem:[%s10596_s4 + $0x48] sm:$0xff] }
 0x3be   :  { %5940 = vmatmul.msk.bf16.gmra.mxu1 %vm4035_vm3, %v5647_v35  ;;  %3165 = vrot.lane.b32.xlu1 %v3033_v25, %s6429_s22  ;;  %v1578_v35 = vor.u32 %v1577_v62, %v1573_v33  ;;  %v6084_v25 = vld [vmem:[#allocation2 + $0x88] sm:$0xf0] }
 0x3bf   :  { %2726 = vrot.lane.b32.xlu0 %v2555_v63, %s6428_s24  ;;  %v1581_v63 = vshll.u32 %v8435_v27, 16  ;;  %v1569_v62 = vrot.slane %v1568_v60, 4  ;;  %4241 = vmatpush.bf16.msrb.mxu3 %v6146_v30  ;;  %v2556_v60 = vrot.slane %v8559_v19, 4  ;;  %v10760_v30 = vrot.slane %v10759_v52, 5  ;;  %v6087_v19 = vld [vmem:[#allocation2 + $0xa0] sm:$0xf0] }
 0x3c0   :  { %v1579_v17 = vrot.slane %v1578_v35, 4  ;;  %v695_v35 = vpop.f32.mrf.mxu2 }
 0x3c1   :  { %v8627_v29 = vrot.slane %v1581_v63, 5  ;;  %v1574_v8 = vsel %vm7233_vm10, %v1569_v62, %v1573_v33 }
 0x3c3   :  { %2343 = vrot.lane.b32.xlu2 %v2212_v10, %s6429_s22  ;;  %v5659_v10 = vor.u32 %v6084_v25, %v5658_v20  ;;  %v1584_v46 = vsel %vm7233_vm10, %v1579_v17, %v8627_v29  ;;  %v2219_v20 = vrot.slane %v2217_v61, 4  ;;  %4242 = vmatpush.bf16.msrb.mxu3 %v6145_v12  ;;  %v6144_v25 = vld [vmem:[%s10596_s4 + $0x40] sm:$0xff] }
 0x3c5   :  { %v8611_v26 = vpop.permute.xlu2 %3151 }
 0x3c6   :  { %3167 = vrot.lane.b32.xlu1 %v3036_v1, %s6429_s22  ;;  %v2557_v1 = vrot.slane %v1575_v16, 7  ;;  %v6136_v16 = vld [vmem:[%s10596_s4] sm:$0xff] }
 0x3c7   :  { %2345 = vrot.lane.b32.xlu0 %v2215_v23, %s6429_s22  ;;  %v6137_v23 = vld [vmem:[%s10596_s4 + $0x8] sm:$0xff]  ;;  %4243 = vmatpush.bf16.msrb.mxu3 %v6144_v25  ;;  %v2216_v25 = vrot.slane %v2214_v22, 4 }
 0x3c8   :  { %v2558_v33 = vor.u32 %v2557_v1, %v1571_v49  ;;  %4114 = vmatpush.bf16.msrb.mxu2 %v6137_v23  ;;  %v3040_v23 = vrot.slane %v3038_v31, 4 }
 0x3c9   :  { %v2218_v22 = vsel %vm7210_vm7, %v2216_v25, %v2217_v61 }
 0x3cb   :  { %3169 = vrot.lane.b32.xlu2 %v3039_v43, %s6429_s22  ;;  %v10757_v43 = vld [vmem:[#allocation11_spill] sm:$0xff] }
 0x3cc   :  { %v694_v17 = vadd.f32 %v693_v36, %v10757_v43  ;;  %4115 = vmatpush.bf16.msrb.mxu2 %v6136_v16  ;;  %v8674_v36 = vld [vmem:[%s10594_s2] ss:$0 sm:$0xff]  ;;  %v2562_v16 = vor.u32 %v8512_v59, %v1581_v63 }
 0x3cd   :  { %v8636_v47 = vpop.permute.xlu2 %2712  ;;  %v8689_v43 = vld [vmem:[%s10595_s3] ss:$0 sm:$0xff] }
 0x3ce   :  { %5941 = vmatmul.msk.bf16.gmra.mxu1 %vm4035_vm3, %v5659_v10  ;;  %1965 = vrot.lane.b32.xlu1 %v1584_v46, %s6430_s0  ;;  %v10758_v10 = vld [vmem:[#allocation12_spill] sm:$0xff]  ;;  %v2221_v46 = vsel %vm7210_vm7, %v2219_v20, %v10760_v30  ;;  %v767_v12 = vmul.f32 %v8674_v36, %v694_v17  ;;  %v10761_v20 = vrot.slane %v10759_v52, 7 }
 0x3cf   :  { %1963 = vrot.lane.b32.xlu0 %v1574_v8, %s6430_s0  ;;  %v696_v62 = vadd.f32 %v695_v35, %v10758_v10  ;;  %v2559_v8 = vsel %vm7260_vm13, %v2556_v60, %v2558_v33  ;;  %v2560_v33 = vrot.slane %v2557_v1, 4 }
 0x3d0   :  { %v3042_v31 = vsel %vm7196_vm6, %v3040_v23, %v10761_v20  ;;  %v8692_v17 = vadd.f32 %v8689_v43, %v767_v12 }
 0x3d1   :  { %v768_v35 = vmul.f32 %v8674_v36, %v696_v62  ;;  %v2563_v6 = vsel %vm7260_vm13, %v2560_v33, %v2562_v16  ;;  %v8706_v62 = vpop.f32.mrf.mxu2  ;;  %v10766_v33 = vld [vmem:[#allocation29_spill] sm:$0xff] }
 0x3d2   :  { %v869_v52 = vmax.f32 %v8692_v17, 0.0  ;;  %v6241_v16 = vunpack.i.h.bf16 %v10766_v33  ;;  %v6240_v25 = vunpack.i.l.bf16 %v10766_v33 }
 0x3d3   :  { %2758 = vrot.lane.b32.xlu2 %v7703_v40, %s6428_s24  ;;  %v5670_v40 = vld [vmem:[#allocation2 + $0x98] sm:$0xf]  ;;  %v8695_v10 = vadd.f32 %v8689_v43, %v768_v35 }
 0x3d4   :  { %v5671_v60 = vor.u32 %v6087_v19, %v5670_v40 }
 0x3d5   :  { %v2332_v49 = vpop.permute.xlu2 %2331  ;;  %v870_v30 = vmax.f32 %v8695_v10, 0.0 }
 0x3d6   :  { %2349 = vrot.lane.b32.xlu1 %v2221_v46, %s6429_s22  ;;  %v10762_v46 = vshrl.u32 %v8435_v27, 16  ;;  %v6090_v27 = vld [vmem:[#allocation2 + $0xb8] sm:$0xf0] }
 0x3d7   :  { %2728 = vrot.lane.b32.xlu0 %v2559_v8, %s6428_s24  ;;  %v10763_v8 = vld [vmem:[#allocation34_spill] sm:$0xff] }
 0x3d8   :  { %v1587_v61 = vrot.slane %v10762_v46, 4  ;;  %v10764_v23 = vsel %vm7233_vm10, %v7763_v48, %v10763_v8  ;;  %v5682_v48 = vld [vmem:[#allocation2 + $0xb0] sm:$0xf] }
 0x3d9   :  { %v700_v35 = vpop.f32.mrf.mxu2 }
 0x3da   :  { %v1588_v12 = vor.u32 %v1587_v61, %v8627_v29  ;;  %v5683_v29 = vor.u32 %v6090_v27, %v5682_v48  ;;  %v10770_v61 = vld [vmem:[#allocation8_spill] sm:$0xff] }
 0x3db   :  { %3171 = vrot.lane.b32.xlu2 %v3042_v31, %s6429_s22  ;;  %v10771_v8 = vmax.f32 %v10770_v61, 0.0  ;;  %v10779_v61 = vld [vmem:[#allocation13_spill] sm:$0xff] }
 0x3dc   :  { %v1589_v31 = vrot.slane %v1588_v12, 4 }
 0x3dd   :  { %v1950_v59 = vpop.permute.xlu2 %1949  ;;  %v2330_v63 = vpop.permute.xlu1 %2329 }
 0x3de   :  { %5942 = vmatmul.msk.bf16.gmra.mxu1 %vm4035_vm3, %v5671_v60  ;;  %2089 = vst.msk [vmem:[#allocation2 + $0x18] sm:$0xf] %vm2086_vm14, %v1950_v59  ;;  %2730 = vrot.lane.b32.xlu1 %v2563_v6, %s6428_s24 }
 0x3df   :  { %2959 = vst.msk [vmem:[#allocation2 + $0x10] sm:$0xf] %vm2086_vm14, %v1950_v59  ;;  %2347 = vrot.lane.b32.xlu0 %v2218_v22, %s6429_s22  ;;  %v3154_v1 = vpop.permute.xlu0 %3153  ;;  %v5590_v22 = vld [vmem:[#allocation2] sm:$0xf] }
 0x3e0   :  { %2471 = vst.msk [vmem:[#allocation2 + $0x18] sm:$0xf] %vm2468_vm15, %v2332_v49  ;;  %v6342_v49 = vpack.i.bf16 %v870_v30, %v869_v52 }
 0x3e1   :  { %3293 = vst.msk [vmem:[#allocation2 + $0x10] sm:$0xf] %vm2468_vm15, %v3154_v1 }
 0x3e3   :  { %1995 = vrot.lane.b32.xlu2 %v10764_v23, %s6430_s0  ;;  %v8762_v23 = vmax.f32 %v10771_v8, %v6241_v16  ;;  %v699_v8 = vadd.f32 %v8706_v62, %v10779_v61  ;;  %v10783_v62 = vld [vmem:[#allocation16_spill] sm:$0xff] }
 0x3e5   :  { %v8720_v40 = vpop.permute.xlu2 %3157 }
 0x3e6   :  { %v1948_v19 = vpop.permute.xlu1 %1947  ;;  %2732 = vrot.lane.b32.xlu1 %v8526_v45, %s6428_s24  ;;  %v10765_v45 = vld [vmem:[#allocation35_spill] sm:$0xff] }
 0x3e7   :  { %2088 = vst.msk [vmem:[#allocation2 + $0xc] sm:$0xf] %vm2086_vm14, %v1948_v19  ;;  %6343 = vrot.lane.b32.xlu0 %v6342_v49, %s6428_s24  ;;  %v2715_v20 = vpop.permute.xlu0 %2714  ;;  %v10772_v49 = vld [vmem:[#allocation7_spill] sm:$0xff] }
 0x3e8   :  { %2470 = vst.msk [vmem:[#allocation2 + $0xc] sm:$0xf] %vm2468_vm15, %v2330_v63  ;;  %v10769_v63 = vld [vmem:[#allocation26_spill] sm:$0xff] }
 0x3e9   :  { %2853 = vst.msk [vmem:[#allocation2 + $0xc] sm:$0xf] %vm2851_vm0, %v8636_v47  ;;  %v6251_v6 = vunpack.i.h.bf16 %v10769_v63  ;;  %v6250_v46 = vunpack.i.l.bf16 %v10769_v63  ;;  %v6093_v63 = vld [vmem:[#allocation2 + $0xd0] sm:$0xf0] }
 0x3ea   :  { %2958 = vst.msk [vmem:[#allocation2 + $0x4] sm:$0xf] %vm2086_vm14, %v1948_v19  ;;  %v10773_v19 = vmax.f32 %v10772_v49, 0.0  ;;  %v10780_v49 = vld [vmem:[#allocation14_spill] sm:$0xff] }
 0x3eb   :  { %3292 = vst.msk [vmem:[#allocation2 + $0x4] sm:$0xf] %vm2468_vm15, %v8611_v26  ;;  %2377 = vrot.lane.b32.xlu2 %v10765_v45, %s6429_s22  ;;  %v10767_v26 = vld [vmem:[#allocation22_spill] sm:$0xff]  ;;  %v10776_v45 = vld [vmem:[#allocation9_spill] sm:$0xff] }
 0x3ec   :  { %3348 = vst.msk [vmem:[#allocation2 + $0x4] sm:$0xf] %vm2851_vm0, %v8636_v47  ;;  %v1594_v59 = vsel %vm7233_vm10, %v1589_v31, %v10767_v26  ;;  %v10768_v47 = vsel %vm7233_vm10, %v7799_v58, %v7801_v14  ;;  %v8766_v12 = vmax.f32 %v10773_v19, %v6240_v25  ;;  %v703_v58 = vpop.f32.mrf.mxu2  ;;  %v10774_v14 = vld [vmem:[#allocation10_spill] sm:$0xff]  ;;  %v701_v19 = vadd.f32 %v700_v35, %v10780_v49 }
 0x3ed   :  { %2854 = vst.msk [vmem:[#allocation2 + $0x18] sm:$0xf] %vm2851_vm0, %v2715_v20  ;;  %v8745_v60 = vpop.permute.xlu2 %3159 }
 0x3ee   :  { %5943 = vmatmul.msk.bf16.gmra.mxu1 %vm4035_vm3, %v5683_v29  ;;  %3349 = vst.msk [vmem:[#allocation2 + $0x10] sm:$0xf] %vm2851_vm0, %v2715_v20  ;;  %1967 = vrot.lane.b32.xlu1 %v1594_v59, %s6430_s0  ;;  %v10775_v20 = vmax.f32 %v10774_v14, 0.0  ;;  %v10777_v29 = vmax.f32 %v10776_v45, 0.0  ;;  %v6347_v25 = vpack.i.bf16 %v8762_v23, %v8766_v12  ;;  %v10781_v14 = vld [vmem:[#allocation33_spill] sm:$0xff]  ;;  %v770_v45 = vmul.f32 %v8674_v36, %v701_v19 }
 0x3ef   :  { %1997 = vrot.lane.b32.xlu0 %v10768_v47, %s6430_s0  ;;  %v5694_v47 = vld [vmem:[#allocation2 + $0xc8] sm:$0xf] }
 0x3f0   :  { %v6068_v1 = vld [vmem:[#allocation2 + $0x8] sm:$0xf0]  ;;  %v8772_v31 = vmax.f32 %v10775_v20, %v6251_v6  ;;  %v8776_v33 = vmax.f32 %v10777_v29, %v6250_v46  ;;  %v5695_v46 = vor.u32 %v6093_v63, %v5694_v47  ;;  %v769_v20 = vmul.f32 %v8674_v36, %v699_v8  ;;  %v10782_v29 = vld [vmem:[#allocation15_spill] sm:$0xff] }
 0x3f1   :  { %v5591_v48 = vor.u32 %v6068_v1, %v5590_v22  ;;  %v6096_v63 = vld [vmem:[#allocation2 + $0xe8] sm:$0xf0] }
 0x3f2   :  { %v6357_v1 = vpack.i.bf16 %v8772_v31, %v8776_v33 }
 0x3f3   :  { %4116 = vmatmul.bf16.vlgmr.msrb.gmra.mxu2 %v5591_v48  ;;  %v6067_v27 = vld [vmem:[#allocation2 + $0x4] sm:$0xf]  ;;  %2760 = vrot.lane.b32.xlu2 %v7812_v50, %s6428_s24  ;;  %v10778_v50 = vld [vmem:[#allocation36_spill] sm:$0xff] }
 0x3f5   :  { %v5592_v16 = vld [vmem:[#allocation2 + $0xc] sm:$0xf0]  ;;  %v1958_v26 = vpop.permute.xlu2 %1957 }
 0x3f6   :  { %v5595_v59 = vor.u32 %v6067_v27, %v5592_v16  ;;  %2093 = vst.msk [vmem:[#allocation2 + $0x48] sm:$0xf] %vm2086_vm14, %v1958_v26  ;;  %6348 = vrot.lane.b32.xlu1 %v6347_v25, %s6429_s22  ;;  %v705_v27 = vpop.f32.mrf.mxu2  ;;  %v704_v16 = vadd.f32 %v703_v58, %v10782_v29 }
 0x3f7   :  { %2963 = vst.msk [vmem:[#allocation2 + $0x40] sm:$0xf] %vm2086_vm14, %v1958_v26  ;;  %3199 = vrot.lane.b32.xlu0 %v10778_v50, %s6429_s22  ;;  %v706_v26 = vadd.f32 %v705_v27, %v10783_v62 }
 0x3f8   :  { %4244 = vmatmul.bf16.vlgmr.msrb.gmra.mxu3 %v5595_v59  ;;  %v3156_v6 = vpop.permute.xlu1 %3155  ;;  %v2334_v22 = vpop.permute.xlu0 %2333  ;;  %v8812_v59 = vadd.f32 %v8689_v43, %v770_v45  ;;  %v771_v58 = vmul.f32 %v8674_v36, %v704_v16  ;;  %v5602_v45 = vld [vmem:[#allocation2 + $0x18] sm:$0xf] }
 0x3f9   :  { %v772_v50 = vmul.f32 %v8674_v36, %v706_v26 }
 0x3fa   :  { %v872_v8 = vmax.f32 %v8812_v59, 0.0 }
 0x3fb   :  { %6358 = vrot.lane.b32.xlu2 %v6357_v1, %s6429_s22 }
 0x3fd   :  { %v8792_v48 = vpop.permute.xlu2 %2722 }
 0x3fe   :  { %5944 = vmatmul.msk.bf16.gmra.mxu1 %vm4035_vm3, %v5695_v46  ;;  %2375 = vrot.lane.b32.xlu1 %v10781_v14, %s6429_s22  ;;  %v8830_v46 = vadd.f32 %v8689_v43, %v771_v58  ;;  %v6099_v58 = vld [vmem:[#allocation2 + $0x100] sm:$0xf0] }
 0x3ff   :  { %2762 = vrot.lane.b32.xlu0 %v7825_v24, %s6428_s24  ;;  %v8809_v24 = vadd.f32 %v8689_v43, %v769_v20 }
 0x400   :  { %v1954_v35 = vpop.permute.xlu1 %1953 }
 0x401   :  { %v1952_v25 = vpop.permute.xlu0 %1951  ;;  %2091 = vst.msk [vmem:[#allocation2 + $0x30] sm:$0xf] %vm2086_vm14, %v1954_v35  ;;  %v871_v1 = vmax.f32 %v8809_v24, 0.0 }
 0x402   :  { %2961 = vst.msk [vmem:[#allocation2 + $0x28] sm:$0xf] %vm2086_vm14, %v1954_v35  ;;  %v10785_v35 = vsel %vm7233_vm10, %v7920_v2, %v7922_v53 }
 0x403   :  { %2379 = vrot.lane.b32.xlu2 %v7806_v56, %s6429_s22  ;;  %3295 = vst.msk [vmem:[#allocation2 + $0x28] sm:$0xf] %vm2468_vm15, %v8720_v40  ;;  %v10784_v56 = vsel %vm7233_vm10, %v7868_v32, %v7870_v9  ;;  %v5706_v40 = vld [vmem:[#allocation2 + $0xe0] sm:$0xf]  ;;  %v873_v9 = vmax.f32 %v8830_v46, 0.0  ;;  %v6352_v19 = vpack.i.bf16 %v872_v8, %v871_v1 }
 0x404   :  { %2090 = vst.msk [vmem:[#allocation2 + $0x24] sm:$0xf] %vm2086_vm14, %v1952_v25  ;;  %v5707_v32 = vor.u32 %v6096_v63, %v5706_v40  ;;  %v5730_v40 = vld [vmem:[#allocation2 + $0x110] sm:$0xf]  ;;  %v6102_v63 = vld [vmem:[#allocation2 + $0x118] sm:$0xf0] }
 0x405   :  { %v2342_v47 = vpop.permute.xlu2 %2341  ;;  %2960 = vst.msk [vmem:[#allocation2 + $0x1c] sm:$0xf] %vm2086_vm14, %v1952_v25  ;;  %v5718_v25 = vld [vmem:[#allocation2 + $0xf8] sm:$0xf] }
 0x406   :  { %2472 = vst.msk [vmem:[#allocation2 + $0x24] sm:$0xf] %vm2468_vm15, %v2334_v22  ;;  %3201 = vrot.lane.b32.xlu1 %v7847_v18, %s6429_s22  ;;  %v8833_v22 = vadd.f32 %v8689_v43, %v772_v50  ;;  %v5719_v2 = vor.u32 %v6099_v58, %v5718_v25 }
 0x407   :  { %1999 = vrot.lane.b32.xlu0 %v10784_v56, %s6430_s0  ;;  %3294 = vst.msk [vmem:[#allocation2 + $0x1c] sm:$0xf] %vm2468_vm15, %v3156_v6  ;;  %v10786_v56 = vsel %vm7233_vm10, %v8227_v4, %v8195_v3 }
 0x408   :  { %v2719_v18 = vpop.permute.xlu1 %2718  ;;  %v874_v6 = vmax.f32 %v8833_v22, 0.0 }
 0x409   :  { %v2717_v61 = vpop.permute.xlu0 %2716  ;;  %3351 = vst.msk [vmem:[#allocation2 + $0x28] sm:$0xf] %vm2851_vm0, %v2719_v18 }
 0x40a   :  { %2855 = vst.msk [vmem:[#allocation2 + $0x24] sm:$0xf] %vm2851_vm0, %v2717_v61  ;;  %v6362_v20 = vpack.i.bf16 %v874_v6, %v873_v9 }
 0x40b   :  { %3205 = vrot.lane.b32.xlu2 %v7892_v44, %s6429_s22  ;;  %3350 = vst.msk [vmem:[#allocation2 + $0x1c] sm:$0xf] %vm2851_vm0, %v2717_v61 }
 0x40d   :  { %v1960_v49 = vpop.permute.xlu2 %1959 }
 0x40e   :  { %5945 = vmatmul.msk.bf16.gmra.mxu1 %vm4035_vm3, %v5707_v32  ;;  %2094 = vst.msk [vmem:[#allocation2 + $0x54] sm:$0xf] %vm2086_vm14, %v1960_v49  ;;  %6353 = vrot.lane.b32.xlu1 %v6352_v19, %s6428_s24 }
 0x40f   :  { %2964 = vst.msk [vmem:[#allocation2 + $0x4c] sm:$0xf] %vm2086_vm14, %v1960_v49  ;;  %2381 = vrot.lane.b32.xlu0 %v7877_v54, %s6429_s22 }
 0x410   :  { %2476 = vst.msk [vmem:[#allocation2 + $0x54] sm:$0xf] %vm2468_vm15, %v2342_v47  ;;  %v2338_v44 = vpop.permute.xlu1 %2337  ;;  %v5604_v14 = vld [vmem:[#allocation2 + $0x24] sm:$0xf0] }
 0x411   :  { %v2336_v27 = vpop.permute.xlu0 %2335  ;;  %v6071_v29 = vld [vmem:[#allocation2 + $0x20] sm:$0xf0] }
 0x412   :  { %2473 = vst.msk [vmem:[#allocation2 + $0x30] sm:$0xf] %vm2468_vm15, %v2336_v27  ;;  %v5603_v16 = vor.u32 %v6071_v29, %v5602_v45  ;;  %v6070_v62 = vld [vmem:[#allocation2 + $0x1c] sm:$0xf]  ;;  %v5731_v27 = vor.u32 %v6102_v63, %v5730_v40  ;;  %v6108_v40 = vld [vmem:[#allocation2 + $0x148] sm:$0xf0] }
 0x413   :  { %2856 = vst.msk [vmem:[#allocation2 + $0x30] sm:$0xf] %vm2851_vm0, %v2719_v18  ;;  %6363 = vrot.lane.b32.xlu2 %v6362_v20, %s6428_s24  ;;  %v5607_v54 = vor.u32 %v6070_v62, %v5604_v14  ;;  %v5742_v62 = vld [vmem:[#allocation2 + $0x128] sm:$0xf] }
 0x414   :  { %4121 = vmatmul.bf16.gmra.mxu2 %v5603_v16 }
 0x415   :  { %v2725_v26 = vpop.permute.xlu2 %2724  ;;  %4249 = vmatmul.bf16.gmra.mxu3 %v5607_v54  ;;  %v6105_v54 = vld [vmem:[#allocation2 + $0x130] sm:$0xf0] }
 0x416   :  { %2859 = vst.msk [vmem:[#allocation2 + $0x54] sm:$0xf] %vm2851_vm0, %v2725_v26  ;;  %2001 = vrot.lane.b32.xlu1 %v10785_v35, %s6430_s0 }
 0x417   :  { %2764 = vrot.lane.b32.xlu0 %v7932_v7, %s6428_s24 }
 0x418   :  { %v1956_v50 = vpop.permute.xlu1 %1955 }
 0x419   :  { %v3162_v47 = vpop.permute.xlu0 %3161  ;;  %2092 = vst.msk [vmem:[#allocation2 + $0x3c] sm:$0xf] %vm2086_vm14, %v1956_v50 }
 0x41a   :  { %2962 = vst.msk [vmem:[#allocation2 + $0x34] sm:$0xf] %vm2086_vm14, %v1956_v50  ;;  %v5614_v61 = vld [vmem:[#allocation2 + $0x30] sm:$0xf]  ;;  %v5743_v50 = vor.u32 %v6105_v54, %v5742_v62  ;;  %v5766_v54 = vld [vmem:[#allocation2 + $0x158] sm:$0xf] }
 0x41b   :  { %2005 = vrot.lane.b32.xlu2 %v10786_v56, %s6430_s0  ;;  %2474 = vst.msk [vmem:[#allocation2 + $0x3c] sm:$0xf] %vm2468_vm15, %v2338_v44 }
 0x41c   :  { %3296 = vst.msk [vmem:[#allocation2 + $0x34] sm:$0xf] %vm2468_vm15, %v8745_v60 }
 0x41d   :  { %v2344_v53 = vpop.permute.xlu2 %2343  ;;  %3297 = vst.msk [vmem:[#allocation2 + $0x40] sm:$0xf] %vm2468_vm15, %v3162_v47 }
 0x41e   :  { %5946 = vmatmul.msk.bf16.gmra.mxu1 %vm4035_vm3, %v5719_v2  ;;  %3353 = vst.msk [vmem:[#allocation2 + $0x40] sm:$0xf] %vm2851_vm0, %v8792_v48  ;;  %3203 = vrot.lane.b32.xlu1 %v7903_v37, %s6429_s22 }
 0x420   :  { %v2721_v7 = vpop.permute.xlu1 %2720 }
 0x421   :  { %v3164_v4 = vpop.permute.xlu0 %3163  ;;  %2857 = vst.msk [vmem:[#allocation2 + $0x3c] sm:$0xf] %vm2851_vm0, %v2721_v7 }
 0x422   :  { %3352 = vst.msk [vmem:[#allocation2 + $0x34] sm:$0xf] %vm2851_vm0, %v2721_v7 }
 0x423   :  { %3207 = vrot.lane.b32.xlu2 %v8201_v5, %s6429_s22  ;;  %3298 = vst.msk [vmem:[#allocation2 + $0x4c] sm:$0xf] %vm2468_vm15, %v3164_v4 }
 0x424   :  { %3354 = vst.msk [vmem:[#allocation2 + $0x4c] sm:$0xf] %vm2851_vm0, %v2725_v26  ;;  %v6077_v26 = vld [vmem:[#allocation2 + $0x50] sm:$0xf0] }
 0x425   :  { %v3170_v60 = vpop.permute.xlu2 %3169  ;;  %v5616_v44 = vld [vmem:[#allocation2 + $0x3c] sm:$0xf0] }
 0x426   :  { %2766 = vrot.lane.b32.xlu1 %v7952_v15, %s6428_s24  ;;  %v8900_v15 = vpop.f32.mrf.mxu1 }
 0x428   :  { %v2340_v37 = vpop.permute.xlu1 %2339  ;;  %v6074_v32 = vld [vmem:[#allocation2 + $0x38] sm:$0xf0] }
 0x429   :  { %v1962_v18 = vpop.permute.xlu0 %1961  ;;  %2475 = vst.msk [vmem:[#allocation2 + $0x48] sm:$0xf] %vm2468_vm15, %v2340_v37  ;;  %v5615_v49 = vor.u32 %v6074_v32, %v5614_v61  ;;  %v6073_v19 = vld [vmem:[#allocation2 + $0x34] sm:$0xf] }
 0x42a   :  { %2858 = vst.msk [vmem:[#allocation2 + $0x48] sm:$0xf] %vm2851_vm0, %v8792_v48  ;;  %v5619_v5 = vor.u32 %v6073_v19, %v5616_v44  ;;  %v8951_v44 = vpop.f32.mrf.mxu2 }
 0x42b   :  { %2770 = vrot.lane.b32.xlu2 %v8237_v11, %s6428_s24  ;;  %2095 = vst.msk [vmem:[#allocation2 + $0x60] sm:$0xf] %vm2086_vm14, %v1962_v18  ;;  %4126 = vmatmul.bf16.gmra.mxu2 %v5615_v49  ;;  %v10787_v11 = vsel %vm7233_vm10, %v8178_v28, %v8193_v55  ;;  %v6076_v25 = vld [vmem:[#allocation2 + $0x4c] sm:$0xf] }
 0x42c   :  { %2965 = vst.msk [vmem:[#allocation2 + $0x58] sm:$0xf] %vm2086_vm14, %v1962_v18  ;;  %4254 = vmatmul.bf16.gmra.mxu3 %v5619_v5 }
 0x42d   :  { %v8905_v14 = vpop.permute.xlu2 %2758  ;;  %2477 = vst.msk [vmem:[#allocation2 + $0x60] sm:$0xf] %vm2468_vm15, %v2344_v53 }
 0x42e   :  { %5947 = vmatmul.msk.bf16.gmra.mxu1 %vm4035_vm3, %v5731_v27  ;;  %3371 = vst.msk [vmem:[#allocation2 + $0x118] sm:$0xf] %vm2851_vm0, %v8905_v14  ;;  %2003 = vrot.lane.b32.xlu1 %v10787_v11, %s6430_s0  ;;  %v8921_v29 = vpop.f32.mrf.mxu1 }
 0x430   :  { %v3166_v48 = vpop.permute.xlu1 %3165 }
 0x431   :  { %v2727_v20 = vpop.permute.xlu0 %2726  ;;  %3299 = vst.msk [vmem:[#allocation2 + $0x58] sm:$0xf] %vm2468_vm15, %v3166_v48  ;;  %v5626_v16 = vld [vmem:[#allocation2 + $0x48] sm:$0xf] }
 0x432   :  { %2860 = vst.msk [vmem:[#allocation2 + $0x60] sm:$0xf] %vm2851_vm0, %v2727_v20  ;;  %v5627_v35 = vor.u32 %v6077_v26, %v5626_v16 }
 0x433   :  { %3355 = vst.msk [vmem:[#allocation2 + $0x58] sm:$0xf] %vm2851_vm0, %v2727_v20 }
 0x435   :  { %v8919_v45 = vpop.permute.xlu2 %3171 }
 0x436   :  { %2385 = vrot.lane.b32.xlu1 %v8207_v41, %s6429_s22  ;;  %v8926_v2 = vpop.f32.mrf.mxu1 }
 0x438   :  { %v3168_v28 = vpop.permute.xlu1 %3167 }
 0x439   :  { %v2346_v55 = vpop.permute.xlu0 %2345  ;;  %v5638_v49 = vld [vmem:[#allocation2 + $0x60] sm:$0xf] }
 0x43a   :  { %v5628_v58 = vld [vmem:[#allocation2 + $0x54] sm:$0xf0] }
 0x43b   :  { %4131 = vmatmul.bf16.gmra.mxu2 %v5627_v35  ;;  %v5631_v47 = vor.u32 %v6076_v25, %v5628_v58 }
 0x43d   :  { %v1996_v56 = vpop.permute.xlu2 %1995  ;;  %4259 = vmatmul.bf16.gmra.mxu3 %v5631_v47 }
 0x43e   :  { %5948 = vmatmul.msk.bf16.gmra.mxu1 %vm4035_vm3, %v5743_v50  ;;  %2112 = vst.msk [vmem:[#allocation2 + $0x12c] sm:$0xf] %vm2086_vm14, %v1996_v56  ;;  %2768 = vrot.lane.b32.xlu1 %v8231_v38, %s6428_s24  ;;  %v8938_v4 = vpop.f32.mrf.mxu1  ;;  %v5754_v38 = vld [vmem:[#allocation2 + $0x140] sm:$0xf] }
 0x43f   :  { %2982 = vst.msk [vmem:[#allocation2 + $0x124] sm:$0xf] %vm2086_vm14, %v1996_v56 }
 0x440   :  { %v1966_v41 = vpop.permute.xlu1 %1965 }
 0x441   :  { %v1964_v53 = vpop.permute.xlu0 %1963  ;;  %2097 = vst.msk [vmem:[#allocation2 + $0x78] sm:$0xf] %vm2086_vm14, %v1966_v41 }
 0x442   :  { %2967 = vst.msk [vmem:[#allocation2 + $0x70] sm:$0xf] %vm2086_vm14, %v1966_v41 }
 0x443   :  { %3301 = vst.msk [vmem:[#allocation2 + $0x70] sm:$0xf] %vm2468_vm15, %v3170_v60  ;;  %v5755_v60 = vor.u32 %v6108_v40, %v5754_v38 }
 0x444   :  { %2096 = vst.msk [vmem:[#allocation2 + $0x6c] sm:$0xf] %vm2086_vm14, %v1964_v53 }
 0x445   :  { %v2378_v7 = vpop.permute.xlu2 %2377  ;;  %2966 = vst.msk [vmem:[#allocation2 + $0x64] sm:$0xf] %vm2086_vm14, %v1964_v53 }
 0x446   :  { %2478 = vst.msk [vmem:[#allocation2 + $0x6c] sm:$0xf] %vm2468_vm15, %v2346_v55  ;;  %v8954_v27 = vpop.f32.mrf.mxu1 }
 0x447   :  { %3300 = vst.msk [vmem:[#allocation2 + $0x64] sm:$0xf] %vm2468_vm15, %v3168_v28  ;;  %v6111_v28 = vld [vmem:[#allocation2 + $0x160] sm:$0xf0] }
 0x448   :  { %2494 = vst.msk [vmem:[#allocation2 + $0x12c] sm:$0xf] %vm2468_vm15, %v2378_v7  ;;  %v8942_v63 = vpop.permute.xlu1 %2349  ;;  %v5767_v53 = vor.u32 %v6111_v28, %v5766_v54  ;;  %v710_v7 = vpop.f32.mrf.mxu2 }
 0x449   :  { %v2729_v37 = vpop.permute.xlu0 %2728 }
 0x44a   :  { %2861 = vst.msk [vmem:[#allocation2 + $0x6c] sm:$0xf] %vm2851_vm0, %v2729_v37 }
 0x44b   :  { %3356 = vst.msk [vmem:[#allocation2 + $0x64] sm:$0xf] %vm2851_vm0, %v2729_v37 }
 0x44d   :  { %v8947_v18 = vpop.permute.xlu2 %2760 }
 0x44e   :  { %5949 = vmatmul.msk.bf16.gmra.mxu1 %vm4035_vm3, %v5755_v60  ;;  %2877 = vst.msk [vmem:[#allocation2 + $0x12c] sm:$0xf] %vm2851_vm0, %v8947_v18  ;;  %v8975_v40 = vpop.f32.mrf.mxu1 }
 0x450   :  { %v2731_v61 = vpop.permute.xlu1 %2730 }
 0x451   :  { %v2348_v32 = vpop.permute.xlu0 %2347  ;;  %v6080_v19 = vld [vmem:[#allocation2 + $0x68] sm:$0xf0]  ;;  %3357 = vst.msk [vmem:[#allocation2 + $0x70] sm:$0xf] %vm2851_vm0, %v2731_v61 }
 0x452   :  { %v5639_v5 = vor.u32 %v6080_v19, %v5638_v49  ;;  %2479 = vst.msk [vmem:[#allocation2 + $0x78] sm:$0xf] %vm2468_vm15, %v2348_v32  ;;  %v6079_v56 = vld [vmem:[#allocation2 + $0x64] sm:$0xf] }
 0x453   :  { %2862 = vst.msk [vmem:[#allocation2 + $0x78] sm:$0xf] %vm2851_vm0, %v2731_v61 }
 0x454   :  { %4136 = vmatmul.bf16.gmra.mxu2 %v5639_v5 }
 0x455   :  { %v6359_v11 = vpop.permute.xlu2 %6358 }
 0x456   :  { %v6361_v48 = vunpack.i.h.bf16 %v6359_v11  ;;  %v6360_v20 = vunpack.i.l.bf16 %v6359_v11 }
 0x458   :  { %v1358_v16 = vmax.f32 %v8772_v31, %v6361_v48  ;;  %v1357_v62 = vmax.f32 %v8776_v33, %v6360_v20  ;;  %v2733_v55 = vpop.permute.xlu1 %2732  ;;  %v5640_v35 = vld [vmem:[#allocation2 + $0x6c] sm:$0xf0] }
 0x459   :  { %v6344_v26 = vpop.permute.xlu0 %6343  ;;  %v5643_v41 = vor.u32 %v6079_v56, %v5640_v35  ;;  %v10788_v56 = vld [vmem:[#allocation17_spill] sm:$0xff] }
 0x45a   :  { %v8960_v25 = vpack.c.bf16 %v1358_v16, %v1358_v16  ;;  %v8962_v58 = vpack.c.bf16 %v1357_v62, %v1357_v62  ;;  %v6346_v50 = vunpack.i.h.bf16 %v6344_v26  ;;  %v6345_v47 = vunpack.i.l.bf16 %v6344_v26 }
 0x45b   :  { %4264 = vmatmul.bf16.gmra.mxu3 %v5643_v41  ;;  %v709_v41 = vadd.f32 %v8951_v44, %v10788_v56 }
 0x45c   :  { %3428 = vst.msk [vmem:[#allocation2 + $0x194] sm:$0xf] %vm1419_vm1, %v8960_v25  ;;  %v8968_v31 = vmax.f32 %v870_v30, %v6346_v50  ;;  %v8972_v33 = vmax.f32 %v869_v52, %v6345_v47  ;;  %v10654_v38 = vshll.u32 %v8962_v58, 16  ;;  %v1815_v60 = vshrl.u32 %v8962_v58, 16 }
 0x45d   :  { %3427 = vst.msk [vmem:[#allocation2 + $0x188] sm:$0xf] %vm1419_vm1, %v8962_v58  ;;  %v2380_v37 = vpop.permute.xlu2 %2379  ;;  %v2286_v52 = vrot.slane %v8962_v58, 5  ;;  %v1821_v61 = vshll.u32 %v8960_v25, 16  ;;  %v10651_v49 = vshrl.u32 %v8960_v25, 16  ;;  %v10650_v16 = vrot.slane %v8960_v25, 5 }
 0x45e   :  { %5950 = vmatmul.msk.bf16.gmra.mxu1 %vm4035_vm3, %v5767_v53  ;;  %1454 = vst.msk [vmem:[#allocation2 + $0x198] sm:$0xf] %vm1419_vm1, %v8962_v58  ;;  %v6367_v17 = vpack.i.bf16 %v8968_v31, %v8972_v33  ;;  %v8987_v10 = vrot.slane %v10654_v38, 5  ;;  %v1817_v30 = vrot.slane %v1815_v60, 4  ;;  %v8993_v32 = vrot.slane %v1815_v60, 7  ;;  %v10789_v53 = vld [vmem:[#allocation18_spill] sm:$0xff] }
 0x45f   :  { %1455 = vst.msk [vmem:[#allocation2 + $0x1a4] sm:$0xf] %vm1419_vm1, %v8960_v25  ;;  %v9005_v20 = vrot.slane %v10651_v49, 7  ;;  %v2288_v62 = vrot.slane %v2286_v52, 4  ;;  %v9015_v28 = vrot.slane %v1821_v61, 5  ;;  %v711_v60 = vadd.f32 %v710_v7, %v10789_v53 }
 0x460   :  { %2932 = vst.msk [vmem:[#allocation2 + $0x190] sm:$0xf] %vm1419_vm1, %v8962_v58  ;;  %6368 = vrot.lane.b32.xlu0 %v6367_v17, %s6429_s22  ;;  %v1968_v19 = vpop.permute.xlu1 %1967  ;;  %v1818_v11 = vor.u32 %v1817_v30, %v8987_v10  ;;  %v2656_v48 = vrot.slane %v8993_v32, 4  ;;  %v9039_v17 = vpop.f32.mrf.mxu2  ;;  %v773_v44 = vmul.f32 %v8674_v36, %v709_v41  ;;  %v6086_v49 = vld [vmem:[#allocation2 + $0x98] sm:$0xf0] }
 0x461   :  { %2933 = vst.msk [vmem:[#allocation2 + $0x19c] sm:$0xf] %vm1419_vm1, %v8960_v25  ;;  %v1998_v5 = vpop.permute.xlu0 %1997  ;;  %v2658_v26 = vor.u32 %v9005_v20, %v1821_v61  ;;  %v9023_v35 = vsel %vm7210_vm7, %v2288_v62, %v10650_v16  ;;  %v774_v7 = vmul.f32 %v8674_v36, %v711_v60  ;;  %v5652_v60 = vld [vmem:[#allocation2 + $0x84] sm:$0xf0] }
 0x462   :  { %2098 = vst.msk [vmem:[#allocation2 + $0x84] sm:$0xf] %vm2086_vm14, %v1968_v19  ;;  %v9013_v54 = vrot.slane %v1818_v11, 4 }
 0x463   :  { %2480 = vst.msk [vmem:[#allocation2 + $0x84] sm:$0xf] %vm2468_vm15, %v8942_v63  ;;  %v9034_v47 = vsel %vm7260_vm13, %v2656_v48, %v2658_v26  ;;  %v9052_v48 = vpop.f32.mrf.mxu1  ;;  %v9064_v56 = vadd.f32 %v8689_v43, %v774_v7 }
 0x464   :  { %2863 = vst.msk [vmem:[#allocation2 + $0x84] sm:$0xf] %vm2851_vm0, %v2733_v55 }
 0x465   :  { %2968 = vst.msk [vmem:[#allocation2 + $0x7c] sm:$0xf] %vm2086_vm14, %v1968_v19  ;;  %v9026_v50 = vpop.permute.xlu2 %3205 }
 0x466   :  { %3302 = vst.msk [vmem:[#allocation2 + $0x7c] sm:$0xf] %vm2468_vm15, %v8919_v45  ;;  %v5650_v45 = vld [vmem:[#allocation2 + $0x78] sm:$0xf] }
 0x467   :  { %3358 = vst.msk [vmem:[#allocation2 + $0x7c] sm:$0xf] %vm2851_vm0, %v2733_v55 }
 0x468   :  { %2113 = vst.msk [vmem:[#allocation2 + $0x138] sm:$0xf] %vm2086_vm14, %v1998_v5  ;;  %2383 = vrot.lane.b32.xlu0 %v7966_v34, %s6429_s22  ;;  %v6349_v30 = vpop.permute.xlu1 %6348 }
 0x469   :  { %2983 = vst.msk [vmem:[#allocation2 + $0x130] sm:$0xf] %vm2086_vm14, %v1998_v5  ;;  %v3200_v61 = vpop.permute.xlu0 %3199  ;;  %v6351_v19 = vunpack.i.h.bf16 %v6349_v30  ;;  %v6350_v11 = vunpack.i.l.bf16 %v6349_v30  ;;  %v9070_v30 = vpop.f32.mrf.mxu2 }
 0x46a   :  { %2495 = vst.msk [vmem:[#allocation2 + $0x138] sm:$0xf] %vm2468_vm15, %v2380_v37  ;;  %v9061_v37 = vadd.f32 %v8689_v43, %v773_v44 }
 0x46b   :  { %3316 = vst.msk [vmem:[#allocation2 + $0x124] sm:$0xf] %vm2468_vm15, %v3200_v61  ;;  %v6083_v55 = vld [vmem:[#allocation2 + $0x80] sm:$0xf0]  ;;  %v1356_v34 = vmax.f32 %v8762_v23, %v6351_v19  ;;  %v1355_v5 = vmax.f32 %v8766_v12, %v6350_v11  ;;  %v10653_v11 = vmax.f32 %v9064_v56, 0.0 }
 0x46c   :  { %3372 = vst.msk [vmem:[#allocation2 + $0x124] sm:$0xf] %vm2851_vm0, %v8947_v18  ;;  %v5651_v62 = vor.u32 %v6083_v55, %v5650_v45  ;;  %v10652_v19 = vmax.f32 %v9061_v37, 0.0 }
 0x46d   :  { %v9058_v26 = vpop.permute.xlu2 %6363  ;;  %v9066_v41 = vpack.c.bf16 %v1356_v34, %v1356_v34  ;;  %v9068_v53 = vpack.c.bf16 %v1355_v5, %v1355_v5 }
 0x46e   :  { %4141 = vmatmul.bf16.gmra.mxu2 %v5651_v62  ;;  %v6082_v23 = vld [vmem:[#allocation2 + $0x7c] sm:$0xf]  ;;  %v9096_v62 = vpop.f32.mrf.mxu1 }
 0x46f   :  { %v5655_v12 = vor.u32 %v6082_v23, %v5652_v60  ;;  %3426 = vst.msk [vmem:[#allocation2 + $0x17c] sm:$0xf] %vm1419_vm1, %v9066_v41  ;;  %v1791_v18 = vshll.u32 %v9068_v53, 16  ;;  %v1795_v7 = vshrl.u32 %v9068_v53, 16 }
 0x470   :  { %3209 = vrot.lane.b32.xlu0 %v8222_v42, %s6429_s22  ;;  %3425 = vst.msk [vmem:[#allocation2 + $0x170] sm:$0xf] %vm1419_vm1, %v9068_v53  ;;  %v2376_v61 = vpop.permute.xlu1 %2375  ;;  %v10790_v42 = vor.u32 %v8224_v21, %v8195_v3  ;;  %v6372_v21 = vpack.i.bf16 %v10653_v11, %v10652_v19  ;;  %v1801_v19 = vshll.u32 %v9066_v41, 16 }
 0x471   :  { %4269 = vmatmul.bf16.gmra.mxu3 %v5655_v12  ;;  %v2763_v44 = vpop.permute.xlu0 %2762  ;;  %1452 = vst.msk [vmem:[#allocation2 + $0x180] sm:$0xf] %vm1419_vm1, %v9068_v53  ;;  %v1793_v55 = vrot.slane %v1791_v18, 5  ;;  %v1797_v34 = vrot.slane %v1795_v7, 4  ;;  %v9122_v38 = vrot.slane %v1795_v7, 7 }
 0x472   :  { %v1789_v45 = vrot.slane %v10790_v42, 4  ;;  %1453 = vst.msk [vmem:[#allocation2 + $0x18c] sm:$0xf] %vm1419_vm1, %v9066_v41 }
 0x473   :  { %2930 = vst.msk [vmem:[#allocation2 + $0x178] sm:$0xf] %vm1419_vm1, %v9068_v53  ;;  %v1798_v60 = vor.u32 %v1797_v34, %v1793_v55  ;;  %v2646_v7 = vor.u32 %v9122_v38, %v1791_v18 }
 0x474   :  { %v1794_v5 = vsel %vm7233_vm10, %v1789_v45, %v1793_v55  ;;  %2931 = vst.msk [vmem:[#allocation2 + $0x184] sm:$0xf] %vm1419_vm1, %v9066_v41  ;;  %v2280_v45 = vrot.slane %v9068_v53, 5 }
 0x475   :  { %2007 = vrot.lane.b32.xlu2 %v1794_v5, %s6430_s0  ;;  %2493 = vst.msk [vmem:[#allocation2 + $0x120] sm:$0xf] %vm2468_vm15, %v2376_v61  ;;  %v2006_v3 = vpop.permute.xlu2 %2005  ;;  %v1799_v11 = vrot.slane %v1798_v60, 4 }
 0x476   :  { %2876 = vst.msk [vmem:[#allocation2 + $0x120] sm:$0xf] %vm2851_vm0, %v8905_v14  ;;  %v6114_v23 = vld [vmem:[#allocation2 + $0x178] sm:$0xf0]  ;;  %v4117_v12 = vpop.f32.mrf.mxu2  ;;  %v10791_v14 = vrot.slane %v8166_v0, 5 }
 0x477   :  { %2878 = vst.msk [vmem:[#allocation2 + $0x138] sm:$0xf] %vm2851_vm0, %v2763_v44  ;;  %v5778_v42 = vld [vmem:[#allocation2 + $0x170] sm:$0xf] }
 0x478   :  { %6373 = vrot.lane.b32.xlu0 %v6372_v21, %s6428_s24  ;;  %2117 = vst.msk [vmem:[#allocation2 + $0x168] sm:$0xf] %vm2086_vm14, %v2006_v3  ;;  %v3202_v61 = vpop.permute.xlu1 %3201  ;;  %v5779_v16 = vor.u32 %v6114_v23, %v5778_v42  ;;  %v2279_v55 = vrot.slane %v10791_v14, 4  ;;  %v5662_v21 = vld [vmem:[#allocation2 + $0x90] sm:$0xf] }
 0x479   :  { %v2000_v5 = vpop.permute.xlu0 %1999  ;;  %2987 = vst.msk [vmem:[#allocation2 + $0x160] sm:$0xf] %vm2086_vm14, %v2006_v3  ;;  %v5663_v3 = vor.u32 %v6086_v49, %v5662_v21  ;;  %v5664_v42 = vld [vmem:[#allocation2 + $0x9c] sm:$0xf0] }
 0x47a   :  { %3317 = vst.msk [vmem:[#allocation2 + $0x130] sm:$0xf] %vm2468_vm15, %v3202_v61  ;;  %5951 = vmatmul.msk.bf16.gmra.mxu1 %vm4035_vm3, %v5779_v16  ;;  %v2281_v23 = vsel %vm7210_vm7, %v2279_v55, %v2280_v45  ;;  %v9128_v16 = vrot.slane %v1801_v19, 5 }
 0x47b   :  { %v4245_v34 = vpop.f32.mrf.mxu3  ;;  %3373 = vst.msk [vmem:[#allocation2 + $0x130] sm:$0xf] %vm2851_vm0, %v2763_v44  ;;  %v6085_v44 = vld [vmem:[#allocation2 + $0x94] sm:$0xf] }
 0x47c   :  { %v9115_v63 = vadd.f32 %v4245_v34, %v4117_v12  ;;  %2114 = vst.msk [vmem:[#allocation2 + $0x144] sm:$0xf] %vm2086_vm14, %v2000_v5  ;;  %v5667_v60 = vor.u32 %v6085_v44, %v5664_v42  ;;  %v1804_v49 = vsel %vm7233_vm10, %v1799_v11, %v9128_v16  ;;  %v9134_v12 = vpop.f32.mrf.mxu1  ;;  %v3101_v11 = vrot.slane %v9068_v53, 7  ;;  %v9210_v53 = vld [vmem:[%s10597_s5] ss:$0 sm:$0xff] }
 0x47d   :  { %2389 = vrot.lane.b32.xlu2 %v2281_v23, %s6429_s22  ;;  %2984 = vst.msk [vmem:[#allocation2 + $0x13c] sm:$0xf] %vm2086_vm14, %v2000_v5  ;;  %v10792_v5 = vld [vmem:[#allocation6_spill] sm:$0xff]  ;;  %v6366_v23 = vunpack.i.h.bf16 %v9058_v26  ;;  %v1805_v42 = vshrl.u32 %v9066_v41, 16 }
 0x47e   :  { %4146 = vmatmul.bf16.gmra.mxu2 %v5663_v3  ;;  %v2644_v21 = vrot.slane %v10792_v5, 4  ;;  %v6365_v3 = vunpack.i.l.bf16 %v9058_v26  ;;  %v6117_v5 = vld [vmem:[#allocation2 + $0x190] sm:$0xf0] }
 0x47f   :  { %v9161_v59 = vmax.f32 %v874_v6, %v6366_v23  ;;  %v2648_v23 = vrot.slane %v9122_v38, 4 }
 0x480   :  { %2009 = vrot.lane.b32.xlu0 %v1804_v49, %s6430_s0  ;;  %v6354_v61 = vpop.permute.xlu1 %6353  ;;  %v10793_v49 = vrot.slane %v8166_v0, 7  ;;  %v9165_v24 = vmax.f32 %v873_v9, %v6365_v3  ;;  %v4119_v0 = vpop.f32.mrf.mxu2 }
 0x481   :  { %4274 = vmatmul.bf16.gmra.mxu3 %v5667_v60  ;;  %v2382_v14 = vpop.permute.xlu0 %2381  ;;  %v6356_v55 = vunpack.i.h.bf16 %v6354_v61  ;;  %v6355_v34 = vunpack.i.l.bf16 %v6354_v61  ;;  %v2647_v60 = vsel %vm7260_vm13, %v2644_v21, %v2646_v7  ;;  %v5674_v21 = vld [vmem:[#allocation2 + $0xa8] sm:$0xf] }
 0x482   :  { %2496 = vst.msk [vmem:[#allocation2 + $0x144] sm:$0xf] %vm2468_vm15, %v2382_v14  ;;  %v3100_v26 = vrot.slane %v10793_v49, 4  ;;  %v5790_v14 = vld [vmem:[#allocation2 + $0x188] sm:$0xf]  ;;  %v6387_v9 = vpack.i.bf16 %v9161_v59, %v9165_v24 }
 0x483   :  { %v9146_v18 = vmax.f32 %v872_v8, %v6356_v55  ;;  %v9150_v44 = vmax.f32 %v871_v1, %v6355_v34  ;;  %v9169_v8 = vrot.slane %v1805_v42, 7  ;;  %v5791_v55 = vor.u32 %v6117_v5, %v5790_v14  ;;  %v6089_v34 = vld [vmem:[#allocation2 + $0xb0] sm:$0xf0]  ;;  %v4247_v22 = vpop.f32.mrf.mxu3 }
 0x484   :  { %v3102_v1 = vsel %vm7196_vm6, %v3100_v26, %v3101_v11  ;;  %v9174_v46 = vpop.f32.mrf.mxu1  ;;  %v5675_v49 = vor.u32 %v6089_v34, %v5674_v21  ;;  %v6088_v26 = vld [vmem:[#allocation2 + $0xac] sm:$0xf]  ;;  %v10794_v14 = vld [vmem:[#allocation19_spill] sm:$0xff] }
 0x485   :  { %2772 = vrot.lane.b32.xlu2 %v2647_v60, %s6428_s24  ;;  %v6377_v61 = vpack.i.bf16 %v9146_v18, %v9150_v44  ;;  %v2650_v3 = vor.u32 %v9169_v8, %v1801_v19  ;;  %v1807_v60 = vrot.slane %v1805_v42, 4  ;;  %v714_v5 = vadd.f32 %v9039_v17, %v10794_v14  ;;  %v10798_v21 = vld [vmem:[#allocation27_spill] sm:$0xff] }
 0x487   :  { %6378 = vrot.lane.b32.xlu1 %v6377_v61, %s6429_s22  ;;  %v4248_v61 = vadd.f32 %v4247_v22, %v4119_v0  ;;  %v2651_v42 = vsel %vm7260_vm13, %v2648_v23, %v2650_v3  ;;  %v10796_v0 = vld [vmem:[#allocation5_spill] sm:$0xff]  ;;  %v775_v34 = vmul.f32 %v8674_v36, %v714_v5 }
 0x488   :  { %3211 = vrot.lane.b32.xlu0 %v3102_v1, %s6429_s22  ;;  %v2002_v7 = vpop.permute.xlu1 %2001  ;;  %v10795_v1 = vld [vmem:[#allocation21_spill] sm:$0xff] }
 0x489   :  { %2115 = vst.msk [vmem:[#allocation2 + $0x150] sm:$0xf] %vm2086_vm14, %v2002_v7  ;;  %v2765_v6 = vpop.permute.xlu0 %2764  ;;  %v716_v38 = vadd.f32 %v9070_v30, %v10795_v1  ;;  %v4376_v17 = vadd.f32 %v8921_v29, %v4248_v61  ;;  %v3103_v29 = vrot.slane %v3101_v11, 4  ;;  %v3104_v61 = vrot.slane %v9066_v41, 7 }
 0x48a   :  { %2985 = vst.msk [vmem:[#allocation2 + $0x148] sm:$0xf] %vm2086_vm14, %v2002_v7  ;;  %5952 = vmatmul.msk.bf16.gmra.mxu1 %vm4035_vm3, %v5791_v55  ;;  %v5676_v7 = vld [vmem:[#allocation2 + $0xb4] sm:$0xf0]  ;;  %v2282_v55 = vrot.slane %v2280_v45, 4  ;;  %v9222_v14 = vadd.f32 %v8689_v43, %v775_v34 }
 0x48b   :  { %3319 = vst.msk [vmem:[#allocation2 + $0x148] sm:$0xf] %vm2468_vm15, %v9026_v50  ;;  %v5679_v19 = vor.u32 %v6088_v26, %v5676_v7  ;;  %v1808_v50 = vor.u32 %v1807_v60, %v9128_v16  ;;  %v776_v22 = vmul.f32 %v8674_v36, %v716_v38  ;;  %v2283_v16 = vrot.slane %v9066_v41, 5 }
 0x48c   :  { %2879 = vst.msk [vmem:[#allocation2 + $0x144] sm:$0xf] %vm2851_vm0, %v2765_v6  ;;  %v3107_v60 = vrot.slane %v8962_v58, 7  ;;  %v4497_v26 = vmul.f32 %v9210_v53, %v4376_v17  ;;  %v6092_v17 = vld [vmem:[#allocation2 + $0xc8] sm:$0xf0] }
 0x48d   :  { %6388 = vrot.lane.b32.xlu2 %v6387_v9, %s6429_s22  ;;  %v10797_v9 = vld [vmem:[#allocation25_spill] sm:$0xff]  ;;  %v1809_v45 = vrot.slane %v1808_v50, 4  ;;  %v2284_v3 = vsel %vm7210_vm7, %v2282_v55, %v2283_v16  ;;  %v9225_v11 = vadd.f32 %v8689_v43, %v776_v22  ;;  %v5686_v55 = vld [vmem:[#allocation2 + $0xc0] sm:$0xf]  ;;  %v3110_v22 = vrot.slane %v8960_v25, 7 }
 0x48e   :  { %4151 = vmatmul.bf16.gmra.mxu2 %v5675_v49  ;;  %v721_v23 = vadd.f32 %v10798_v21, %v10797_v9  ;;  %v4374_v49 = vadd.f32 %v8900_v15, %v9115_v63  ;;  %v9233_v15 = vld [vmem:[%s10598_s6] ss:$0 sm:$0xff]  ;;  %v3105_v63 = vsel %vm7196_vm6, %v3103_v29, %v3104_v61 }
 0x48f   :  { %2387 = vrot.lane.b32.xlu1 %v10796_v0, %s6429_s22  ;;  %v1814_v38 = vsel %vm7233_vm10, %v1809_v45, %v8987_v10  ;;  %v878_v10 = vmax.f32 %v9225_v11, 0.0 }
 0x490   :  { %2774 = vrot.lane.b32.xlu0 %v2651_v42, %s6428_s24  ;;  %v3204_v30 = vpop.permute.xlu1 %3203  ;;  %v778_v1 = vmul.f32 %v8674_v36, %v721_v23  ;;  %v4548_v42 = vadd.f32 %v9233_v15, %v4497_v26  ;;  %v2285_v23 = vrot.slane %v2283_v16, 4 }
 0x491   :  { %4279 = vmatmul.bf16.gmra.mxu3 %v5679_v19  ;;  %3318 = vst.msk [vmem:[#allocation2 + $0x13c] sm:$0xf] %vm2468_vm15, %v3204_v30  ;;  %v4496_v19 = vmul.f32 %v9210_v53, %v4374_v49  ;;  %v877_v30 = vmax.f32 %v9222_v14, 0.0  ;;  %v5688_v49 = vld [vmem:[#allocation2 + $0xcc] sm:$0xf0] }
 0x492   :  { %3374 = vst.msk [vmem:[#allocation2 + $0x13c] sm:$0xf] %vm2851_vm0, %v2765_v6  ;;  %v10799_v6 = vld [vmem:[#allocation24_spill] sm:$0xff]  ;;  %v9259_v21 = vadd.f32 %v8689_v43, %v778_v1 }
 0x493   :  { %v777_v5 = vmul.f32 %v8674_v36, %v10799_v6  ;;  %v3109_v36 = vrot.slane %v3107_v60, 4  ;;  %v4547_v26 = vadd.f32 %v9233_v15, %v4496_v19  ;;  %v4595_v6 = vmax.f32 %v4548_v42, 0.0 }
 0x494   :  { %v10656_v1 = vmax.f32 %v9259_v21, 0.0 }
 0x495   :  { %2391 = vrot.lane.b32.xlu2 %v2284_v3, %s6429_s22  ;;  %v9256_v9 = vadd.f32 %v8689_v43, %v777_v5  ;;  %v3111_v45 = vsel %vm7196_vm6, %v3109_v36, %v3110_v22  ;;  %v5687_v3 = vor.u32 %v6092_v17, %v5686_v55  ;;  %v6091_v43 = vld [vmem:[#allocation2 + $0xc4] sm:$0xf]  ;;  %v4594_v19 = vmax.f32 %v4547_v26, 0.0 }
 0x496   :  { %v4690_v42 = vrot.slane %v4595_v6, 1  ;;  %v10800_v26 = vshll.u32 %v8962_v58, 16 }
 0x497   :  { %v4122_v7 = vpop.f32.mrf.mxu2  ;;  %3213 = vrot.lane.b32.xlu1 %v3105_v63, %s6429_s22  ;;  %v10655_v16 = vmax.f32 %v9256_v9, 0.0  ;;  %v5691_v63 = vor.u32 %v6091_v43, %v5688_v49  ;;  %v4689_v49 = vrot.slane %v4594_v19, 1 }
 0x498   :  { %2011 = vrot.lane.b32.xlu0 %v1814_v38, %s6430_s0  ;;  %v4250_v50 = vpop.f32.mrf.mxu3  ;;  %v9248_v0 = vpop.permute.xlu1 %2766  ;;  %v2287_v38 = vsel %vm7210_vm7, %v2285_v23, %v2286_v52  ;;  %v2652_v23 = vrot.slane %v9169_v8, 4  ;;  %v4876_v43 = vmax.f32 %v4594_v19, %v4690_v42 }
 0x499   :  { %v4251_v34 = vadd.f32 %v4250_v50, %v4122_v7  ;;  %3375 = vst.msk [vmem:[#allocation2 + $0x148] sm:$0xf] %vm2851_vm0, %v9248_v0  ;;  %v6392_v52 = vpack.i.bf16 %v10656_v1, %v10655_v16 }
 0x49b   :  { %v4379_v29 = vadd.f32 %v8926_v2, %v4251_v34  ;;  %v6382_v2 = vpack.i.bf16 %v878_v10, %v877_v30 }
 0x49d   :  { %3217 = vrot.lane.b32.xlu2 %v3111_v45, %s6429_s22  ;;  %v4498_v5 = vmul.f32 %v9210_v53, %v4379_v29  ;;  %v3208_v29 = vpop.permute.xlu2 %3207 }
 0x49e   :  { %4156 = vmatmul.bf16.gmra.mxu2 %v5687_v3 }
 0x49f   :  { %v4549_v7 = vadd.f32 %v9233_v15, %v4498_v5  ;;  %v4124_v36 = vpop.f32.mrf.mxu2  ;;  %6383 = vrot.lane.b32.xlu1 %v6382_v2, %s6428_s24  ;;  %v2654_v5 = vor.u32 %v8993_v32, %v10800_v26 }
 0x4a0   :  { %2393 = vrot.lane.b32.xlu0 %v2287_v38, %s6429_s22  ;;  %v4252_v50 = vpop.f32.mrf.mxu3  ;;  %v2004_v55 = vpop.permute.xlu1 %2003  ;;  %v5748_v16 = vld [vmem:[#allocation2 + $0x144] sm:$0xf0] }
 0x4a1   :  { %4284 = vmatmul.bf16.gmra.mxu3 %v5691_v63  ;;  %v4596_v17 = vmax.f32 %v4549_v7, 0.0  ;;  %v4253_v34 = vadd.f32 %v4252_v50, %v4124_v36  ;;  %2116 = vst.msk [vmem:[#allocation2 + $0x15c] sm:$0xf] %vm2086_vm14, %v2004_v55  ;;  %v2655_v8 = vsel %vm7260_vm13, %v2652_v23, %v2654_v5  ;;  %v10801_v36 = vsel %vm7233_vm10, %v9013_v54, %v9015_v28  ;;  %v6095_v50 = vld [vmem:[#allocation2 + $0xe0] sm:$0xf0] }
 0x4a2   :  { %2986 = vst.msk [vmem:[#allocation2 + $0x154] sm:$0xf] %vm2086_vm14, %v2004_v55  ;;  %v4926_v55 = vrot.slane %v4876_v43, 7  ;;  %v5700_v54 = vld [vmem:[#allocation2 + $0xe4] sm:$0xf0] }
 0x4a3   :  { %v4692_v45 = vrot.slane %v4596_v17, 1  ;;  %v4381_v3 = vadd.f32 %v8938_v4, %v4253_v34  ;;  %3320 = vst.msk [vmem:[#allocation2 + $0x154] sm:$0xf] %vm2468_vm15, %v3208_v29  ;;  %v4691_v4 = vsel %vm4688_vm4, %v4689_v49, %v4690_v42  ;;  %v6094_v5 = vld [vmem:[#allocation2 + $0xdc] sm:$0xf] }
 0x4a4   :  { %v5703_v43 = vor.u32 %v6094_v5, %v5700_v54  ;;  %v5712_v5 = vld [vmem:[#allocation2 + $0xfc] sm:$0xf0] }
 0x4a5   :  { %6393 = vrot.lane.b32.xlu2 %v6392_v52, %s6428_s24  ;;  %v4499_v2 = vmul.f32 %v9210_v53, %v4381_v3  ;;  %v4693_v63 = vsel %vm4688_vm4, %v4690_v42, %v4692_v45  ;;  %v4828_v42 = vmax.f32 %v4594_v19, %v4691_v4  ;;  %v3106_v52 = vrot.slane %v3104_v61, 4 }
 0x4a6   :  { %v4829_v38 = vmax.f32 %v4595_v6, %v4693_v63  ;;  %v5698_v6 = vld [vmem:[#allocation2 + $0xd8] sm:$0xf] }
 0x4a7   :  { %v4550_v7 = vadd.f32 %v9233_v15, %v4499_v2  ;;  %2013 = vrot.lane.b32.xlu1 %v10801_v36, %s6430_s0  ;;  %v5699_v49 = vor.u32 %v6095_v50, %v5698_v6  ;;  %v3108_v19 = vsel %vm7196_vm6, %v3106_v52, %v3107_v60  ;;  %v6098_v52 = vld [vmem:[#allocation2 + $0xf8] sm:$0xf0] }
 0x4a8   :  { %2776 = vrot.lane.b32.xlu0 %v2655_v8, %s6428_s24  ;;  %v2386_v32 = vpop.permute.xlu1 %2385  ;;  %v4927_v34 = vrot.slane %v4829_v38, 7 }
 0x4a9   :  { %v4597_v29 = vmax.f32 %v4550_v7, 0.0  ;;  %2498 = vst.msk [vmem:[#allocation2 + $0x15c] sm:$0xf] %vm2468_vm15, %v2386_v32 }
 0x4aa   :  { %v4928_v23 = vsel %vm3006_vm2, %v4926_v55, %v4927_v34 }
 0x4ab   :  { %v4694_v3 = vrot.slane %v4597_v29, 1  ;;  %v5065_v26 = vmax.f32 %v4828_v42, %v4928_v23 }
 0x4ad   :  { %v4695_v2 = vsel %vm4688_vm4, %v4692_v45, %v4694_v3 }
 0x4ae   :  { %4161 = vmatmul.bf16.gmra.mxu2 %v5699_v49  ;;  %v4127_v63 = vpop.f32.mrf.mxu2  ;;  %v4830_v8 = vmax.f32 %v4596_v17, %v4695_v2  ;;  %v5710_v49 = vld [vmem:[#allocation2 + $0xf0] sm:$0xf] }
 0x4af   :  { %v4255_v41 = vpop.f32.mrf.mxu3  ;;  %3215 = vrot.lane.b32.xlu1 %v3108_v19, %s6429_s22 }
 0x4b0   :  { %v4256_v61 = vadd.f32 %v4255_v41, %v4127_v63  ;;  %v2769_v4 = vpop.permute.xlu1 %2768  ;;  %v4929_v7 = vrot.slane %v4830_v8, 7 }
 0x4b1   :  { %4289 = vmatmul.bf16.gmra.mxu3 %v5703_v43  ;;  %2881 = vst.msk [vmem:[#allocation2 + $0x15c] sm:$0xf] %vm2851_vm0, %v2769_v4 }
 0x4b2   :  { %v4384_v36 = vadd.f32 %v8954_v27, %v4256_v61  ;;  %3376 = vst.msk [vmem:[#allocation2 + $0x154] sm:$0xf] %vm2851_vm0, %v2769_v4  ;;  %v4930_v45 = vsel %vm3006_vm2, %v4927_v34, %v4929_v7  ;;  %v5711_v34 = vor.u32 %v6098_v52, %v5710_v49 }
 0x4b3   :  { %v5066_v58 = vmax.f32 %v4829_v38, %v4930_v45  ;;  %v6097_v38 = vld [vmem:[#allocation2 + $0xf4] sm:$0xf] }
 0x4b4   :  { %v4500_v32 = vmul.f32 %v9210_v53, %v4384_v36  ;;  %v5715_v63 = vor.u32 %v6097_v38, %v5712_v5 }
 0x4b5   :  { %v9323_v60 = vpack.c.bf16 %v5066_v58, %v5065_v26 }
 0x4b6   :  { %v4551_v17 = vadd.f32 %v9233_v15, %v4500_v32  ;;  %v4129_v50 = vpop.f32.mrf.mxu2 }
 0x4b7   :  { %v4257_v55 = vpop.f32.mrf.mxu3  ;;  %2778 = vrot.lane.b32.xlu1 %v9034_v47, %s6428_s24 }
 0x4b8   :  { %v4598_v42 = vmax.f32 %v4551_v17, 0.0  ;;  %v4258_v6 = vadd.f32 %v4257_v55, %v4129_v50  ;;  %v9338_v17 = vpop.permute.xlu2 %2770 }
 0x4ba   :  { %v4696_v27 = vrot.slane %v4598_v42, 1  ;;  %v4386_v23 = vadd.f32 %v8975_v40, %v4258_v6 }
 0x4bc   :  { %v4501_v54 = vmul.f32 %v9210_v53, %v4386_v23  ;;  %v4697_v26 = vsel %vm4688_vm4, %v4694_v3, %v4696_v27  ;;  %v5722_v23 = vld [vmem:[#allocation2 + $0x108] sm:$0xf] }
 0x4bd   :  { %v4831_v2 = vmax.f32 %v4597_v29, %v4697_v26 }
 0x4be   :  { %4166 = vmatmul.bf16.gmra.mxu2 %v5711_v34  ;;  %v4552_v43 = vadd.f32 %v9233_v15, %v4501_v54  ;;  %v4132_v47 = vpop.f32.mrf.mxu2  ;;  %v5724_v54 = vld [vmem:[#allocation2 + $0x114] sm:$0xf0] }
 0x4bf   :  { %v4931_v19 = vrot.slane %v4831_v2, 7 }
 0x4c0   :  { %v4599_v41 = vmax.f32 %v4552_v43, 0.0  ;;  %v4260_v61 = vpop.f32.mrf.mxu3  ;;  %v6100_v43 = vld [vmem:[#allocation2 + $0x10c] sm:$0xf] }
 0x4c1   :  { %4294 = vmatmul.bf16.gmra.mxu3 %v5715_v63  ;;  %v4261_v4 = vadd.f32 %v4260_v61, %v4132_v47  ;;  %v4932_v40 = vsel %vm3006_vm2, %v4929_v7, %v4931_v19  ;;  %v5727_v47 = vor.u32 %v6100_v43, %v5724_v54  ;;  %v6104_v54 = vld [vmem:[#allocation2 + $0x128] sm:$0xf0] }
 0x4c2   :  { %v4698_v36 = vrot.slane %v4599_v41, 1  ;;  %v5067_v45 = vmax.f32 %v4830_v8, %v4932_v40 }
 0x4c3   :  { %v4389_v58 = vadd.f32 %v9052_v48, %v4261_v4  ;;  %v6101_v48 = vld [vmem:[#allocation2 + $0x110] sm:$0xf0] }
 0x4c4   :  { %v4699_v3 = vsel %vm4688_vm4, %v4696_v27, %v4698_v36 }
 0x4c5   :  { %v4502_v32 = vmul.f32 %v9210_v53, %v4389_v58  ;;  %v9336_v29 = vmax.f32 %v4598_v42, %v4699_v3  ;;  %v5723_v42 = vor.u32 %v6101_v48, %v5722_v23 }
 0x4c6   :  { %v4134_v50 = vpop.f32.mrf.mxu2 }
 0x4c7   :  { %v4553_v55 = vadd.f32 %v9233_v15, %v4502_v32  ;;  %v4933_v6 = vrot.slane %v9336_v29, 7 }
 0x4c8   :  { %v4262_v52 = vpop.f32.mrf.mxu3 }
 0x4c9   :  { %v4600_v7 = vmax.f32 %v4553_v55, 0.0  ;;  %v4263_v49 = vadd.f32 %v4262_v52, %v4134_v50  ;;  %v4934_v8 = vsel %vm3006_vm2, %v4931_v19, %v4933_v6 }
 0x4ca   :  { %v5068_v34 = vmax.f32 %v4831_v2, %v4934_v8 }
 0x4cb   :  { %v4700_v27 = vrot.slane %v4600_v7, 1  ;;  %v4391_v38 = vadd.f32 %v9096_v62, %v4263_v49  ;;  %v9354_v62 = vpop.f32.mrf.mxu1 }
 0x4cc   :  { %v9344_v26 = vpack.c.bf16 %v5068_v34, %v5067_v45 }
 0x4cd   :  { %v4503_v5 = vmul.f32 %v9210_v53, %v4391_v38  ;;  %v4701_v63 = vsel %vm4688_vm4, %v4698_v36, %v4700_v27  ;;  %v5734_v38 = vld [vmem:[#allocation2 + $0x120] sm:$0xf] }
 0x4ce   :  { %4171 = vmatmul.bf16.gmra.mxu2 %v5723_v42  ;;  %v9348_v4 = vmax.f32 %v4599_v41, %v4701_v63  ;;  %v10802_v41 = vshrl.u32 %v8960_v25, 16 }
 0x4cf   :  { %v2008_v61 = vpop.permute.xlu2 %2007  ;;  %v9351_v19 = vadd.f32 %v9233_v15, %v4503_v5 }
 0x4d0   :  { %2118 = vst.msk [vmem:[#allocation2 + $0x174] sm:$0xf] %vm2086_vm14, %v2008_v61  ;;  %v4935_v2 = vrot.slane %v9348_v4, 7  ;;  %v1827_v3 = vrot.slane %v10802_v41, 4 }
 0x4d1   :  { %4299 = vmatmul.bf16.gmra.mxu3 %v5727_v47  ;;  %2988 = vst.msk [vmem:[#allocation2 + $0x16c] sm:$0xf] %vm2086_vm14, %v2008_v61  ;;  %v4601_v40 = vmax.f32 %v9351_v19, 0.0  ;;  %v5735_v61 = vor.u32 %v6104_v54, %v5734_v38 }
 0x4d2   :  { %v6369_v45 = vpop.permute.xlu0 %6368  ;;  %v9362_v32 = vsel %vm3006_vm2, %v4933_v6, %v4935_v2  ;;  %v1828_v34 = vor.u32 %v1827_v3, %v9015_v28  ;;  %v6103_v3 = vld [vmem:[#allocation2 + $0x124] sm:$0xf] }
 0x4d3   :  { %v6371_v36 = vunpack.i.h.bf16 %v6369_v45  ;;  %v6370_v58 = vunpack.i.l.bf16 %v6369_v45  ;;  %v5069_v50 = vmax.f32 %v9336_v29, %v9362_v32  ;;  %v9368_v55 = vrot.slane %v4601_v40, 1  ;;  %v9386_v5 = vpop.f32.mrf.mxu1 }
 0x4d4   :  { %v1829_v28 = vrot.slane %v1828_v34, 4 }
 0x4d5   :  { %v1360_v52 = vmax.f32 %v8968_v31, %v6371_v36  ;;  %v1359_v23 = vmax.f32 %v8972_v33, %v6370_v58  ;;  %v4703_v31 = vsel %vm4688_vm4, %v4700_v27, %v9368_v55  ;;  %v5736_v27 = vld [vmem:[#allocation2 + $0x12c] sm:$0xf0] }
 0x4d6   :  { %v9395_v45 = vmax.f32 %v4600_v7, %v4703_v31 }
 0x4d7   :  { %v9372_v49 = vpack.c.bf16 %v1360_v52, %v1360_v52  ;;  %v9374_v8 = vpack.c.bf16 %v1359_v23, %v1359_v23  ;;  %v2390_v48 = vpop.permute.xlu2 %2389  ;;  %v4137_v41 = vpop.f32.mrf.mxu2  ;;  %v5739_v52 = vor.u32 %v6103_v3, %v5736_v27 }
 0x4d8   :  { %2500 = vst.msk [vmem:[#allocation2 + $0x174] sm:$0xf] %vm2468_vm15, %v2390_v48  ;;  %v4937_v31 = vrot.slane %v9395_v45, 7 }
 0x4d9   :  { %3430 = vst.msk [vmem:[#allocation2 + $0x1ac] sm:$0xf] %vm1419_vm1, %v9372_v49  ;;  %v1831_v6 = vshll.u32 %v9374_v8, 16  ;;  %v1835_v42 = vshrl.u32 %v9374_v8, 16  ;;  %v1841_v47 = vshll.u32 %v9372_v49, 16  ;;  %v3113_v3 = vrot.slane %v9374_v8, 7 }
 0x4da   :  { %3429 = vst.msk [vmem:[#allocation2 + $0x1a0] sm:$0xf] %vm1419_vm1, %v9374_v8  ;;  %v2384_v33 = vpop.permute.xlu0 %2383  ;;  %v4938_v27 = vsel %vm3006_vm2, %v4935_v2, %v4937_v31 }
 0x4db   :  { %1456 = vst.msk [vmem:[#allocation2 + $0x1b0] sm:$0xf] %vm1419_vm1, %v9374_v8  ;;  %v1833_v43 = vrot.slane %v1831_v6, 5  ;;  %v1837_v63 = vrot.slane %v1835_v42, 4  ;;  %v9409_v48 = vrot.slane %v1841_v47, 5 }
 0x4dc   :  { %1457 = vst.msk [vmem:[#allocation2 + $0x1bc] sm:$0xf] %vm1419_vm1, %v9372_v49 }
 0x4dd   :  { %2934 = vst.msk [vmem:[#allocation2 + $0x1a8] sm:$0xf] %vm1419_vm1, %v9374_v8  ;;  %v1834_v36 = vsel %vm7233_vm10, %v1829_v28, %v1833_v43  ;;  %v1838_v58 = vor.u32 %v1837_v63, %v1833_v43  ;;  %v10667_v43 = vrot.slane %v9374_v8, 5 }
 0x4de   :  { %2935 = vst.msk [vmem:[#allocation2 + $0x1b4] sm:$0xf] %vm1419_vm1, %v9372_v49  ;;  %2015 = vrot.lane.b32.xlu1 %v1834_v36, %s6430_s0  ;;  %4176 = vmatmul.bf16.gmra.mxu2 %v5735_v61  ;;  %v4265_v34 = vpop.f32.mrf.mxu3  ;;  %v10803_v36 = vrot.slane %v8960_v25, 5 }
 0x4df   :  { %2497 = vst.msk [vmem:[#allocation2 + $0x150] sm:$0xf] %vm2468_vm15, %v2384_v33  ;;  %v9405_v7 = vpop.permute.xlu2 %2772  ;;  %v1839_v23 = vrot.slane %v1838_v58, 4  ;;  %v4266_v33 = vadd.f32 %v4265_v34, %v4137_v41  ;;  %v5070_v41 = vmax.f32 %v9348_v4, %v4938_v27  ;;  %v2661_v34 = vrot.slane %v1835_v42, 7 }
 0x4e0   :  { %2880 = vst.msk [vmem:[#allocation2 + $0x150] sm:$0xf] %vm2851_vm0, %v9248_v0  ;;  %v6120_v38 = vld [vmem:[#allocation2 + $0x1a8] sm:$0xf0]  ;;  %v2291_v58 = vrot.slane %v10803_v36, 4 }
 0x4e1   :  { %4304 = vmatmul.bf16.gmra.mxu3 %v5739_v52  ;;  %2883 = vst.msk [vmem:[#allocation2 + $0x174] sm:$0xf] %vm2851_vm0, %v9405_v7  ;;  %v1844_v54 = vsel %vm7233_vm10, %v1839_v23, %v9409_v48  ;;  %v5802_v28 = vld [vmem:[#allocation2 + $0x1a0] sm:$0xf]  ;;  %v4394_v61 = vadd.f32 %v9134_v12, %v4266_v33  ;;  %v1845_v52 = vshrl.u32 %v9372_v49, 16  ;;  %v9434_v23 = vpop.f32.mrf.mxu1  ;;  %v9444_v4 = vpack.c.bf16 %v5070_v41, %v5069_v50 }
 0x4e2   :  { %v3210_v63 = vpop.permute.xlu0 %3209  ;;  %2017 = vrot.lane.b32.xlu2 %v1844_v54, %s6430_s0  ;;  %v5803_v0 = vor.u32 %v6120_v38, %v5802_v28  ;;  %v2293_v2 = vsel %vm7210_vm7, %v2291_v58, %v10667_v43  ;;  %v3112_v54 = vrot.slane %v3110_v22, 4  ;;  %v6107_v28 = vld [vmem:[#allocation2 + $0x140] sm:$0xf0]  ;;  %v2662_v25 = vor.u32 %v2661_v34, %v1831_v6  ;;  %v5746_v22 = vld [vmem:[#allocation2 + $0x138] sm:$0xf] }
 0x4e3   :  { %3321 = vst.msk [vmem:[#allocation2 + $0x160] sm:$0xf] %vm2468_vm15, %v3210_v63  ;;  %v4504_v12 = vmul.f32 %v9210_v53, %v4394_v61  ;;  %v4139_v63 = vpop.f32.mrf.mxu2  ;;  %v9454_v42 = vrot.slane %v1845_v52, 7 }
 0x4e4   :  { %3377 = vst.msk [vmem:[#allocation2 + $0x160] sm:$0xf] %vm2851_vm0, %v9338_v17  ;;  %5953 = vmatmul.msk.bf16.gmra.mxu1 %vm4035_vm3, %v5803_v0  ;;  %v3114_v50 = vsel %vm7196_vm6, %v3112_v54, %v3113_v3 }
 0x4e5   :  { %v9448_v38 = vadd.f32 %v9233_v15, %v4504_v12  ;;  %v2660_v12 = vrot.slane %v9005_v20, 4 }
 0x4e6   :  { %2397 = vrot.lane.b32.xlu1 %v2293_v2, %s6429_s22  ;;  %v4267_v61 = vpop.f32.mrf.mxu3  ;;  %v5747_v2 = vor.u32 %v6107_v28, %v5746_v22  ;;  %v10804_v28 = vmax.f32 %v9064_v56, 0.0 }
 0x4e7   :  { %v6389_v33 = vpop.permute.xlu2 %6388  ;;  %v4602_v29 = vmax.f32 %v9448_v38, 0.0  ;;  %v4268_v32 = vadd.f32 %v4267_v61, %v4139_v63 }
 0x4e8   :  { %v6391_v0 = vunpack.i.h.bf16 %v6389_v33  ;;  %v6390_v27 = vunpack.i.l.bf16 %v6389_v33 }
 0x4e9   :  { %v4704_v33 = vrot.slane %v4602_v29, 1  ;;  %v4396_v63 = vadd.f32 %v9174_v46, %v4268_v32  ;;  %v10805_v46 = vmax.f32 %v9061_v37, 0.0  ;;  %v6106_v32 = vld [vmem:[#allocation2 + $0x13c] sm:$0xf]  ;;  %v9494_v22 = vpop.f32.mrf.mxu1 }
 0x4ea   :  { %v1364_v36 = vmax.f32 %v9161_v59, %v6391_v0  ;;  %v1363_v58 = vmax.f32 %v9165_v24, %v6390_v27  ;;  %v6374_v41 = vpop.permute.xlu0 %6373  ;;  %3219 = vrot.lane.b32.xlu2 %v3114_v50, %s6429_s22  ;;  %v2664_v59 = vrot.slane %v2661_v34, 4  ;;  %v2666_v24 = vor.u32 %v9454_v42, %v1841_v47 }
 0x4eb   :  { %v6376_v54 = vunpack.i.h.bf16 %v6374_v41  ;;  %v6375_v61 = vunpack.i.l.bf16 %v6374_v41  ;;  %v4505_v20 = vmul.f32 %v9210_v53, %v4396_v63  ;;  %v2663_v50 = vsel %vm7260_vm13, %v2660_v12, %v2662_v25 }
 0x4ec   :  { %v9470_v6 = vpack.c.bf16 %v1364_v36, %v1364_v36  ;;  %v9472_v1 = vpack.c.bf16 %v1363_v58, %v1363_v58  ;;  %v5751_v34 = vor.u32 %v6106_v32, %v5748_v16  ;;  %v4705_v56 = vsel %vm4688_vm4, %v9368_v55, %v4704_v33 }
 0x4ed   :  { %v9480_v0 = vmax.f32 %v10804_v28, %v6376_v54  ;;  %v9484_v27 = vmax.f32 %v10805_v46, %v6375_v61  ;;  %v9499_v37 = vadd.f32 %v9233_v15, %v4505_v20  ;;  %v2667_v55 = vsel %vm7260_vm13, %v2664_v59, %v2666_v24 }
 0x4ee   :  { %3434 = vst.msk [vmem:[#allocation2 + $0x1dc] sm:$0xf] %vm1419_vm1, %v9470_v6  ;;  %2780 = vrot.lane.b32.xlu1 %v2663_v50, %s6428_s24  ;;  %4181 = vmatmul.bf16.gmra.mxu2 %v5747_v2  ;;  %v10658_v47 = vshll.u32 %v9470_v6, 16  ;;  %v10663_v16 = vrot.slane %v9472_v1, 7  ;;  %v10659_v36 = vshrl.u32 %v9470_v6, 16  ;;  %v10657_v63 = vrot.slane %v9470_v6, 7 }
 0x4ef   :  { %3433 = vst.msk [vmem:[#allocation2 + $0x1d0] sm:$0xf] %vm1419_vm1, %v9472_v1  ;;  %v6397_v25 = vpack.i.bf16 %v9480_v0, %v9484_v27  ;;  %v4603_v58 = vmax.f32 %v9499_v37, 0.0  ;;  %v4835_v61 = vmax.f32 %v4601_v40, %v4705_v56  ;;  %v10664_v19 = vrot.slane %v9472_v1, 5  ;;  %v2392_v46 = vpop.permute.xlu2 %2391 }
 0x4f0   :  { %1460 = vst.msk [vmem:[#allocation2 + $0x1e0] sm:$0xf] %vm1419_vm1, %v9472_v1  ;;  %v9515_v12 = vrot.slane %v10658_v47, 5  ;;  %v3127_v2 = vrot.slane %v10663_v16, 4  ;;  %v9539_v20 = vrot.slane %v10659_v36, 4  ;;  %v3115_v36 = vrot.slane %v3113_v3, 4 }
 0x4f1   :  { %1461 = vst.msk [vmem:[#allocation2 + $0x1ec] sm:$0xf] %vm1419_vm1, %v9470_v6  ;;  %4309 = vmatmul.bf16.gmra.mxu3 %v5751_v34  ;;  %6398 = vrot.lane.b32.xlu0 %v6397_v25, %s6429_s22  ;;  %v4142_v41 = vpop.f32.mrf.mxu2  ;;  %v9529_v59 = vrot.slane %v4603_v58, 1  ;;  %v4939_v40 = vrot.slane %v4835_v61, 7  ;;  %v5760_v47 = vld [vmem:[#allocation2 + $0x15c] sm:$0xf0] }
 0x4f2   :  { %2938 = vst.msk [vmem:[#allocation2 + $0x1d8] sm:$0xf] %vm1419_vm1, %v9472_v1  ;;  %v2010_v54 = vpop.permute.xlu0 %2009  ;;  %2782 = vrot.lane.b32.xlu2 %v2667_v55, %s6428_s24  ;;  %v9535_v24 = vsel %vm7196_vm6, %v3127_v2, %v10657_v63  ;;  %v1871_v14 = vshll.u32 %v9472_v1, 16 }
 0x4f3   :  { %2939 = vst.msk [vmem:[#allocation2 + $0x1e4] sm:$0xf] %vm1419_vm1, %v9470_v6  ;;  %v4707_v50 = vsel %vm4688_vm4, %v4704_v33, %v9529_v59  ;;  %v4940_v25 = vsel %vm3006_vm2, %v4937_v31, %v4939_v40  ;;  %v10660_v33 = vrot.slane %v9470_v6, 5  ;;  %v5758_v31 = vld [vmem:[#allocation2 + $0x150] sm:$0xf] }
 0x4f4   :  { %v4270_v28 = vpop.f32.mrf.mxu3  ;;  %2119 = vst.msk [vmem:[#allocation2 + $0x180] sm:$0xf] %vm2086_vm14, %v2010_v54  ;;  %v9551_v56 = vmax.f32 %v4602_v29, %v4707_v50 }
 0x4f5   :  { %v4271_v32 = vadd.f32 %v4270_v28, %v4142_v41  ;;  %2989 = vst.msk [vmem:[#allocation2 + $0x178] sm:$0xf] %vm2086_vm14, %v2010_v54  ;;  %v5071_v41 = vmax.f32 %v9395_v45, %v4940_v25  ;;  %v2306_v54 = vrot.slane %v10664_v19, 4  ;;  %v9562_v28 = vpop.f32.mrf.mxu1  ;;  %v1847_v45 = vrot.slane %v1845_v52, 4 }
 0x4f6   :  { %2501 = vst.msk [vmem:[#allocation2 + $0x180] sm:$0xf] %vm2468_vm15, %v2392_v46  ;;  %v4941_v2 = vrot.slane %v9551_v56, 7 }
 0x4f7   :  { %v4399_v55 = vadd.f32 %v9354_v62, %v4271_v32  ;;  %v9576_v50 = vsel %vm7210_vm7, %v2306_v54, %v10660_v33 }
 0x4f8   :  { %v4942_v32 = vsel %vm3006_vm2, %v4939_v40, %v4941_v2 }
 0x4f9   :  { %v4506_v38 = vmul.f32 %v9210_v53, %v4399_v55  ;;  %2395 = vrot.lane.b32.xlu0 %v9023_v35, %s6429_s22  ;;  %v4144_v29 = vpop.f32.mrf.mxu2  ;;  %v6379_v46 = vpop.permute.xlu1 %6378  ;;  %v6110_v35 = vld [vmem:[#allocation2 + $0x158] sm:$0xf0]  ;;  %v5072_v63 = vmax.f32 %v4835_v61, %v4942_v32  ;;  %v6422_v61 = vld [vmem:[%s10594_s2] ss:$0 sm:$0xff]  ;;  %v6109_v32 = vld [vmem:[#allocation2 + $0x154] sm:$0xf] }
 0x4fa   :  { %v3212_v62 = vpop.permute.xlu0 %3211  ;;  %v6381_v25 = vunpack.i.h.bf16 %v6379_v46  ;;  %v6380_v55 = vunpack.i.l.bf16 %v6379_v46  ;;  %v5759_v40 = vor.u32 %v6110_v35, %v5758_v31  ;;  %v1848_v31 = vor.u32 %v1847_v45, %v9409_v48 }
 0x4fb   :  { %3322 = vst.msk [vmem:[#allocation2 + $0x16c] sm:$0xf] %vm2468_vm15, %v3212_v62  ;;  %v9580_v34 = vadd.f32 %v9233_v15, %v4506_v38  ;;  %v10806_v38 = vld [vmem:[#allocation28_spill] sm:$0xff]  ;;  %v9594_v35 = vpack.c.bf16 %v5072_v63, %v5071_v41 }
 0x4fc   :  { %v4272_v52 = vpop.f32.mrf.mxu3  ;;  %3378 = vst.msk [vmem:[#allocation2 + $0x16c] sm:$0xf] %vm2851_vm0, %v9405_v7  ;;  %v1362_v33 = vmax.f32 %v9146_v18, %v6381_v25  ;;  %v1361_v46 = vmax.f32 %v9150_v44, %v6380_v55  ;;  %v779_v62 = vmul.f32 %v6422_v61, %v10806_v38  ;;  %v10669_v7 = vrot.slane %v9372_v49, 7 }
 0x4fd   :  { %v4273_v54 = vadd.f32 %v4272_v52, %v4144_v29  ;;  %v5763_v44 = vor.u32 %v6109_v32, %v5760_v47  ;;  %v4604_v25 = vmax.f32 %v9580_v34, 0.0  ;;  %v1849_v45 = vrot.slane %v1848_v31, 4 }
 0x4fe   :  { %4186 = vmatmul.bf16.gmra.mxu2 %v5759_v40  ;;  %v9597_v29 = vpack.c.bf16 %v1362_v33, %v1362_v33  ;;  %v9599_v18 = vpack.c.bf16 %v1361_v46, %v1361_v46  ;;  %v3117_v55 = vsel %vm7196_vm6, %v3115_v36, %v10669_v7  ;;  %v6423_v36 = vld [vmem:[%s10595_s3] ss:$0 sm:$0xff]  ;;  %v10666_v31 = vrot.slane %v9372_v49, 5 }
 0x4ff   :  { %v4401_v3 = vadd.f32 %v9386_v5, %v4273_v54  ;;  %v9619_v41 = vadd.f32 %v6423_v36, %v779_v62  ;;  %v9626_v54 = vpop.f32.mrf.mxu1  ;;  %v4708_v46 = vrot.slane %v4604_v25, 1  ;;  %v2668_v7 = vrot.slane %v9454_v42, 4 }
 0x500   :  { %3432 = vst.msk [vmem:[#allocation2 + $0x1c4] sm:$0xf] %vm1419_vm1, %v9597_v29  ;;  %v1851_v48 = vshll.u32 %v9599_v18, 16  ;;  %v1855_v47 = vshrl.u32 %v9599_v18, 16 }
 0x501   :  { %v4507_v52 = vmul.f32 %v9210_v53, %v4401_v3  ;;  %4314 = vmatmul.bf16.gmra.mxu3 %v5763_v44  ;;  %3221 = vrot.lane.b32.xlu0 %v3117_v55, %s6429_s22  ;;  %v9610_v5 = vpop.f32.mrf.mxu2  ;;  %3431 = vst.msk [vmem:[#allocation2 + $0x1b8] sm:$0xf] %vm1419_vm1, %v9599_v18  ;;  %v2388_v63 = vpop.permute.xlu1 %2387  ;;  %v10662_v32 = vmax.f32 %v9619_v41, 0.0  ;;  %v4709_v55 = vsel %vm4688_vm4, %v9529_v59, %v4708_v46  ;;  %v10668_v59 = vshll.u32 %v9597_v29, 16 }
 0x502   :  { %v2775_v34 = vpop.permute.xlu0 %2774  ;;  %1458 = vst.msk [vmem:[#allocation2 + $0x1c8] sm:$0xf] %vm1419_vm1, %v9599_v18  ;;  %v1853_v40 = vrot.slane %v1851_v48, 5  ;;  %v1857_v38 = vrot.slane %v1855_v47, 4 }
 0x503   :  { %v9622_v33 = vadd.f32 %v9233_v15, %v4507_v52  ;;  %1459 = vst.msk [vmem:[#allocation2 + $0x1d4] sm:$0xf] %vm1419_vm1, %v9597_v29 }
 0x504   :  { %v9630_v61 = vpop.f32.mrf.mxu3  ;;  %2936 = vst.msk [vmem:[#allocation2 + $0x1c0] sm:$0xf] %vm1419_vm1, %v9599_v18  ;;  %v1854_v15 = vsel %vm7233_vm10, %v1849_v45, %v1853_v40  ;;  %v1858_v44 = vor.u32 %v1857_v38, %v1853_v40 }
 0x505   :  { %v10661_v62 = vmax.f32 %v9622_v33, 0.0  ;;  %2937 = vst.msk [vmem:[#allocation2 + $0x1cc] sm:$0xf] %vm1419_vm1, %v9597_v29  ;;  %2019 = vrot.lane.b32.xlu2 %v1854_v15, %s6430_s0  ;;  %v2297_v15 = vrot.slane %v10666_v31, 4 }
 0x506   :  { %2499 = vst.msk [vmem:[#allocation2 + $0x168] sm:$0xf] %vm2468_vm15, %v2388_v63 }
 0x507   :  { %2882 = vst.msk [vmem:[#allocation2 + $0x168] sm:$0xf] %vm2851_vm0, %v9338_v17  ;;  %v6123_v3 = vld [vmem:[#allocation2 + $0x1c0] sm:$0xf0]  ;;  %v9649_v52 = vrot.slane %v10661_v62, 1  ;;  %v10665_v17 = vrot.slane %v9599_v18, 5  ;;  %v9676_v19 = vpop.f32.mrf.mxu1 }
 0x508   :  { %2884 = vst.msk [vmem:[#allocation2 + $0x180] sm:$0xf] %vm2851_vm0, %v2775_v34  ;;  %v5814_v36 = vld [vmem:[#allocation2 + $0x1b8] sm:$0xf] }
 0x509   :  { %1027 = vrot.lane.b32.xlu0 %v10662_v32, %s6428_s24  ;;  %v9655_v63 = vpop.f32.mrf.mxu2  ;;  %v3214_v45 = vpop.permute.xlu1 %3213  ;;  %v5815_v38 = vor.u32 %v6123_v3, %v5814_v36  ;;  %v1859_v32 = vrot.slane %v1858_v44, 4  ;;  %v2299_v3 = vsel %vm7210_vm7, %v2297_v15, %v10665_v17  ;;  %v9671_v36 = vrot.slane %v1855_v47, 7  ;;  %v6113_v15 = vld [vmem:[#allocation2 + $0x170] sm:$0xf0] }
 0x50a   :  { %v2012_v40 = vpop.permute.xlu0 %2011  ;;  %3323 = vst.msk [vmem:[#allocation2 + $0x178] sm:$0xf] %vm2468_vm15, %v3214_v45  ;;  %v1865_v45 = vshrl.u32 %v9597_v29, 16  ;;  %v4711_v16 = vsel %vm4688_vm4, %v4708_v46, %v9649_v52  ;;  %v4837_v47 = vmax.f32 %v4603_v58, %v4709_v55  ;;  %v6112_v55 = vld [vmem:[#allocation2 + $0x16c] sm:$0xf] }
 0x50b   :  { %3379 = vst.msk [vmem:[#allocation2 + $0x178] sm:$0xf] %vm2851_vm0, %v2775_v34  ;;  %5954 = vmatmul.msk.bf16.gmra.mxu1 %vm4035_vm3, %v5815_v38  ;;  %v1863_v34 = vrot.slane %v10668_v59, 5  ;;  %v9682_v44 = vmax.f32 %v4604_v25, %v4711_v16 }
 0x50c   :  { %v9662_v62 = vpop.f32.mrf.mxu3  ;;  %2120 = vst.msk [vmem:[#allocation2 + $0x18c] sm:$0xf] %vm2086_vm14, %v2012_v40  ;;  %v1867_v43 = vrot.slane %v1865_v45, 4  ;;  %v4943_v59 = vrot.slane %v4837_v47, 7 }
 0x50d   :  { %2990 = vst.msk [vmem:[#allocation2 + $0x184] sm:$0xf] %vm2086_vm14, %v2012_v40  ;;  %2401 = vrot.lane.b32.xlu2 %v2299_v3, %s6429_s22  ;;  %v1864_v46 = vsel %vm7233_vm10, %v1859_v32, %v1863_v34  ;;  %v10670_v31 = vrot.slane %v9682_v44, 7  ;;  %v2670_v3 = vor.u32 %v9671_v36, %v1851_v48  ;;  %v3119_v48 = vrot.slane %v9599_v18, 7 }
 0x50e   :  { %v5770_v38 = vld [vmem:[#allocation2 + $0x168] sm:$0xf] }
 0x50f   :  { %v5771_v17 = vor.u32 %v6113_v15, %v5770_v38  ;;  %v4944_v38 = vsel %vm3006_vm2, %v4941_v2, %v4943_v59  ;;  %v2671_v2 = vsel %vm7260_vm13, %v2668_v7, %v2670_v3  ;;  %v9723_v7 = vrot.slane %v1865_v45, 7 }
 0x510   :  { %v5073_v42 = vmax.f32 %v9551_v56, %v4944_v38  ;;  %v6126_v56 = vld [vmem:[#allocation2 + $0x1d8] sm:$0xf0]  ;;  %v1873_v45 = vrot.slane %v1871_v14, 5 }
 0x511   :  { %2021 = vrot.lane.b32.xlu0 %v1864_v46, %s6430_s0  ;;  %v4152_v40 = vpop.f32.mrf.mxu2  ;;  %4191 = vmatmul.bf16.gmra.mxu2 %v5771_v17  ;;  %v6384_v16 = vpop.permute.xlu1 %6383  ;;  %v4946_v17 = vsel %vm3006_vm2, %v4943_v59, %v10670_v31 }
 0x512   :  { %v2394_v25 = vpop.permute.xlu0 %2393  ;;  %v6386_v37 = vunpack.i.h.bf16 %v6384_v16  ;;  %v6385_v58 = vunpack.i.l.bf16 %v6384_v16  ;;  %v5772_v32 = vld [vmem:[#allocation2 + $0x174] sm:$0xf0]  ;;  %v5074_v31 = vmax.f32 %v4837_v47, %v4946_v17  ;;  %v3218_v47 = vpop.permute.xlu2 %3217 }
 0x513   :  { %2502 = vst.msk [vmem:[#allocation2 + $0x18c] sm:$0xf] %vm2468_vm15, %v2394_v25  ;;  %v5775_v46 = vor.u32 %v6112_v55, %v5772_v32  ;;  %v1868_v55 = vor.u32 %v1867_v43, %v1863_v34  ;;  %v10807_v32 = vrot.slane %v9372_v49, 7  ;;  %v1875_v34 = vshrl.u32 %v9472_v1, 16 }
 0x514   :  { %v4280_v15 = vpop.f32.mrf.mxu3  ;;  %v9703_v16 = vmax.f32 %v878_v10, %v6386_v37  ;;  %v9707_v25 = vmax.f32 %v877_v30, %v6385_v58  ;;  %v5826_v10 = vld [vmem:[#allocation2 + $0x1d0] sm:$0xf]  ;;  %v9717_v30 = vpop.f32.mrf.mxu1  ;;  %v9726_v3 = vpack.c.bf16 %v5074_v31, %v5073_v42  ;;  %v2672_v31 = vrot.slane %v9671_v36, 4 }
 0x515   :  { %4319 = vmatmul.bf16.gmra.mxu3 %v5775_v46  ;;  %2784 = vrot.lane.b32.xlu2 %v2671_v2, %s6428_s24  ;;  %v3118_v59 = vrot.slane %v10807_v32, 4  ;;  %v1869_v58 = vrot.slane %v1868_v55, 4  ;;  %v5827_v46 = vor.u32 %v6126_v56, %v5826_v10  ;;  %v10808_v42 = vshll.u32 %v9597_v29, 16 }
 0x516   :  { %v6402_v11 = vpack.i.bf16 %v9703_v16, %v9707_v25  ;;  %v10809_v55 = vrot.slane %v9374_v8, 5  ;;  %v4281_v10 = vadd.f32 %v4280_v15, %v4152_v40  ;;  %v4278_v8 = vadd.f32 %v9662_v62, %v9655_v63 }
 0x517   :  { %v3120_v43 = vsel %vm7196_vm6, %v3118_v59, %v3119_v48  ;;  %v2674_v32 = vor.u32 %v9723_v7, %v10808_v42  ;;  %v4276_v40 = vadd.f32 %v9630_v61, %v9610_v5  ;;  %v3121_v42 = vrot.slane %v3119_v48, 4 }
 0x518   :  { %6403 = vrot.lane.b32.xlu1 %v6402_v11, %s6429_s22  ;;  %v2294_v59 = vrot.slane %v10809_v55, 4  ;;  %v1877_v11 = vrot.slane %v1875_v34, 4  ;;  %v3122_v48 = vrot.slane %v9597_v29, 7 }
 0x519   :  { %3223 = vrot.lane.b32.xlu0 %v3120_v43, %s6429_s22  ;;  %v4154_v37 = vpop.f32.mrf.mxu2  ;;  %v2014_v38 = vpop.permute.xlu1 %2013  ;;  %v1874_v43 = vsel %vm7233_vm10, %v1869_v58, %v1873_v45  ;;  %v2675_v15 = vsel %vm7260_vm13, %v2672_v31, %v2674_v32  ;;  %v9777_v32 = vld [vmem:[%s10597_s5] ss:$0 sm:$0xff] }
 0x51a   :  { %2121 = vst.msk [vmem:[#allocation2 + $0x198] sm:$0xf] %vm2086_vm14, %v2014_v38  ;;  %v2777_v17 = vpop.permute.xlu0 %2776  ;;  %v1878_v58 = vor.u32 %v1877_v11, %v1873_v45  ;;  %v6394_v63 = vpop.permute.xlu2 %6393  ;;  %v10811_v11 = vrot.slane %v9472_v1, 5 }
 0x51b   :  { %2991 = vst.msk [vmem:[#allocation2 + $0x190] sm:$0xf] %vm2086_vm14, %v2014_v38  ;;  %5955 = vmatmul.msk.bf16.gmra.mxu1 %vm4035_vm3, %v5827_v46  ;;  %v2301_v38 = vrot.slane %v9597_v29, 5  ;;  %v4409_v46 = vadd.f32 %v9562_v28, %v4281_v10  ;;  %v4404_v28 = vadd.f32 %v9434_v23, %v4276_v40  ;;  %v6395_v10 = vunpack.i.l.bf16 %v6394_v63 }
 0x51c   :  { %v4282_v2 = vpop.f32.mrf.mxu3  ;;  %3325 = vst.msk [vmem:[#allocation2 + $0x190] sm:$0xf] %vm2468_vm15, %v3218_v47  ;;  %v10810_v47 = vrot.slane %v9372_v49, 5  ;;  %v9765_v61 = vpop.f32.mrf.mxu1  ;;  %v4406_v49 = vadd.f32 %v9494_v22, %v4278_v8  ;;  %v1879_v31 = vrot.slane %v1878_v58, 4  ;;  %v9790_v8 = vld [vmem:[%s10598_s6] ss:$0 sm:$0xff]  ;;  %v3123_v58 = vsel %vm7196_vm6, %v3121_v42, %v3122_v48 }
 0x51d   :  { %v4283_v56 = vadd.f32 %v4282_v2, %v4154_v37  ;;  %2885 = vst.msk [vmem:[#allocation2 + $0x18c] sm:$0xf] %vm2851_vm0, %v2777_v17  ;;  %2023 = vrot.lane.b32.xlu2 %v1874_v43, %s6430_s0  ;;  %v4510_v22 = vmul.f32 %v9777_v32, %v4409_v46 }
 0x51e   :  { %v2296_v37 = vsel %vm7210_vm7, %v2294_v59, %v10810_v47  ;;  %v4509_v43 = vmul.f32 %v9777_v32, %v4406_v49  ;;  %v4508_v47 = vmul.f32 %v9777_v32, %v4404_v28 }
 0x51f   :  { %v4411_v36 = vadd.f32 %v9626_v54, %v4283_v56  ;;  %v2303_v54 = vrot.slane %v2301_v38, 4  ;;  %v4561_v46 = vadd.f32 %v9790_v8, %v4510_v22 }
 0x520   :  { %2399 = vrot.lane.b32.xlu1 %v2296_v37, %s6429_s22  ;;  %v1884_v37 = vsel %vm7233_vm10, %v1879_v31, %v9515_v12  ;;  %v4560_v28 = vadd.f32 %v9790_v8, %v4509_v43 }
 0x521   :  { %2786 = vrot.lane.b32.xlu0 %v2675_v15, %s6428_s24  ;;  %v4157_v62 = vpop.f32.mrf.mxu2  ;;  %v3216_v5 = vpop.permute.xlu1 %3215  ;;  %v4511_v2 = vmul.f32 %v9210_v53, %v4411_v36  ;;  %v5782_v53 = vld [vmem:[#allocation2 + $0x180] sm:$0xf]  ;;  %v2305_v23 = vsel %vm7210_vm7, %v2303_v54, %v10811_v11  ;;  %v9796_v15 = vrot.slane %v1875_v34, 7  ;;  %v2676_v34 = vrot.slane %v9723_v7, 4 }
 0x522   :  { %3324 = vst.msk [vmem:[#allocation2 + $0x184] sm:$0xf] %vm2468_vm15, %v3216_v5  ;;  %v10812_v54 = vmax.f32 %v9259_v21, 0.0  ;;  %v4559_v7 = vadd.f32 %v9790_v8, %v4508_v47 }
 0x523   :  { %3380 = vst.msk [vmem:[#allocation2 + $0x184] sm:$0xf] %vm2851_vm0, %v2777_v17  ;;  %v6396_v17 = vunpack.i.h.bf16 %v6394_v63  ;;  %v4562_v36 = vadd.f32 %v9790_v8, %v4511_v2  ;;  %v10813_v63 = vmax.f32 %v9256_v9, 0.0  ;;  %v2678_v21 = vor.u32 %v9796_v15, %v1871_v14 }
 0x524   :  { %v4285_v45 = vpop.f32.mrf.mxu3  ;;  %v6116_v59 = vld [vmem:[#allocation2 + $0x188] sm:$0xf0]  ;;  %v3124_v9 = vrot.slane %v3122_v48, 4  ;;  %v9827_v22 = vpop.f32.mrf.mxu1  ;;  %v10814_v48 = vrot.slane %v9472_v1, 7  ;;  %v4606_v47 = vmax.f32 %v4559_v7, 0.0 }
 0x525   :  { %v4286_v55 = vadd.f32 %v4285_v45, %v4157_v62  ;;  %v5783_v56 = vor.u32 %v6116_v59, %v5782_v53  ;;  %2405 = vrot.lane.b32.xlu2 %v2305_v23, %s6429_s22  ;;  %v9811_v5 = vmax.f32 %v10812_v54, %v6396_v17  ;;  %v9815_v49 = vmax.f32 %v10813_v63, %v6395_v10 }
 0x526   :  { %v4609_v45 = vmax.f32 %v4562_v36, 0.0  ;;  %v2679_v11 = vsel %vm7260_vm13, %v2676_v34, %v2678_v21  ;;  %v4607_v17 = vmax.f32 %v4560_v28, 0.0  ;;  %v3126_v43 = vsel %vm7196_vm6, %v3124_v9, %v10814_v48 }
 0x527   :  { %v4414_v40 = vadd.f32 %v9676_v19, %v4286_v55  ;;  %4196 = vmatmul.bf16.gmra.mxu2 %v5783_v56  ;;  %v4608_v55 = vmax.f32 %v4561_v46, 0.0  ;;  %v6407_v23 = vpack.i.bf16 %v9811_v5, %v9815_v49  ;;  %v10815_v36 = vshrl.u32 %v9470_v6, 16 }
 0x528   :  { %3225 = vrot.lane.b32.xlu1 %v3123_v58, %s6429_s22  ;;  %v4718_v10 = vrot.slane %v4609_v45, 1  ;;  %v10816_v21 = vshll.u32 %v9470_v6, 16 }
 0x529   :  { %v4512_v62 = vmul.f32 %v9777_v32, %v4414_v40  ;;  %2025 = vrot.lane.b32.xlu0 %v1884_v37, %s6430_s0  ;;  %v4159_v19 = vpop.f32.mrf.mxu2  ;;  %v9817_v2 = vpop.permute.xlu1 %2778  ;;  %v9841_v40 = vrot.slane %v10815_v36, 7  ;;  %v4716_v37 = vrot.slane %v4608_v55, 1 }
 0x52a   :  { %3381 = vst.msk [vmem:[#allocation2 + $0x190] sm:$0xf] %vm2851_vm0, %v9817_v2 }
 0x52b   :  { %v4563_v31 = vadd.f32 %v9790_v8, %v4512_v62  ;;  %v6115_v62 = vld [vmem:[#allocation2 + $0x184] sm:$0xf]  ;;  %v4719_v63 = vsel %vm4688_vm4, %v4716_v37, %v4718_v10  ;;  %v2682_v7 = vor.u32 %v9841_v40, %v10816_v21 }
 0x52c   :  { %v4287_v42 = vpop.f32.mrf.mxu3  ;;  %v4423_v36 = vpop.f32.mrf.mxu1 }
 0x52d   :  { %v4610_v53 = vmax.f32 %v4563_v31, 0.0  ;;  %v4288_v59 = vadd.f32 %v4287_v42, %v4159_v19  ;;  %2788 = vrot.lane.b32.xlu2 %v2679_v11, %s6428_s24  ;;  %v4714_v19 = vrot.slane %v4607_v17, 1  ;;  %v2680_v31 = vrot.slane %v9796_v15, 4 }
 0x52e   :  { %v10817_v42 = vrot.slane %v9599_v18, 5  ;;  %v4712_v11 = vrot.slane %v4606_v47, 1 }
 0x52f   :  { %v4720_v14 = vrot.slane %v4610_v53, 1  ;;  %v4416_v56 = vadd.f32 %v9717_v30, %v4288_v59  ;;  %v4717_v48 = vsel %vm4688_vm4, %v4714_v19, %v4716_v37 }
 0x530   :  { %6408 = vrot.lane.b32.xlu1 %v6407_v23, %s6429_s22  ;;  %v2300_v9 = vrot.slane %v10817_v42, 4  ;;  %v4715_v15 = vsel %vm4688_vm4, %v4712_v11, %v4714_v19  ;;  %v4713_v37 = vsel %vm4688_vm4, %v9649_v52, %v4712_v11 }
 0x531   :  { %v4513_v58 = vmul.f32 %v9777_v32, %v4416_v56  ;;  %3227 = vrot.lane.b32.xlu0 %v3126_v43, %s6429_s22  ;;  %v4162_v46 = vpop.f32.mrf.mxu2  ;;  %v4721_v30 = vsel %vm4688_vm4, %v4718_v10, %v4720_v14  ;;  %v5784_v1 = vld [vmem:[#allocation2 + $0x18c] sm:$0xf0]  ;;  %v4842_v43 = vmax.f32 %v4608_v55, %v4719_v63  ;;  %v4840_v19 = vmax.f32 %v4606_v47, %v4715_v15 }
 0x532   :  { %v5787_v54 = vor.u32 %v6115_v62, %v5784_v1  ;;  %v4843_v59 = vmax.f32 %v4609_v45, %v4721_v30  ;;  %v2683_v62 = vsel %vm7260_vm13, %v2680_v31, %v2682_v7  ;;  %v2302_v18 = vsel %vm7210_vm7, %v2300_v9, %v2301_v38 }
 0x533   :  { %v4564_v34 = vadd.f32 %v9790_v8, %v4513_v58  ;;  %v4953_v29 = vrot.slane %v4842_v43, 7 }
 0x534   :  { %v4290_v28 = vpop.f32.mrf.mxu3  ;;  %4324 = vmatmul.bf16.gmra.mxu3 %v5787_v54  ;;  %v4955_v45 = vrot.slane %v4843_v59, 7 }
 0x535   :  { %v4611_v23 = vmax.f32 %v4564_v34, 0.0  ;;  %v4291_v56 = vadd.f32 %v4290_v28, %v4162_v46  ;;  %v4841_v46 = vmax.f32 %v4607_v17, %v4717_v48  ;;  %v10818_v28 = vmax.f32 %v9622_v33, 0.0 }
 0x537   :  { %v4722_v10 = vrot.slane %v4611_v23, 1  ;;  %v4419_v58 = vadd.f32 %v9765_v61, %v4291_v56  ;;  %v4951_v63 = vrot.slane %v4841_v46, 7  ;;  %v4839_v31 = vmax.f32 %v10818_v28, %v4713_v37 }
 0x538   :  { %2403 = vrot.lane.b32.xlu1 %v2302_v18, %s6429_s22  ;;  %v10819_v37 = vrot.slane %v9682_v44, 7 }
 0x539   :  { %v4723_v30 = vsel %vm4688_vm4, %v4720_v14, %v4722_v10  ;;  %v4514_v55 = vmul.f32 %v9777_v32, %v4419_v58  ;;  %2790 = vrot.lane.b32.xlu0 %v2683_v62, %s6428_s24  ;;  %v4164_v61 = vpop.f32.mrf.mxu2  ;;  %v4956_v14 = vsel %vm3006_vm2, %v4953_v29, %v4955_v45  ;;  %v4954_v47 = vsel %vm3006_vm2, %v4951_v63, %v4953_v29  ;;  %v4425_v58 = vpop.f32.mrf.mxu1 }
 0x53a   :  { %v9870_v1 = vmax.f32 %v4610_v53, %v4723_v30  ;;  %v4949_v53 = vrot.slane %v4840_v19, 7  ;;  %v5079_v11 = vmax.f32 %v4842_v43, %v4956_v14  ;;  %v4947_v33 = vrot.slane %v4839_v31, 7 }
 0x53b   :  { %v4565_v38 = vadd.f32 %v9790_v8, %v4514_v55 }
 0x53c   :  { %v4292_v34 = vpop.f32.mrf.mxu3  ;;  %v2018_v17 = vpop.permute.xlu2 %2017  ;;  %v4957_v54 = vrot.slane %v9870_v1, 7  ;;  %v4952_v48 = vsel %vm3006_vm2, %v4949_v53, %v4951_v63  ;;  %v4950_v55 = vsel %vm3006_vm2, %v4947_v33, %v4949_v53  ;;  %v4948_v29 = vsel %vm3006_vm2, %v10819_v37, %v4947_v33 }
 0x53d   :  { %v4612_v21 = vmax.f32 %v4565_v38, 0.0  ;;  %v4293_v7 = vadd.f32 %v4292_v34, %v4164_v61  ;;  %2123 = vst.msk [vmem:[#allocation2 + $0x1b0] sm:$0xf] %vm2086_vm14, %v2018_v17  ;;  %v5076_v14 = vmax.f32 %v4839_v31, %v4950_v55 }
 0x53e   :  { %2993 = vst.msk [vmem:[#allocation2 + $0x1a8] sm:$0xf] %vm2086_vm14, %v2018_v17  ;;  %v4958_v52 = vsel %vm3006_vm2, %v4955_v45, %v4957_v54  ;;  %v5078_v45 = vmax.f32 %v4841_v46, %v4954_v47 }
 0x53f   :  { %v4724_v42 = vrot.slane %v4612_v21, 1  ;;  %v4421_v9 = vadd.f32 %v9827_v22, %v4293_v7  ;;  %v5080_v56 = vmax.f32 %v4843_v59, %v4958_v52  ;;  %v5077_v59 = vmax.f32 %v4840_v19, %v4952_v48 }
 0x540   :  { %3229 = vrot.lane.b32.xlu1 %v9535_v24, %s6429_s22 }
 0x541   :  { %v4515_v15 = vmul.f32 %v9777_v32, %v4421_v9  ;;  %v5120_v62 = vpack.c.bf16 %v5080_v56, %v5079_v11  ;;  %v4167_v18 = vpop.f32.mrf.mxu2  ;;  %v4725_v30 = vsel %vm4688_vm4, %v4722_v10, %v4724_v42  ;;  %v5119_v24 = vpack.c.bf16 %v5078_v45, %v5077_v59  ;;  %v4428_v9 = vpop.f32.mrf.mxu1 }
 0x542   :  { %v4845_v61 = vmax.f32 %v4611_v23, %v4725_v30  ;;  %v5075_v23 = vmax.f32 %v9682_v44, %v4948_v29 }
 0x543   :  { %v4566_v22 = vadd.f32 %v9790_v8, %v4515_v15  ;;  %5150 = vmatpush.bf16.msra.mxu2 %v5120_v62 }
 0x544   :  { %v4295_v43 = vpop.f32.mrf.mxu3  ;;  %v4959_v38 = vrot.slane %v4845_v61, 7  ;;  %v5118_v7 = vpack.c.bf16 %v5076_v14, %v5075_v23  ;;  %v3220_v48 = vpop.permute.xlu2 %3219 }
 0x545   :  { %v4613_v34 = vmax.f32 %v4566_v22, 0.0  ;;  %v4296_v17 = vadd.f32 %v4295_v43, %v4167_v18 }
 0x546   :  { %v4960_v46 = vsel %vm3006_vm2, %v4957_v54, %v4959_v38 }
 0x547   :  { %v4726_v10 = vrot.slane %v4613_v34, 1  ;;  %v4424_v63 = vadd.f32 %v4423_v36, %v4296_v17  ;;  %5151 = vmatpush.bf16.msra.mxu2 %v5119_v24  ;;  %v5081_v28 = vmax.f32 %v9870_v1, %v4960_v46 }
 0x549   :  { %v4516_v19 = vmul.f32 %v9777_v32, %v4424_v63  ;;  %v4169_v52 = vpop.f32.mrf.mxu2  ;;  %v4727_v53 = vsel %vm4688_vm4, %v4724_v42, %v4726_v10 }
 0x54a   :  { %v4846_v47 = vmax.f32 %v4612_v21, %v4727_v53 }
 0x54b   :  { %v4567_v11 = vadd.f32 %v9790_v8, %v4516_v19  ;;  %5152 = vmatpush.bf16.msra.mxu2 %v5118_v7 }
 0x54c   :  { %v4297_v31 = vpop.f32.mrf.mxu3  ;;  %v4961_v54 = vrot.slane %v4846_v47, 7  ;;  %v9911_v17 = vpop.permute.xlu2 %2782 }
 0x54d   :  { %v4614_v56 = vmax.f32 %v4567_v11, 0.0  ;;  %v4298_v36 = vadd.f32 %v4297_v31, %v4169_v52 }
 0x54e   :  { %v4962_v44 = vsel %vm3006_vm2, %v4959_v38, %v4961_v54 }
 0x54f   :  { %v4728_v33 = vrot.slane %v4614_v56, 1  ;;  %v4426_v1 = vadd.f32 %v4425_v58, %v4298_v36  ;;  %5153 = vmatpush.bf16.msra.mxu2 %v9726_v3  ;;  %v5082_v15 = vmax.f32 %v4845_v61, %v4962_v44  ;;  %v4430_v61 = vpop.f32.mrf.mxu1 }
 0x550   :  { %v2016_v62 = vpop.permute.xlu1 %2015 }
 0x551   :  { %v4517_v42 = vmul.f32 %v9777_v32, %v4426_v1  ;;  %2122 = vst.msk [vmem:[#allocation2 + $0x1a4] sm:$0xf] %vm2086_vm14, %v2016_v62  ;;  %v4172_v21 = vpop.f32.mrf.mxu2  ;;  %v4729_v18 = vsel %vm4688_vm4, %v4726_v10, %v4728_v33  ;;  %v9903_v45 = vpack.c.bf16 %v5082_v15, %v5081_v28 }
 0x552   :  { %2992 = vst.msk [vmem:[#allocation2 + $0x19c] sm:$0xf] %vm2086_vm14, %v2016_v62  ;;  %v4847_v30 = vmax.f32 %v4613_v34, %v4729_v18 }
 0x553   :  { %v4568_v55 = vadd.f32 %v9790_v8, %v4517_v42  ;;  %3326 = vst.msk [vmem:[#allocation2 + $0x19c] sm:$0xf] %vm2468_vm15, %v3220_v48  ;;  %5154 = vmatpush.bf16.msra.mxu2 %v9594_v35 }
 0x554   :  { %v4300_v3 = vpop.f32.mrf.mxu3  ;;  %v4963_v58 = vrot.slane %v4847_v30, 7 }
 0x555   :  { %v4615_v22 = vmax.f32 %v4568_v55, 0.0  ;;  %v4301_v59 = vadd.f32 %v4300_v3, %v4172_v21 }
 0x556   :  { %v4964_v43 = vsel %vm3006_vm2, %v4961_v54, %v4963_v58 }
 0x557   :  { %v4730_v37 = vrot.slane %v4615_v22, 1  ;;  %v4429_v29 = vadd.f32 %v4428_v9, %v4301_v59  ;;  %5155 = vmatpush.bf16.msra.mxu2 %v9444_v4  ;;  %v5083_v38 = vmax.f32 %v4846_v47, %v4964_v43  ;;  %v4433_v7 = vpop.f32.mrf.mxu1 }
 0x558   :  { %v2398_v34 = vpop.permute.xlu1 %2397 }
 0x559   :  { %v4518_v24 = vmul.f32 %v9777_v32, %v4429_v29  ;;  %2504 = vst.msk [vmem:[#allocation2 + $0x1a4] sm:$0xf] %vm2468_vm15, %v2398_v34  ;;  %v4174_v35 = vpop.f32.mrf.mxu2  ;;  %v4731_v14 = vsel %vm4688_vm4, %v4728_v33, %v4730_v37 }
 0x55a   :  { %v9916_v46 = vmax.f32 %v4614_v56, %v4731_v14 }
 0x55b   :  { %v9919_v10 = vadd.f32 %v9790_v8, %v4518_v24  ;;  %5156 = vmatpush.bf16.msra.mxu2 %v9344_v26 }
 0x55c   :  { %v4302_v63 = vpop.f32.mrf.mxu3  ;;  %v4965_v4 = vrot.slane %v9916_v46, 7 }
 0x55d   :  { %v4616_v23 = vmax.f32 %v9919_v10, 0.0  ;;  %v4303_v28 = vadd.f32 %v4302_v63, %v4174_v35  ;;  %v10820_v35 = vor.u32 %v9539_v20, %v9515_v12 }
 0x55e   :  { %v4966_v19 = vsel %vm3006_vm2, %v4963_v58, %v4965_v4 }
 0x55f   :  { %v4732_v52 = vrot.slane %v4616_v23, 1  ;;  %v4431_v53 = vadd.f32 %v4430_v61, %v4303_v28  ;;  %5157 = vmatpush.bf16.msra.mxu2 %v9323_v60  ;;  %v5084_v47 = vmax.f32 %v4847_v30, %v4966_v19  ;;  %v2020_v9 = vpop.permute.xlu2 %2019  ;;  %v4435_v43 = vpop.f32.mrf.mxu1  ;;  %v1889_v14 = vrot.slane %v10820_v35, 4 }
 0x560   :  { %v2781_v11 = vpop.permute.xlu1 %2780  ;;  %2124 = vst.msk [vmem:[#allocation2 + $0x1bc] sm:$0xf] %vm2086_vm14, %v2020_v9 }
 0x561   :  { %v4519_v26 = vmul.f32 %v9777_v32, %v4431_v53  ;;  %v4177_v31 = vpop.f32.mrf.mxu2  ;;  %v4733_v54 = vsel %vm4688_vm4, %v4730_v37, %v4732_v52  ;;  %v9931_v56 = vpack.c.bf16 %v5084_v47, %v5083_v38  ;;  %2994 = vst.msk [vmem:[#allocation2 + $0x1b4] sm:$0xf] %vm2086_vm14, %v2020_v9 }
 0x562   :  { %v9934_v36 = vmax.f32 %v4615_v22, %v4733_v54  ;;  %2887 = vst.msk [vmem:[#allocation2 + $0x1a4] sm:$0xf] %vm2851_vm0, %v2781_v11 }
 0x563   :  { %v9937_v48 = vadd.f32 %v9790_v8, %v4519_v26  ;;  %v6399_v60 = vpop.permute.xlu0 %6398  ;;  %3382 = vst.msk [vmem:[#allocation2 + $0x19c] sm:$0xf] %vm2851_vm0, %v2781_v11 }
 0x564   :  { %v4305_v44 = vpop.f32.mrf.mxu3  ;;  %v6401_v33 = vunpack.i.h.bf16 %v6399_v60  ;;  %v6400_v1 = vunpack.i.l.bf16 %v6399_v60  ;;  %v4967_v15 = vrot.slane %v9934_v36, 7 }
 0x565   :  { %v4617_v62 = vmax.f32 %v9937_v48, 0.0  ;;  %v4306_v42 = vadd.f32 %v4305_v44, %v4177_v31 }
 0x566   :  { %v1366_v21 = vmax.f32 %v9480_v0, %v6401_v33  ;;  %v1365_v18 = vmax.f32 %v9484_v27, %v6400_v1  ;;  %v9948_v30 = vsel %vm3006_vm2, %v4965_v4, %v4967_v15 }
 0x567   :  { %v4434_v55 = vadd.f32 %v4433_v7, %v4306_v42  ;;  %v5085_v3 = vmax.f32 %v9916_v46, %v9948_v30  ;;  %v2402_v22 = vpop.permute.xlu2 %2401  ;;  %v4734_v59 = vrot.slane %v4617_v62, 1 }
 0x568   :  { %v9952_v58 = vpack.c.bf16 %v1366_v21, %v1366_v21  ;;  %v9954_v61 = vpack.c.bf16 %v1365_v18, %v1365_v18  ;;  %2506 = vst.msk [vmem:[#allocation2 + $0x1bc] sm:$0xf] %vm2468_vm15, %v2402_v22 }
 0x569   :  { %v4520_v0 = vmul.f32 %v9777_v32, %v4434_v55  ;;  %v4179_v27 = vpop.f32.mrf.mxu2  ;;  %v4735_v53 = vsel %vm4688_vm4, %v4732_v52, %v4734_v59  ;;  %v4438_v55 = vpop.f32.mrf.mxu1 }
 0x56a   :  { %3436 = vst.msk [vmem:[#allocation2 + $0x1f4] sm:$0xf] %vm1419_vm1, %v9952_v58  ;;  %v1891_v37 = vshll.u32 %v9954_v61, 16  ;;  %v1895_v29 = vshrl.u32 %v9954_v61, 16  ;;  %v1901_v28 = vshll.u32 %v9952_v58, 16  ;;  %v9999_v31 = vmax.f32 %v4616_v23, %v4735_v53 }
 0x56b   :  { %v9965_v38 = vadd.f32 %v9790_v8, %v4520_v0  ;;  %3435 = vst.msk [vmem:[#allocation2 + $0x1e8] sm:$0xf] %vm1419_vm1, %v9954_v61  ;;  %v2396_v34 = vpop.permute.xlu0 %2395  ;;  %v2310_v42 = vrot.slane %v9954_v61, 5  ;;  %v3131_v0 = vrot.slane %v9954_v61, 7 }
 0x56c   :  { %1462 = vst.msk [vmem:[#allocation2 + $0x1f8] sm:$0xf] %vm1419_vm1, %v9954_v61  ;;  %v4307_v24 = vpop.f32.mrf.mxu3  ;;  %v1893_v63 = vrot.slane %v1891_v37, 5  ;;  %v1897_v4 = vrot.slane %v1895_v29, 4  ;;  %v9995_v26 = vrot.slane %v1901_v28, 5 }
 0x56d   :  { %v4618_v19 = vmax.f32 %v9965_v38, 0.0  ;;  %1463 = vst.msk [vmem:[#allocation2 + $0x204] sm:$0xf] %vm1419_vm1, %v9952_v58  ;;  %v4308_v7 = vadd.f32 %v4307_v24, %v4179_v27  ;;  %v1905_v27 = vshrl.u32 %v9952_v58, 16  ;;  %v2684_v38 = vrot.slane %v9841_v40, 4 }
 0x56e   :  { %2940 = vst.msk [vmem:[#allocation2 + $0x1f0] sm:$0xf] %vm1419_vm1, %v9954_v61  ;;  %v1894_v12 = vsel %vm7233_vm10, %v1889_v14, %v1893_v63  ;;  %v1898_v20 = vor.u32 %v1897_v4, %v1893_v63 }
 0x56f   :  { %2941 = vst.msk [vmem:[#allocation2 + $0x1fc] sm:$0xf] %vm1419_vm1, %v9952_v58  ;;  %v4436_v47 = vadd.f32 %v4435_v43, %v4308_v7  ;;  %2027 = vrot.lane.b32.xlu2 %v1894_v12, %s6430_s0  ;;  %v4736_v9 = vrot.slane %v4618_v19, 1  ;;  %v9991_v11 = vpop.permute.xlu2 %2784  ;;  %v2685_v7 = vrot.slane %v1895_v29, 7  ;;  %v10044_v29 = vrot.slane %v1905_v27, 7 }
 0x570   :  { %2503 = vst.msk [vmem:[#allocation2 + $0x198] sm:$0xf] %vm2468_vm15, %v2396_v34  ;;  %v1899_v52 = vrot.slane %v1898_v20, 4  ;;  %v4969_v34 = vrot.slane %v9999_v31, 7  ;;  %v1907_v61 = vrot.slane %v1905_v27, 4 }
 0x571   :  { %v4521_v54 = vmul.f32 %v9777_v32, %v4436_v47  ;;  %2886 = vst.msk [vmem:[#allocation2 + $0x198] sm:$0xf] %vm2851_vm0, %v9817_v2  ;;  %v4182_v60 = vpop.f32.mrf.mxu2  ;;  %v6129_v44 = vld [vmem:[#allocation2 + $0x1f0] sm:$0xf0]  ;;  %v10821_v2 = vrot.slane %v9470_v6, 5  ;;  %v4737_v43 = vsel %vm4688_vm4, %v4734_v59, %v4736_v9  ;;  %v10822_v59 = vrot.slane %v9470_v6, 7 }
 0x572   :  { %2889 = vst.msk [vmem:[#allocation2 + $0x1bc] sm:$0xf] %vm2851_vm0, %v9991_v11  ;;  %v1904_v33 = vsel %vm7233_vm10, %v1899_v52, %v9995_v26  ;;  %v5838_v1 = vld [vmem:[#allocation2 + $0x1e8] sm:$0xf]  ;;  %v4851_v14 = vmax.f32 %v4617_v62, %v4737_v43  ;;  %v4970_v53 = vsel %vm3006_vm2, %v4967_v15, %v4969_v34  ;;  %v6119_v52 = vld [vmem:[#allocation2 + $0x1a0] sm:$0xf0]  ;;  %v4440_v43 = vpop.f32.mrf.mxu1 }
 0x573   :  { %v10011_v10 = vadd.f32 %v9790_v8, %v4521_v54  ;;  %2029 = vrot.lane.b32.xlu0 %v1904_v33, %s6430_s0  ;;  %v3222_v23 = vpop.permute.xlu0 %3221  ;;  %v5839_v21 = vor.u32 %v6129_v44, %v5838_v1  ;;  %v2309_v18 = vrot.slane %v10821_v2, 4  ;;  %v3130_v4 = vrot.slane %v10822_v59, 4 }
 0x574   :  { %v4310_v22 = vpop.f32.mrf.mxu3  ;;  %3327 = vst.msk [vmem:[#allocation2 + $0x1a8] sm:$0xf] %vm2468_vm15, %v3222_v23  ;;  %v4971_v47 = vrot.slane %v4851_v14, 7  ;;  %v5086_v48 = vmax.f32 %v9934_v36, %v4970_v53  ;;  %v2686_v1 = vor.u32 %v2685_v7, %v1891_v37  ;;  %v10823_v37 = vmax.f32 %v9619_v41, 0.0 }
 0x575   :  { %v4619_v24 = vmax.f32 %v10011_v10, 0.0  ;;  %v4311_v35 = vadd.f32 %v4310_v22, %v4182_v60  ;;  %3383 = vst.msk [vmem:[#allocation2 + $0x1a8] sm:$0xf] %vm2851_vm0, %v9911_v17  ;;  %5956 = vmatmul.msk.bf16.gmra.mxu1 %vm4035_vm3, %v5839_v21  ;;  %v2311_v63 = vsel %vm7210_vm7, %v2309_v18, %v2310_v42  ;;  %v3132_v6 = vsel %vm7196_vm6, %v3130_v4, %v3131_v0 }
 0x576   :  { %v4972_v36 = vsel %vm3006_vm2, %v4969_v34, %v4971_v47  ;;  %v10061_v21 = vpack.c.bf16 %v5086_v48, %v5085_v3  ;;  %v2687_v34 = vsel %vm7260_vm13, %v2684_v38, %v2686_v1  ;;  %v2690_v41 = vor.u32 %v10044_v29, %v1901_v28 }
 0x577   :  { %v4738_v12 = vrot.slane %v4619_v24, 1  ;;  %v4439_v20 = vadd.f32 %v4438_v55, %v4311_v35  ;;  %2409 = vrot.lane.b32.xlu2 %v2311_v63, %s6429_s22  ;;  %v2024_v54 = vpop.permute.xlu2 %2023  ;;  %v5087_v23 = vmax.f32 %v9999_v31, %v4972_v36  ;;  %v2688_v35 = vrot.slane %v2685_v7, 4 }
 0x578   :  { %v5794_v62 = vld [vmem:[#allocation2 + $0x198] sm:$0xf]  ;;  %2126 = vst.msk [vmem:[#allocation2 + $0x1d4] sm:$0xf] %vm2086_vm14, %v2024_v54  ;;  %v1908_v38 = vor.u32 %v1907_v61, %v9995_v26 }
 0x579   :  { %v4522_v15 = vmul.f32 %v9777_v32, %v4439_v20  ;;  %v5795_v60 = vor.u32 %v6119_v52, %v5794_v62  ;;  %v4739_v44 = vsel %vm4688_vm4, %v4736_v9, %v4738_v12  ;;  %2996 = vst.msk [vmem:[#allocation2 + $0x1cc] sm:$0xf] %vm2086_vm14, %v2024_v54  ;;  %v4184_v33 = vpop.f32.mrf.mxu2  ;;  %v2691_v28 = vsel %vm7260_vm13, %v2688_v35, %v2690_v41 }
 0x57a   :  { %v10055_v10 = vmax.f32 %v4618_v19, %v4739_v44  ;;  %v6118_v19 = vld [vmem:[#allocation2 + $0x19c] sm:$0xf]  ;;  %v1909_v41 = vrot.slane %v1908_v38, 4 }
 0x57b   :  { %v4573_v9 = vadd.f32 %v9790_v8, %v4522_v15  ;;  %4201 = vmatmul.bf16.gmra.mxu2 %v5795_v60  ;;  %3231 = vrot.lane.b32.xlu0 %v3132_v6, %s6429_s22  ;;  %v1028_v2 = vpop.permute.xlu0 %1027  ;;  %v2313_v60 = vrot.slane %v9952_v58, 5 }
 0x57c   :  { %v4312_v18 = vpop.f32.mrf.mxu3  ;;  %v10067_v55 = vmax.f32 %v10823_v37, %v1028_v2  ;;  %v5796_v31 = vld [vmem:[#allocation2 + $0x1a4] sm:$0xf0]  ;;  %v4973_v22 = vrot.slane %v10055_v10, 7 }
 0x57d   :  { %v4620_v46 = vmax.f32 %v4573_v9, 0.0  ;;  %v4313_v30 = vadd.f32 %v4312_v18, %v4184_v33  ;;  %v5799_v3 = vor.u32 %v6118_v19, %v5796_v31 }
 0x57e   :  { %1272 = vrot.lane.b32.xlu1 %v10067_v55, %s6429_s22  ;;  %v4974_v40 = vsel %vm3006_vm2, %v4971_v47, %v4973_v22 }
 0x57f   :  { %v4740_v63 = vrot.slane %v4620_v46, 1  ;;  %v4441_v59 = vadd.f32 %v4440_v43, %v4313_v30  ;;  %2792 = vrot.lane.b32.xlu2 %v2687_v34, %s6428_s24  ;;  %4329 = vmatmul.bf16.gmra.mxu3 %v5799_v3  ;;  %v5088_v4 = vmax.f32 %v4851_v14, %v4974_v40  ;;  %v2406_v53 = vpop.permute.xlu2 %2405 }
 0x580   :  { %2508 = vst.msk [vmem:[#allocation2 + $0x1d4] sm:$0xf] %vm2468_vm15, %v2406_v53 }
 0x581   :  { %v4523_v20 = vmul.f32 %v9777_v32, %v4441_v59  ;;  %v4741_v48 = vsel %vm4688_vm4, %v4738_v12, %v4740_v63  ;;  %v10083_v7 = vpack.c.bf16 %v5088_v4, %v5087_v23  ;;  %v2312_v12 = vrot.slane %v2310_v42, 4  ;;  %v10138_v31 = vpop.f32.mrf.mxu2 }
 0x582   :  { %v4853_v62 = vmax.f32 %v4619_v24, %v4741_v48 }
 0x583   :  { %v10088_v47 = vadd.f32 %v9790_v8, %v4523_v20  ;;  %2794 = vrot.lane.b32.xlu0 %v2691_v28, %s6428_s24  ;;  %v2022_v52 = vpop.permute.xlu0 %2021  ;;  %v2314_v44 = vsel %vm7210_vm7, %v2312_v12, %v2313_v60 }
 0x584   :  { %2125 = vst.msk [vmem:[#allocation2 + $0x1c8] sm:$0xf] %vm2086_vm14, %v2022_v52  ;;  %v4975_v14 = vrot.slane %v4853_v62, 7 }
 0x585   :  { %v4621_v54 = vmax.f32 %v10088_v47, 0.0  ;;  %2995 = vst.msk [vmem:[#allocation2 + $0x1c0] sm:$0xf] %vm2086_vm14, %v2022_v52 }
 0x586   :  { %2407 = vrot.lane.b32.xlu1 %v9576_v50, %s6429_s22  ;;  %v4976_v24 = vsel %vm3006_vm2, %v4973_v22, %v4975_v14  ;;  %v3133_v50 = vrot.slane %v3131_v0, 4 }
 0x587   :  { %v10101_v8 = vrot.slane %v4621_v54, 1  ;;  %v5089_v6 = vmax.f32 %v10055_v10, %v4976_v24  ;;  %v10104_v15 = vpop.permute.xlu2 %2788  ;;  %v3134_v10 = vrot.slane %v9952_v58, 7 }
 0x588   :  { %2891 = vst.msk [vmem:[#allocation2 + $0x1d4] sm:$0xf] %vm2851_vm0, %v10104_v15 }
 0x589   :  { %v4743_v42 = vsel %vm4688_vm4, %v4740_v63, %v10101_v8  ;;  %v3135_v2 = vsel %vm7196_vm6, %v3133_v50, %v3134_v10 }
 0x58a   :  { %v10117_v36 = vmax.f32 %v4620_v46, %v4743_v42  ;;  %v6404_v1 = vpop.permute.xlu1 %6403 }
 0x58b   :  { %2411 = vrot.lane.b32.xlu0 %v2314_v44, %s6429_s22  ;;  %v3224_v33 = vpop.permute.xlu0 %3223  ;;  %v6406_v0 = vunpack.i.h.bf16 %v6404_v1  ;;  %v6405_v23 = vunpack.i.l.bf16 %v6404_v1 }
 0x58c   :  { %3328 = vst.msk [vmem:[#allocation2 + $0x1b4] sm:$0xf] %vm2468_vm15, %v3224_v33  ;;  %v4977_v9 = vrot.slane %v10117_v36, 7 }
 0x58d   :  { %3384 = vst.msk [vmem:[#allocation2 + $0x1b4] sm:$0xf] %vm2851_vm0, %v9991_v11  ;;  %v1368_v18 = vmax.f32 %v9703_v16, %v6406_v0  ;;  %v1367_v37 = vmax.f32 %v9707_v25, %v6405_v23  ;;  %v10140_v11 = vpop.f32.mrf.mxu3  ;;  %v10148_v25 = vpop.f32.mrf.mxu1 }
 0x58e   :  { %3233 = vrot.lane.b32.xlu1 %v3135_v2, %s6429_s22  ;;  %v4978_v27 = vsel %vm3006_vm2, %v4975_v14, %v4977_v9  ;;  %v10182_v14 = vpop.f32.mrf.mxu2  ;;  %v6122_v2 = vld [vmem:[#allocation2 + $0x1b8] sm:$0xf0] }
 0x58f   :  { %v5090_v19 = vmax.f32 %v4853_v62, %v4978_v27  ;;  %v10142_v22 = vpack.c.bf16 %v1368_v18, %v1368_v18  ;;  %v10144_v46 = vpack.c.bf16 %v1367_v37, %v1367_v37  ;;  %v3136_v18 = vrot.slane %v3134_v10, 4 }
 0x591   :  { %v10146_v16 = vpack.c.bf16 %v5090_v19, %v5089_v6  ;;  %3438 = vst.msk [vmem:[#allocation2 + $0x20c] sm:$0xf] %vm1419_vm1, %v10142_v22  ;;  %v3137_v30 = vrot.slane %v10144_v46, 7  ;;  %v1911_v26 = vshll.u32 %v10144_v46, 16  ;;  %v1915_v3 = vshrl.u32 %v10144_v46, 16 }
 0x592   :  { %3437 = vst.msk [vmem:[#allocation2 + $0x200] sm:$0xf] %vm1419_vm1, %v10144_v46  ;;  %v2400_v34 = vpop.permute.xlu1 %2399  ;;  %v3140_v35 = vrot.slane %v10142_v22, 7  ;;  %v1921_v4 = vshll.u32 %v10142_v22, 16  ;;  %v2316_v50 = vrot.slane %v10144_v46, 5  ;;  %v1925_v23 = vshrl.u32 %v10142_v22, 16 }
 0x593   :  { %v10157_v43 = vpop.permute.xlu0 %2786  ;;  %1464 = vst.msk [vmem:[#allocation2 + $0x210] sm:$0xf] %vm1419_vm1, %v10144_v46  ;;  %v3139_v40 = vrot.slane %v3137_v30, 4  ;;  %v1913_v63 = vrot.slane %v1911_v26, 5  ;;  %v1917_v59 = vrot.slane %v1915_v3, 4  ;;  %v2693_v0 = vrot.slane %v1915_v3, 7 }
 0x594   :  { %1465 = vst.msk [vmem:[#allocation2 + $0x21c] sm:$0xf] %vm1419_vm1, %v10142_v22  ;;  %v10178_v62 = vrot.slane %v1921_v4, 5  ;;  %v3138_v38 = vsel %vm7196_vm6, %v3136_v18, %v3137_v30  ;;  %v2318_v18 = vrot.slane %v2316_v50, 4 }
 0x595   :  { %2942 = vst.msk [vmem:[#allocation2 + $0x208] sm:$0xf] %vm1419_vm1, %v10144_v46  ;;  %v3141_v53 = vsel %vm7196_vm6, %v3139_v40, %v3140_v35  ;;  %v1914_v20 = vsel %vm7233_vm10, %v1909_v41, %v1913_v63  ;;  %v1918_v48 = vor.u32 %v1917_v59, %v1913_v63  ;;  %v10184_v12 = vpop.f32.mrf.mxu3  ;;  %v10191_v1 = vpop.f32.mrf.mxu1  ;;  %v2694_v19 = vor.u32 %v2693_v0, %v1911_v26 }
 0x596   :  { %2943 = vst.msk [vmem:[#allocation2 + $0x214] sm:$0xf] %vm1419_vm1, %v10142_v22  ;;  %3237 = vrot.lane.b32.xlu0 %v3141_v53, %s6429_s22  ;;  %2031 = vrot.lane.b32.xlu1 %v1914_v20, %s6430_s0  ;;  %v4192_v63 = vpop.f32.mrf.mxu2  ;;  %v2692_v59 = vrot.slane %v10044_v29, 4  ;;  %v1927_v53 = vrot.slane %v1925_v23, 4  ;;  %v2696_v30 = vrot.slane %v2693_v0, 4 }
 0x597   :  { %2505 = vst.msk [vmem:[#allocation2 + $0x1b0] sm:$0xf] %vm2468_vm15, %v2400_v34  ;;  %v1919_v28 = vrot.slane %v1918_v48, 4  ;;  %v10211_v34 = vrot.slane %v1925_v23, 7  ;;  %v6121_v48 = vld [vmem:[#allocation2 + $0x1b4] sm:$0xf] }
 0x598   :  { %2888 = vst.msk [vmem:[#allocation2 + $0x1b0] sm:$0xf] %vm2851_vm0, %v9911_v17  ;;  %v6132_v52 = vld [vmem:[#allocation2 + $0x208] sm:$0xf0]  ;;  %v2315_v17 = vrot.slane %v2313_v60, 4 }
 0x599   :  { %v1924_v24 = vsel %vm7233_vm10, %v1919_v28, %v10178_v62  ;;  %v5850_v6 = vld [vmem:[#allocation2 + $0x200] sm:$0xf] }
 0x59a   :  { %v3226_v44 = vpop.permute.xlu1 %3225  ;;  %2033 = vrot.lane.b32.xlu2 %v1924_v24, %s6430_s0  ;;  %v5851_v33 = vor.u32 %v6132_v52, %v5850_v6  ;;  %v2317_v61 = vsel %vm7210_vm7, %v2315_v17, %v2316_v50  ;;  %v2695_v52 = vsel %vm7260_vm13, %v2692_v59, %v2694_v19  ;;  %v2698_v24 = vor.u32 %v10211_v34, %v1921_v4 }
 0x59b   :  { %v2026_v42 = vpop.permute.xlu0 %2025  ;;  %3329 = vst.msk [vmem:[#allocation2 + $0x1c0] sm:$0xf] %vm2468_vm15, %v3226_v44  ;;  %v2319_v19 = vrot.slane %v10142_v22, 5 }
 0x59c   :  { %2127 = vst.msk [vmem:[#allocation2 + $0x1e0] sm:$0xf] %vm2086_vm14, %v2026_v42  ;;  %5957 = vmatmul.msk.bf16.gmra.mxu1 %vm4035_vm3, %v5851_v33 }
 0x59d   :  { %2997 = vst.msk [vmem:[#allocation2 + $0x1d8] sm:$0xf] %vm2086_vm14, %v2026_v42  ;;  %v4320_v27 = vpop.f32.mrf.mxu3  ;;  %v10214_v40 = vpop.f32.mrf.mxu1  ;;  %v2320_v46 = vsel %vm7210_vm7, %v2318_v18, %v2319_v19  ;;  %v10316_v18 = vld [vmem:[%s10598_s6] ss:$0 sm:$0xff] }
 0x59e   :  { %3385 = vst.msk [vmem:[#allocation2 + $0x1c0] sm:$0xf] %vm2851_vm0, %v10157_v43  ;;  %2413 = vrot.lane.b32.xlu1 %v2317_v61, %s6429_s22 }
 0x59f   :  { %v5806_v60 = vld [vmem:[#allocation2 + $0x1b0] sm:$0xf] }
 0x5a0   :  { %v5807_v37 = vor.u32 %v6122_v2, %v5806_v60  ;;  %v4194_v60 = vpop.f32.mrf.mxu2 }
 0x5a2   :  { %4206 = vmatmul.bf16.gmra.mxu2 %v5807_v37  ;;  %v6409_v41 = vpop.permute.xlu1 %6408  ;;  %3235 = vrot.lane.b32.xlu2 %v3138_v38, %s6429_s22 }
 0x5a3   :  { %v3228_v3 = vpop.permute.xlu0 %3227  ;;  %v6411_v58 = vunpack.i.h.bf16 %v6409_v41  ;;  %v6410_v10 = vunpack.i.l.bf16 %v6409_v41 }
 0x5a4   :  { %3330 = vst.msk [vmem:[#allocation2 + $0x1cc] sm:$0xf] %vm2468_vm15, %v3228_v3 }
 0x5a5   :  { %3386 = vst.msk [vmem:[#allocation2 + $0x1cc] sm:$0xf] %vm2851_vm0, %v10104_v15  ;;  %v1370_v26 = vmax.f32 %v9811_v5, %v6411_v58  ;;  %v1369_v20 = vmax.f32 %v9815_v49, %v6410_v10  ;;  %v5808_v28 = vld [vmem:[#allocation2 + $0x1bc] sm:$0xf0]  ;;  %v1928_v15 = vor.u32 %v1927_v53, %v10178_v62  ;;  %v2699_v5 = vsel %vm7260_vm13, %v2696_v30, %v2698_v24  ;;  %v4322_v44 = vpop.f32.mrf.mxu3  ;;  %v4450_v23 = vpop.f32.mrf.mxu1 }
 0x5a6   :  { %v5811_v6 = vor.u32 %v6121_v48, %v5808_v28  ;;  %2796 = vrot.lane.b32.xlu1 %v2695_v52, %s6428_s24  ;;  %v4323_v38 = vadd.f32 %v4322_v44, %v4194_v60  ;;  %v4321_v58 = vadd.f32 %v4320_v27, %v4192_v63  ;;  %v4318_v30 = vadd.f32 %v10184_v12, %v10182_v14 }
 0x5a7   :  { %v10226_v29 = vpack.c.bf16 %v1370_v26, %v1370_v26  ;;  %v10228_v42 = vpack.c.bf16 %v1369_v20, %v1369_v20  ;;  %v1929_v33 = vrot.slane %v1928_v15, 4  ;;  %v2321_v20 = vrot.slane %v2319_v19, 4 }
 0x5a8   :  { %4334 = vmatmul.bf16.gmra.mxu3 %v5811_v6  ;;  %v4451_v26 = vadd.f32 %v4450_v23, %v4323_v38  ;;  %v4316_v48 = vadd.f32 %v10140_v11, %v10138_v31  ;;  %v4449_v28 = vadd.f32 %v10214_v40, %v4321_v58  ;;  %v4446_v11 = vadd.f32 %v10191_v1, %v4318_v30  ;;  %v10297_v1 = vld [vmem:[%s10597_s5] ss:$0 sm:$0xff] }
 0x5a9   :  { %3440 = vst.msk [vmem:[#allocation2 + $0x224] sm:$0xf] %vm1419_vm1, %v10226_v29  ;;  %v1931_v49 = vshll.u32 %v10228_v42, 16  ;;  %v1935_v4 = vshrl.u32 %v10228_v42, 16  ;;  %v1941_v0 = vshll.u32 %v10226_v29, 16  ;;  %v2322_v53 = vrot.slane %v10228_v42, 5 }
 0x5aa   :  { %3439 = vst.msk [vmem:[#allocation2 + $0x218] sm:$0xf] %vm1419_vm1, %v10228_v42  ;;  %2798 = vrot.lane.b32.xlu2 %v2699_v5, %s6428_s24  ;;  %v2404_v62 = vpop.permute.xlu1 %2403  ;;  %v4197_v14 = vpop.f32.mrf.mxu2  ;;  %v2705_v31 = vshrl.u32 %v10226_v29, 16  ;;  %v4527_v40 = vmul.f32 %v9777_v32, %v4451_v26  ;;  %v6125_v5 = vld [vmem:[#allocation2 + $0x1d0] sm:$0xf0]  ;;  %v4526_v32 = vmul.f32 %v10297_v1, %v4449_v28 }
 0x5ab   :  { %1466 = vst.msk [vmem:[#allocation2 + $0x228] sm:$0xf] %vm1419_vm1, %v10228_v42  ;;  %v1933_v17 = vrot.slane %v1931_v49, 5  ;;  %v1937_v61 = vrot.slane %v1935_v4, 4  ;;  %v10260_v41 = vrot.slane %v1941_v0, 5  ;;  %v10276_v52 = vpop.permute.xlu0 %2790  ;;  %v2323_v12 = vsel %vm7210_vm7, %v2321_v20, %v2322_v53 }
 0x5ac   :  { %2944 = vst.msk [vmem:[#allocation2 + $0x220] sm:$0xf] %vm1419_vm1, %v10228_v42  ;;  %v2701_v6 = vrot.slane %v1935_v4, 7  ;;  %v4444_v4 = vadd.f32 %v10148_v25, %v4316_v48 }
 0x5ad   :  { %2945 = vst.msk [vmem:[#allocation2 + $0x22c] sm:$0xf] %vm1419_vm1, %v10226_v29  ;;  %v1934_v2 = vsel %vm7233_vm10, %v1929_v33, %v1933_v17  ;;  %v1938_v37 = vor.u32 %v1937_v61, %v1933_v17  ;;  %v4453_v44 = vpop.f32.mrf.mxu1  ;;  %v3146_v17 = vrot.slane %v10226_v29, 7  ;;  %v3142_v61 = vrot.slane %v3140_v35, 4 }
 0x5ae   :  { %2507 = vst.msk [vmem:[#allocation2 + $0x1c8] sm:$0xf] %vm2468_vm15, %v2404_v62  ;;  %2035 = vrot.lane.b32.xlu0 %v1934_v2, %s6430_s0  ;;  %v2702_v25 = vor.u32 %v2701_v6, %v1931_v49  ;;  %v10310_v35 = vrot.slane %v2705_v31, 7  ;;  %v4525_v2 = vmul.f32 %v10297_v1, %v4446_v11  ;;  %v2700_v49 = vrot.slane %v10211_v34, 4 }
 0x5af   :  { %2890 = vst.msk [vmem:[#allocation2 + $0x1c8] sm:$0xf] %vm2851_vm0, %v10157_v43  ;;  %v1939_v3 = vrot.slane %v1938_v37, 4  ;;  %v3143_v43 = vrot.slane %v10228_v42, 7  ;;  %v4578_v37 = vadd.f32 %v10316_v18, %v4527_v40  ;;  %v4524_v19 = vmul.f32 %v10297_v1, %v4444_v4 }
 0x5b0   :  { %v6135_v10 = vld [vmem:[#allocation2 + $0x220] sm:$0xf0]  ;;  %v2708_v30 = vor.u32 %v10310_v35, %v1941_v0  ;;  %v4576_v26 = vadd.f32 %v10316_v18, %v4525_v2  ;;  %v2324_v0 = vrot.slane %v2322_v53, 4 }
 0x5b1   :  { %v1944_v50 = vsel %vm7233_vm10, %v1939_v3, %v10260_v41  ;;  %v5862_v59 = vld [vmem:[#allocation2 + $0x218] sm:$0xf]  ;;  %v3145_v24 = vrot.slane %v3143_v43, 4  ;;  %v3144_v22 = vsel %vm7196_vm6, %v3142_v61, %v3143_v43  ;;  %v4577_v3 = vadd.f32 %v10316_v18, %v4526_v32 }
 0x5b2   :  { %2415 = vrot.lane.b32.xlu2 %v2320_v46, %s6429_s22  ;;  %2037 = vrot.lane.b32.xlu1 %v1944_v50, %s6430_s0  ;;  %v5863_v27 = vor.u32 %v6135_v10, %v5862_v59  ;;  %v3230_v63 = vpop.permute.xlu1 %3229  ;;  %v6124_v10 = vld [vmem:[#allocation2 + $0x1cc] sm:$0xf]  ;;  %v2703_v59 = vsel %vm7260_vm13, %v2700_v49, %v2702_v25  ;;  %v2704_v43 = vrot.slane %v2701_v6, 4  ;;  %v4625_v34 = vmax.f32 %v4578_v37, 0.0 }
 0x5b3   :  { %3331 = vst.msk [vmem:[#allocation2 + $0x1d8] sm:$0xf] %vm2468_vm15, %v3230_v63  ;;  %v3147_v60 = vsel %vm7196_vm6, %v3145_v24, %v3146_v17  ;;  %v4199_v63 = vpop.f32.mrf.mxu2  ;;  %v4575_v48 = vadd.f32 %v10316_v18, %v4524_v19  ;;  %v4624_v28 = vmax.f32 %v4577_v3, 0.0  ;;  %v4623_v11 = vmax.f32 %v4576_v26, 0.0 }
 0x5b4   :  { %5958 = vmatmul.msk.bf16.gmra.mxu1 %vm4035_vm3, %v5863_v27  ;;  %3387 = vst.msk [vmem:[#allocation2 + $0x1d8] sm:$0xf] %vm2851_vm0, %v10276_v52  ;;  %v2709_v6 = vsel %vm7260_vm13, %v2704_v43, %v2708_v30  ;;  %v4750_v40 = vrot.slane %v4625_v34, 1 }
 0x5b5   :  { %v4455_v24 = vpop.f32.mrf.mxu1 }
 0x5b6   :  { %2417 = vrot.lane.b32.xlu0 %v2323_v12, %s6429_s22  ;;  %v5818_v15 = vld [vmem:[#allocation2 + $0x1c8] sm:$0xf] }
 0x5b7   :  { %v5819_v62 = vor.u32 %v6125_v5, %v5818_v15  ;;  %v4325_v33 = vpop.f32.mrf.mxu3 }
 0x5b8   :  { %v4326_v23 = vadd.f32 %v4325_v33, %v4197_v14  ;;  %v4748_v33 = vrot.slane %v4624_v28, 1 }
 0x5b9   :  { %4211 = vmatmul.bf16.gmra.mxu2 %v5819_v62  ;;  %v4622_v62 = vmax.f32 %v4575_v48, 0.0 }
 0x5ba   :  { %v4454_v38 = vadd.f32 %v4453_v44, %v4326_v23  ;;  %3241 = vrot.lane.b32.xlu2 %v3147_v60, %s6429_s22  ;;  %3239 = vrot.lane.b32.xlu1 %v3144_v22, %s6429_s22  ;;  %v2325_v44 = vrot.slane %v10226_v29, 5  ;;  %v4746_v23 = vrot.slane %v4623_v11, 1  ;;  %v4751_v53 = vsel %vm4688_vm4, %v4748_v33, %v4750_v40 }
 0x5bb   :  { %v5820_v46 = vld [vmem:[#allocation2 + $0x1d4] sm:$0xf0]  ;;  %v4744_v22 = vrot.slane %v4622_v62, 1 }
 0x5bc   :  { %v4528_v58 = vmul.f32 %v10297_v1, %v4454_v38  ;;  %v5823_v50 = vor.u32 %v6124_v10, %v5820_v46  ;;  %v2326_v32 = vsel %vm7210_vm7, %v2324_v0, %v2325_v44  ;;  %v4749_v37 = vsel %vm4688_vm4, %v4746_v23, %v4748_v33 }
 0x5bd   :  { %v4858_v38 = vmax.f32 %v4624_v28, %v4751_v53  ;;  %v4747_v49 = vsel %vm4688_vm4, %v4744_v22, %v4746_v23  ;;  %v4857_v3 = vmax.f32 %v4623_v11, %v4749_v37  ;;  %v4745_v10 = vsel %vm4688_vm4, %v10101_v8, %v4744_v22 }
 0x5be   :  { %v4579_v27 = vadd.f32 %v10316_v18, %v4528_v58  ;;  %2800 = vrot.lane.b32.xlu0 %v2703_v59, %s6428_s24  ;;  %4339 = vmatmul.bf16.gmra.mxu3 %v5823_v50  ;;  %v4856_v59 = vmax.f32 %v4622_v62, %v4747_v49  ;;  %v3339_v49 = vrot.slane %v10310_v35, 4 }
 0x5bf   :  { %v4327_v20 = vpop.f32.mrf.mxu3  ;;  %v4985_v50 = vrot.slane %v4858_v38, 7  ;;  %v4983_v26 = vrot.slane %v4857_v3, 7 }
 0x5c0   :  { %v4626_v14 = vmax.f32 %v4579_v27, 0.0  ;;  %v4328_v12 = vadd.f32 %v4327_v20, %v4199_v63  ;;  %v4981_v8 = vrot.slane %v4856_v59, 7 }
 0x5c1   :  { %v4986_v20 = vsel %vm3006_vm2, %v4983_v26, %v4985_v50 }
 0x5c2   :  { %v4752_v15 = vrot.slane %v4626_v14, 1  ;;  %v4456_v5 = vadd.f32 %v4455_v24, %v4328_v12  ;;  %2802 = vrot.lane.b32.xlu1 %v2709_v6, %s6428_s24  ;;  %v5094_v6 = vmax.f32 %v4857_v3, %v4986_v20 }
 0x5c4   :  { %v4529_v61 = vmul.f32 %v10297_v1, %v4456_v5  ;;  %v4753_v4 = vsel %vm4688_vm4, %v4750_v40, %v4752_v15 }
 0x5c5   :  { %v4859_v60 = vmax.f32 %v4625_v34, %v4753_v4  ;;  %v4855_v34 = vmax.f32 %v4621_v54, %v4745_v10  ;;  %v4458_v10 = vpop.f32.mrf.mxu1 }
 0x5c6   :  { %v10345_v42 = vadd.f32 %v10316_v18, %v4529_v61  ;;  %2419 = vrot.lane.b32.xlu0 %v2326_v32, %s6429_s22 }
 0x5c7   :  { %v4987_v19 = vrot.slane %v4859_v60, 7  ;;  %v4979_v12 = vrot.slane %v4855_v34, 7 }
 0x5c8   :  { %v4627_v25 = vmax.f32 %v10345_v42, 0.0 }
 0x5c9   :  { %v2028_v2 = vpop.permute.xlu2 %2027  ;;  %v4988_v43 = vsel %vm3006_vm2, %v4985_v50, %v4987_v19  ;;  %v4982_v47 = vsel %vm3006_vm2, %v4979_v12, %v4981_v8  ;;  %v4980_v0 = vsel %vm3006_vm2, %v4977_v9, %v4979_v12 }
 0x5ca   :  { %2128 = vst.msk [vmem:[#allocation2 + $0x1ec] sm:$0xf] %vm2086_vm14, %v2028_v2  ;;  %v10354_v57 = vrot.slane %v4627_v25, 1  ;;  %v5095_v48 = vmax.f32 %v4858_v38, %v4988_v43  ;;  %v5091_v5 = vmax.f32 %v10117_v36, %v4980_v0  ;;  %v2947_v36 = vrot.slane %v2705_v31, 4 }
 0x5cb   :  { %2998 = vst.msk [vmem:[#allocation2 + $0x1e4] sm:$0xf] %vm2086_vm14, %v2028_v2 }
 0x5cc   :  { %v4755_v58 = vsel %vm4688_vm4, %v4752_v15, %v10354_v57  ;;  %v5092_v15 = vmax.f32 %v4855_v34, %v4982_v47 }
 0x5cd   :  { %v10362_v46 = vmax.f32 %v4626_v14, %v4755_v58  ;;  %v4984_v14 = vsel %vm3006_vm2, %v4981_v8, %v4983_v26 }
 0x5ce   :  { %v5093_v54 = vmax.f32 %v4856_v59, %v4984_v14  ;;  %v5126_v44 = vpack.c.bf16 %v5092_v15, %v5091_v5 }
 0x5cf   :  { %v4989_v30 = vrot.slane %v10362_v46, 7 }
 0x5d0   :  { %v5127_v40 = vpack.c.bf16 %v5094_v6, %v5093_v54  ;;  %v4460_v6 = vpop.f32.mrf.mxu1 }
 0x5d1   :  { %v2410_v27 = vpop.permute.xlu2 %2409  ;;  %v4990_v63 = vsel %vm3006_vm2, %v4987_v19, %v4989_v30 }
 0x5d2   :  { %2510 = vst.msk [vmem:[#allocation2 + $0x1ec] sm:$0xf] %vm2468_vm15, %v2410_v27  ;;  %v5096_v28 = vmax.f32 %v4859_v60, %v4990_v63 }
 0x5d4   :  { %v5128_v24 = vpack.c.bf16 %v5096_v28, %v5095_v48 }
 0x5d6   :  { %5163 = vmatpush.bf16.msra.mxu3 %v5128_v24 }
 0x5d9   :  { %v2793_v11 = vpop.permute.xlu2 %2792 }
 0x5da   :  { %2893 = vst.msk [vmem:[#allocation2 + $0x1ec] sm:$0xf] %vm2851_vm0, %v2793_v11  ;;  %5164 = vmatpush.bf16.msra.mxu3 %v5127_v40 }
 0x5de   :  { %5165 = vmatpush.bf16.msra.mxu3 %v5126_v44 }
 0x5e1   :  { %v6128_v58 = vld [vmem:[#allocation2 + $0x1e8] sm:$0xf0] }
 0x5e2   :  { %5166 = vmatpush.bf16.msra.mxu3 %v10146_v16 }
 0x5e5   :  { %v2030_v62 = vpop.permute.xlu0 %2029 }
 0x5e6   :  { %2129 = vst.msk [vmem:[#allocation2 + $0x1f8] sm:$0xf] %vm2086_vm14, %v2030_v62  ;;  %5167 = vmatpush.bf16.msra.mxu3 %v10083_v7  ;;  %v2948_v7 = vor.u32 %v2947_v36, %v10260_v41 }
 0x5e7   :  { %2999 = vst.msk [vmem:[#allocation2 + $0x1f0] sm:$0xf] %vm2086_vm14, %v2030_v62 }
 0x5ea   :  { %5168 = vmatpush.bf16.msra.mxu3 %v10061_v21 }
 0x5ed   :  { %v3232_v9 = vpop.permute.xlu0 %3231 }
 0x5ee   :  { %3332 = vst.msk [vmem:[#allocation2 + $0x1e4] sm:$0xf] %vm2468_vm15, %v3232_v9  ;;  %5169 = vmatpush.bf16.msra.mxu3 %v9931_v56  ;;  %v3148_v56 = vrot.slane %v3146_v17, 4 }
 0x5ef   :  { %3388 = vst.msk [vmem:[#allocation2 + $0x1e4] sm:$0xf] %vm2851_vm0, %v2793_v11 }
 0x5f0   :  { %v1273_v16 = vpop.permute.xlu1 %1272 }
 0x5f1   :  { %v1371_v33 = vmax.f32 %v10067_v55, %v1273_v16 }
 0x5f2   :  { %5170 = vmatpush.bf16.msra.mxu3 %v9903_v45  ;;  %v2949_v45 = vrot.slane %v2948_v7, 4 }
 0x5f3   :  { %v2946_v61 = vpack.c.bf16 %v1371_v33, %v1371_v33 }
 0x5f4   :  { %v2034_v23 = vpop.permute.xlu2 %2033 }
 0x5f5   :  { %v2951_v4 = vshll.u32 %v2946_v61, 16  ;;  %v3340_v21 = vshrl.u32 %v2946_v61, 16  ;;  %3441 = vst.msk [vmem:[#allocation2 + $0x230] sm:$0xf] %vm1419_vm1, %v2946_v61  ;;  %v2795_v32 = vpop.permute.xlu0 %2794  ;;  %v3149_v53 = vrot.slane %v2946_v61, 7  ;;  %vm5146_vm1 = vcmask 916480  }
 0x5f6   :  { %2131 = vst.msk [vmem:[#allocation2 + $0x210] sm:$0xf] %vm2086_vm14, %v2034_v23  ;;  %v6127_v8 = vld [vmem:[#allocation2 + $0x1e4] sm:$0xf] }
 0x5f7   :  { %3001 = vst.msk [vmem:[#allocation2 + $0x208] sm:$0xf] %vm2086_vm14, %v2034_v23  ;;  %v3150_v55 = vsel %vm7196_vm6, %v3148_v56, %v3149_v53  ;;  %v2953_v31 = vrot.slane %v2951_v4, 5  ;;  %v3342_v60 = vrot.slane %v3340_v21, 7  ;;  %v4463_v53 = vpop.f32.mrf.mxu1 }
 0x5f8   :  { %v2408_v41 = vpop.permute.xlu1 %2407  ;;  %3243 = vrot.lane.b32.xlu1 %v3150_v55, %s6429_s22 }
 0x5f9   :  { %2509 = vst.msk [vmem:[#allocation2 + $0x1e0] sm:$0xf] %vm2468_vm15, %v2408_v41  ;;  %v2954_v29 = vsel %vm7233_vm10, %v2949_v45, %v2953_v31  ;;  %v3343_v37 = vor.u32 %v3342_v60, %v2951_v4 }
 0x5fa   :  { %2892 = vst.msk [vmem:[#allocation2 + $0x1e0] sm:$0xf] %vm2851_vm0, %v10276_v52  ;;  %2955 = vrot.lane.b32.xlu2 %v2954_v29, %s6430_s0 }
 0x5fb   :  { %v3344_v52 = vsel %vm7260_vm13, %v3339_v49, %v3343_v37 }
 0x5fc   :  { %v3535_v17 = vld [vmem:[#allocation2 + $0x230] sm:$0xf]  ;;  %v3236_v13 = vpop.permute.xlu2 %3235 }
 0x5fd   :  { %v2412_v22 = vpop.permute.xlu0 %2411  ;;  %v3806_v2 = vunpack.c.l.b16 %v3535_v17 }
 0x5fe   :  { %2511 = vst.msk [vmem:[#allocation2 + $0x1f8] sm:$0xf] %vm2468_vm15, %v2412_v22  ;;  %v4202_v19 = vpop.f32.mrf.mxu2 }
 0x5ff   :  { %2894 = vst.msk [vmem:[#allocation2 + $0x1f8] sm:$0xf] %vm2851_vm0, %v2795_v32  ;;  %v3878_v38 = vpack.c.b16 %v3806_v2, %v3806_v2  ;;  %v4465_v17 = vpop.f32.mrf.mxu1 }
 0x600   :  { %v3234_v39 = vpop.permute.xlu1 %3233 }
 0x601   :  { %3333 = vst.msk [vmem:[#allocation2 + $0x1f0] sm:$0xf] %vm2468_vm15, %v3234_v39  ;;  %5959 = vmatmul.msk.bf16.gmra.mxu1 %vm4035_vm3, %v3878_v38  ;;  %v5830_v3 = vld [vmem:[#allocation2 + $0x1e0] sm:$0xf] }
 0x602   :  { %3389 = vst.msk [vmem:[#allocation2 + $0x1f0] sm:$0xf] %vm2851_vm0, %v2795_v32  ;;  %v4330_v50 = vpop.f32.mrf.mxu3  ;;  %3345 = vrot.lane.b32.xlu2 %v3344_v52, %s6428_s24  ;;  %v5831_v59 = vor.u32 %v6128_v58, %v5830_v3 }
 0x603   :  { %v4331_v43 = vadd.f32 %v4330_v50, %v4202_v19 }
 0x604   :  { %4216 = vmatmul.bf16.gmra.mxu2 %v5831_v59  ;;  %v2799_v26 = vpop.permute.xlu2 %2798 }
 0x605   :  { %v4459_v35 = vadd.f32 %v4458_v10, %v4331_v43 }
 0x606   :  { %v4204_v48 = vpop.f32.mrf.mxu2  ;;  %v5842_v23 = vld [vmem:[#allocation2 + $0x1f8] sm:$0xf] }
 0x607   :  { %v4530_v34 = vmul.f32 %v10297_v1, %v4459_v35  ;;  %v4468_v50 = vpop.f32.mrf.mxu1 }
 0x608   :  { %v3238_v63 = vpop.permute.xlu0 %3237  ;;  %v2032_v51 = vpop.permute.xlu1 %2031 }
 0x609   :  { %v4581_v27 = vadd.f32 %v10316_v18, %v4530_v34  ;;  %v5832_v20 = vld [vmem:[#allocation2 + $0x1ec] sm:$0xf0]  ;;  %3335 = vst.msk [vmem:[#allocation2 + $0x208] sm:$0xf] %vm2468_vm15, %v3238_v63 }
 0x60a   :  { %v4332_v28 = vpop.f32.mrf.mxu3  ;;  %v5835_v14 = vor.u32 %v6127_v8, %v5832_v20  ;;  %3391 = vst.msk [vmem:[#allocation2 + $0x208] sm:$0xf] %vm2851_vm0, %v2799_v26 }
 0x60b   :  { %v4628_v12 = vmax.f32 %v4581_v27, 0.0  ;;  %v4333_v24 = vadd.f32 %v4332_v28, %v4204_v48  ;;  %2130 = vst.msk [vmem:[#allocation2 + $0x204] sm:$0xf] %vm2086_vm14, %v2032_v51 }
 0x60c   :  { %4344 = vmatmul.bf16.gmra.mxu3 %v5835_v14  ;;  %3000 = vst.msk [vmem:[#allocation2 + $0x1fc] sm:$0xf] %vm2086_vm14, %v2032_v51  ;;  %v2416_v0 = vpop.permute.xlu2 %2415 }
 0x60d   :  { %v4756_v47 = vrot.slane %v4628_v12, 1  ;;  %v4461_v54 = vadd.f32 %v4460_v6, %v4333_v24  ;;  %3334 = vst.msk [vmem:[#allocation2 + $0x1fc] sm:$0xf] %vm2468_vm15, %v3236_v13 }
 0x60e   :  { %2513 = vst.msk [vmem:[#allocation2 + $0x210] sm:$0xf] %vm2468_vm15, %v2416_v0 }
 0x60f   :  { %v4531_v11 = vmul.f32 %v10297_v1, %v4461_v54  ;;  %v4757_v40 = vsel %vm4688_vm4, %v10354_v57, %v4756_v47  ;;  %2896 = vst.msk [vmem:[#allocation2 + $0x210] sm:$0xf] %vm2851_vm0, %v2799_v26  ;;  %v4470_v0 = vpop.f32.mrf.mxu1 }
 0x610   :  { %v2414_v5 = vpop.permute.xlu1 %2413  ;;  %v4861_v44 = vmax.f32 %v4627_v25, %v4757_v40 }
 0x611   :  { %v10429_v15 = vadd.f32 %v10316_v18, %v4531_v11  ;;  %2512 = vst.msk [vmem:[#allocation2 + $0x204] sm:$0xf] %vm2468_vm15, %v2414_v5 }
 0x612   :  { %v4991_v36 = vrot.slane %v4861_v44, 7 }
 0x613   :  { %v4629_v62 = vmax.f32 %v10429_v15, 0.0 }
 0x614   :  { %v4992_v7 = vsel %vm3006_vm2, %v4989_v30, %v4991_v36  ;;  %v5844_v30 = vld [vmem:[#allocation2 + $0x204] sm:$0xf0] }
 0x615   :  { %v4758_v9 = vrot.slane %v4629_v62, 1  ;;  %v5097_v25 = vmax.f32 %v10362_v46, %v4992_v7  ;;  %v3242_v46 = vpop.permute.xlu2 %3241 }
 0x616   :  { %v5854_v34 = vld [vmem:[#allocation2 + $0x210] sm:$0xf] }
 0x617   :  { %v4759_v16 = vsel %vm4688_vm4, %v4756_v47, %v4758_v9 }
 0x618   :  { %v10436_v33 = vmax.f32 %v4628_v12, %v4759_v16  ;;  %v2797_v57 = vpop.permute.xlu1 %2796 }
 0x619   :  { %2895 = vst.msk [vmem:[#allocation2 + $0x204] sm:$0xf] %vm2851_vm0, %v2797_v57 }
 0x61a   :  { %v4993_v61 = vrot.slane %v10436_v33, 7  ;;  %3390 = vst.msk [vmem:[#allocation2 + $0x1fc] sm:$0xf] %vm2851_vm0, %v2797_v57  ;;  %v4473_v57 = vpop.f32.mrf.mxu1 }
 0x61c   :  { %v4994_v42 = vsel %vm3006_vm2, %v4991_v36, %v4993_v61 }
 0x61d   :  { %v5098_v4 = vmax.f32 %v4861_v44, %v4994_v42 }
 0x61f   :  { %v10448_v21 = vpack.c.bf16 %v5098_v4, %v5097_v25 }
 0x620   :  { %v2036_v32 = vpop.permute.xlu0 %2035  ;;  %v6131_v56 = vld [vmem:[#allocation2 + $0x200] sm:$0xf0] }
 0x621   :  { %2132 = vst.msk [vmem:[#allocation2 + $0x21c] sm:$0xf] %vm2086_vm14, %v2036_v32  ;;  %v5843_v55 = vor.u32 %v6131_v56, %v5842_v23  ;;  %v6130_v45 = vld [vmem:[#allocation2 + $0x1fc] sm:$0xf] }
 0x622   :  { %3002 = vst.msk [vmem:[#allocation2 + $0x214] sm:$0xf] %vm2086_vm14, %v2036_v32  ;;  %v5847_v31 = vor.u32 %v6130_v45, %v5844_v30  ;;  %v4475_v30 = vpop.f32.mrf.mxu1 }
 0x623   :  { %4221 = vmatmul.bf16.gmra.mxu2 %v5843_v55 }
 0x624   :  { %4349 = vmatmul.bf16.gmra.mxu3 %v5847_v31  ;;  %v2038_v41 = vpop.permute.xlu1 %2037 }
 0x625   :  { %2133 = vst.msk [vmem:[#allocation2 + $0x228] sm:$0xf] %vm2086_vm14, %v2038_v41  ;;  %v4207_v29 = vpop.f32.mrf.mxu2 }
 0x626   :  { %3003 = vst.msk [vmem:[#allocation2 + $0x220] sm:$0xf] %vm2086_vm14, %v2038_v41 }
 0x627   :  { %3337 = vst.msk [vmem:[#allocation2 + $0x220] sm:$0xf] %vm2468_vm15, %v3242_v46 }
 0x628   :  { %v2418_v60 = vpop.permute.xlu0 %2417 }
 0x629   :  { %2514 = vst.msk [vmem:[#allocation2 + $0x21c] sm:$0xf] %vm2468_vm15, %v2418_v60 }
 0x62b   :  { %v4335_v22 = vpop.f32.mrf.mxu3 }
 0x62c   :  { %v4336_v13 = vadd.f32 %v4335_v22, %v4207_v29  ;;  %v3240_v2 = vpop.permute.xlu1 %3239 }
 0x62d   :  { %3336 = vst.msk [vmem:[#allocation2 + $0x214] sm:$0xf] %vm2468_vm15, %v3240_v2  ;;  %v4209_v39 = vpop.f32.mrf.mxu2 }
 0x62e   :  { %v4464_v37 = vadd.f32 %v4463_v53, %v4336_v13 }
 0x630   :  { %v4532_v38 = vmul.f32 %v10297_v1, %v4464_v37  ;;  %v2801_v49 = vpop.permute.xlu0 %2800  ;;  %v10483_v37 = vpop.f32.mrf.mxu1 }
 0x631   :  { %2897 = vst.msk [vmem:[#allocation2 + $0x21c] sm:$0xf] %vm2851_vm0, %v2801_v49 }
 0x632   :  { %v4583_v19 = vadd.f32 %v10316_v18, %v4532_v38  ;;  %3392 = vst.msk [vmem:[#allocation2 + $0x214] sm:$0xf] %vm2851_vm0, %v2801_v49 }
 0x633   :  { %v4337_v52 = vpop.f32.mrf.mxu3 }
 0x634   :  { %v4630_v3 = vmax.f32 %v4583_v19, 0.0  ;;  %v4338_v58 = vadd.f32 %v4337_v52, %v4209_v39  ;;  %v2803_v10 = vpop.permute.xlu1 %2802 }
 0x635   :  { %3393 = vst.msk [vmem:[#allocation2 + $0x220] sm:$0xf] %vm2851_vm0, %v2803_v10 }
 0x636   :  { %v4760_v59 = vrot.slane %v4630_v3, 1  ;;  %v4466_v43 = vadd.f32 %v4465_v17, %v4338_v58 }
 0x638   :  { %v4533_v35 = vmul.f32 %v10297_v1, %v4466_v43  ;;  %v2420_v26 = vpop.permute.xlu0 %2419  ;;  %v6134_v27 = vld [vmem:[#allocation2 + $0x218] sm:$0xf0]  ;;  %v4761_v63 = vsel %vm4688_vm4, %v4758_v9, %v4760_v59  ;;  %v4480_v52 = vpop.f32.mrf.mxu1 }
 0x639   :  { %2515 = vst.msk [vmem:[#allocation2 + $0x228] sm:$0xf] %vm2468_vm15, %v2420_v26  ;;  %v5855_v51 = vor.u32 %v6134_v27, %v5854_v34  ;;  %v4863_v8 = vmax.f32 %v4629_v62, %v4761_v63  ;;  %v6133_v14 = vld [vmem:[#allocation2 + $0x214] sm:$0xf] }
 0x63a   :  { %v4584_v20 = vadd.f32 %v10316_v18, %v4533_v35  ;;  %2898 = vst.msk [vmem:[#allocation2 + $0x228] sm:$0xf] %vm2851_vm0, %v2803_v10 }
 0x63b   :  { %4226 = vmatmul.bf16.gmra.mxu2 %v5855_v51  ;;  %v4995_v48 = vrot.slane %v4863_v8, 7 }
 0x63c   :  { %v4631_v28 = vmax.f32 %v4584_v20, 0.0  ;;  %v5856_v12 = vld [vmem:[#allocation2 + $0x21c] sm:$0xf0]  ;;  %v4212_v11 = vpop.f32.mrf.mxu2 }
 0x63d   :  { %v5859_v24 = vor.u32 %v6133_v14, %v5856_v12  ;;  %v4996_v6 = vsel %vm3006_vm2, %v4993_v61, %v4995_v48 }
 0x63e   :  { %v4762_v47 = vrot.slane %v4631_v28, 1  ;;  %v5099_v54 = vmax.f32 %v10436_v33, %v4996_v6 }
 0x63f   :  { %4354 = vmatmul.bf16.gmra.mxu3 %v5859_v24 }
 0x640   :  { %v4763_v40 = vsel %vm4688_vm4, %v4760_v59, %v4762_v47  ;;  %v4483_v10 = vpop.f32.mrf.mxu1 }
 0x641   :  { %v4864_v15 = vmax.f32 %v4630_v3, %v4763_v40  ;;  %v4340_v5 = vpop.f32.mrf.mxu3 }
 0x642   :  { %v4341_v44 = vadd.f32 %v4340_v5, %v4212_v11 }
 0x643   :  { %v4997_v62 = vrot.slane %v4864_v15, 7 }
 0x644   :  { %v4469_v9 = vadd.f32 %v4468_v50, %v4341_v44  ;;  %v4214_v42 = vpop.f32.mrf.mxu2 }
 0x645   :  { %v4998_v36 = vsel %vm3006_vm2, %v4995_v48, %v4997_v62 }
 0x646   :  { %v5100_v16 = vmax.f32 %v4863_v8, %v4998_v36  ;;  %v4534_v7 = vmul.f32 %v10297_v1, %v4469_v9 }
 0x648   :  { %v10474_v61 = vpack.c.bf16 %v5100_v16, %v5099_v54  ;;  %v4585_v33 = vadd.f32 %v10316_v18, %v4534_v7  ;;  %v4485_v35 = vpop.f32.mrf.mxu1 }
 0x649   :  { %v4342_v25 = vpop.f32.mrf.mxu3 }
 0x64a   :  { %v4632_v4 = vmax.f32 %v4585_v33, 0.0  ;;  %v4343_v32 = vadd.f32 %v4342_v25, %v4214_v42 }
 0x64c   :  { %v4764_v23 = vrot.slane %v4632_v4, 1  ;;  %v4471_v56 = vadd.f32 %v4470_v0, %v4343_v32 }
 0x64e   :  { %v4535_v53 = vmul.f32 %v10297_v1, %v4471_v56  ;;  %v4765_v55 = vsel %vm4688_vm4, %v4762_v47, %v4764_v23 }
 0x64f   :  { %v4865_v45 = vmax.f32 %v4631_v28, %v4765_v55 }
 0x650   :  { %v4586_v31 = vadd.f32 %v10316_v18, %v4535_v53 }
 0x651   :  { %v4999_v41 = vrot.slane %v4865_v45, 7 }
 0x652   :  { %v4633_v46 = vmax.f32 %v4586_v31, 0.0 }
 0x653   :  { %v5000_v29 = vsel %vm3006_vm2, %v4997_v62, %v4999_v41 }
 0x654   :  { %v2956_v60 = vpop.permute.xlu2 %2955  ;;  %v4766_v17 = vrot.slane %v4633_v46, 1  ;;  %v5101_v22 = vmax.f32 %v4864_v15, %v5000_v29 }
 0x655   :  { %3004 = vst.msk [vmem:[#allocation2 + $0x22c] sm:$0xf] %vm2086_vm14, %v2956_v60 }
 0x656   :  { %v4767_v13 = vsel %vm4688_vm4, %v4764_v23, %v4766_v17 }
 0x657   :  { %v4866_v2 = vmax.f32 %v4632_v4, %v4767_v13 }
 0x659   :  { %v5001_v38 = vrot.slane %v4866_v2, 7 }
 0x65b   :  { %v5002_v49 = vsel %vm3006_vm2, %v4999_v41, %v5001_v38 }
 0x65c   :  { %v5102_v19 = vmax.f32 %v4865_v45, %v5002_v49  ;;  %v3346_v58 = vpop.permute.xlu2 %3345 }
 0x65e   :  { %v10486_v39 = vpack.c.bf16 %v5102_v19, %v5101_v22 }
 0x66a   :  { %v3244_v3 = vpop.permute.xlu1 %3243 }
 0x66b   :  { %3338 = vst.msk [vmem:[#allocation2 + $0x22c] sm:$0xf] %vm2468_vm15, %v3244_v3 }
 0x66c   :  { %3394 = vst.msk [vmem:[#allocation2 + $0x22c] sm:$0xf] %vm2851_vm0, %v3346_v58 }
 0x673   :  { %v3534_v50 = vld [vmem:[#allocation2 + $0x228] sm:$0xff] }
 0x674   :  { %v3804_v59 = vunpack.c.l.b16 %v3534_v50  ;;  %v3805_v43 = vunpack.c.h.b16 %v3534_v50 }
 0x676   :  { %v3876_v26 = vpack.c.b16 %v3804_v59, %v3804_v59  ;;  %v3877_v34 = vpack.c.b16 %v3805_v43, %v3805_v43 }
 0x678   :  { %4231 = vmatmul.bf16.gmra.mxu2 %v3876_v26  ;;  %4359 = vmatmul.bf16.gmra.mxu3 %v3877_v34 }
 0x67e   :  { %v4488_v27 = vpop.f32.mrf.mxu1 }
 0x686   :  { %v4490_v63 = vpop.f32.mrf.mxu1 }
 0x687   :  { %v4217_v51 = vpop.f32.mrf.mxu2 }
 0x68f   :  { %v4345_v8 = vpop.f32.mrf.mxu3  ;;  %v4219_v12 = vpop.f32.mrf.mxu2 }
 0x690   :  { %v4346_v20 = vadd.f32 %v4345_v8, %v4217_v51 }
 0x692   :  { %v4474_v48 = vadd.f32 %v4473_v57, %v4346_v20 }
 0x694   :  { %v4536_v28 = vmul.f32 %v10297_v1, %v4474_v48 }
 0x696   :  { %v4587_v14 = vadd.f32 %v10316_v18, %v4536_v28 }
 0x697   :  { %v4347_v24 = vpop.f32.mrf.mxu3 }
 0x698   :  { %v4634_v6 = vmax.f32 %v4587_v14, 0.0  ;;  %v4348_v47 = vadd.f32 %v4347_v24, %v4219_v12 }
 0x69a   :  { %v4768_v54 = vrot.slane %v4634_v6, 1  ;;  %v4476_v0 = vadd.f32 %v4475_v30, %v4348_v47 }
 0x69c   :  { %v4537_v11 = vmul.f32 %v10297_v1, %v4476_v0  ;;  %v4769_v40 = vsel %vm4688_vm4, %v4766_v17, %v4768_v54 }
 0x69d   :  { %v4867_v15 = vmax.f32 %v4633_v46, %v4769_v40 }
 0x69e   :  { %v10495_v5 = vadd.f32 %v10316_v18, %v4537_v11 }
 0x69f   :  { %v5003_v44 = vrot.slane %v4867_v15, 7 }
 0x6a0   :  { %v4635_v62 = vmax.f32 %v10495_v5, 0.0  ;;  %v6157_v5 = vld [vmem:[%s10600_s8 + $0x18] sm:$0xff] }
 0x6a1   :  { %v5004_v9 = vsel %vm3006_vm2, %v5001_v38, %v5003_v44  ;;  %5235 = vmatpush.bf16.msrb.mxu2 %v6157_v5 }
 0x6a2   :  { %v4770_v36 = vrot.slane %v4635_v62, 1  ;;  %v5103_v16 = vmax.f32 %v4866_v2, %v5004_v9 }
 0x6a4   :  { %v4771_v57 = vsel %vm4688_vm4, %v4768_v54, %v4770_v36 }
 0x6a5   :  { %v10502_v7 = vmax.f32 %v4634_v6, %v4771_v57 }
 0x6a6   :  { %v4222_v23 = vpop.f32.mrf.mxu2 }
 0x6a7   :  { %v5005_v33 = vrot.slane %v10502_v7, 7  ;;  %v4350_v32 = vpop.f32.mrf.mxu3 }
 0x6a8   :  { %v4351_v17 = vadd.f32 %v4350_v32, %v4222_v23  ;;  %v5111_v32 = vld [vmem:[%s10599_s7] sm:$0xff] }
 0x6a9   :  { %v5006_v42 = vsel %vm3006_vm2, %v5003_v44, %v5005_v33 }
 0x6aa   :  { %v5104_v25 = vmax.f32 %v4867_v15, %v5006_v42  ;;  %v4479_v38 = vadd.f32 %v10483_v37, %v4351_v17 }
 0x6ac   :  { %v10508_v4 = vpack.c.bf16 %v5104_v25, %v5103_v16  ;;  %v4538_v58 = vmul.f32 %v10297_v1, %v4479_v38 }
 0x6ae   :  { %v4224_v53 = vpop.f32.mrf.mxu2 }
 0x6af   :  { %v4352_v56 = vpop.f32.mrf.mxu3 }
 0x6b0   :  { %v4353_v60 = vadd.f32 %v4352_v56, %v4224_v53  ;;  %v5138_v53 = vunpack.c.l.b16 %v5111_v32 }
 0x6b2   :  { %v4481_v13 = vadd.f32 %v4480_v52, %v4353_v60 }
 0x6b4   :  { %v4539_v19 = vmul.f32 %v10297_v1, %v4481_v13 }
 0x6b6   :  { %v4590_v59 = vadd.f32 %v10316_v18, %v4539_v19 }
 0x6b8   :  { %v4637_v37 = vmax.f32 %v4590_v59, 0.0 }
 0x6ba   :  { %v4774_v28 = vrot.slane %v4637_v37, 1 }
 0x6be   :  { %v4227_v45 = vpop.f32.mrf.mxu2 }
 0x6c2   :  { %v4355_v55 = vpop.f32.mrf.mxu3 }
 0x6c3   :  { %v4356_v46 = vadd.f32 %v4355_v55, %v4227_v45  ;;  %v5139_v55 = vunpack.c.h.b16 %v5111_v32 }
 0x6c5   :  { %v4484_v22 = vadd.f32 %v4483_v10, %v4356_v46  ;;  %v4589_v10 = vadd.f32 %v10316_v18, %v4538_v58  ;;  %v5142_v60 = vpack.c.b16 %v5139_v55, %v5139_v55 }
 0x6c6   :  { %v4229_v31 = vpop.f32.mrf.mxu2 }
 0x6c7   :  { %v4540_v49 = vmul.f32 %v10297_v1, %v4484_v22  ;;  %v4636_v8 = vmax.f32 %v4589_v10, 0.0  ;;  %5171 = vmatmul.bf16.vlgmr.msra.gmra.mxu3 %v5142_v60 }
 0x6c9   :  { %v4591_v50 = vadd.f32 %v10316_v18, %v4540_v49  ;;  %v4772_v24 = vrot.slane %v4636_v8, 1 }
 0x6ca   :  { %v4357_v30 = vpop.f32.mrf.mxu3 }
 0x6cb   :  { %v4358_v41 = vadd.f32 %v4357_v30, %v4229_v31  ;;  %v4638_v26 = vmax.f32 %v4591_v50, 0.0  ;;  %v4775_v40 = vsel %vm4688_vm4, %v4772_v24, %v4774_v28  ;;  %v4773_v44 = vsel %vm4688_vm4, %v4770_v36, %v4772_v24  ;;  %v6159_v24 = vld [vmem:[%s10602_s10 + $0x8] sm:$0xff] }
 0x6cc   :  { %v4870_v16 = vmax.f32 %v4636_v8, %v4775_v40  ;;  %v4869_v25 = vmax.f32 %v4635_v62, %v4773_v44 }
 0x6cd   :  { %v4486_v29 = vadd.f32 %v4485_v35, %v4358_v41  ;;  %v4776_v20 = vrot.slane %v4638_v26, 1  ;;  %v5141_v41 = vpack.c.b16 %v5138_v53, %v5138_v53 }
 0x6ce   :  { %v5009_v45 = vrot.slane %v4870_v16, 7  ;;  %v5007_v17 = vrot.slane %v4869_v25, 7 }
 0x6cf   :  { %v4541_v2 = vmul.f32 %v10297_v1, %v4486_v29  ;;  %v4777_v0 = vsel %vm4688_vm4, %v4774_v28, %v4776_v20  ;;  %5158 = vmatmul.bf16.vlgmr.msra.gmra.mxu2 %v5141_v41 }
 0x6d0   :  { %v5010_v38 = vsel %vm3006_vm2, %v5007_v17, %v5009_v45  ;;  %v5008_v19 = vsel %vm3006_vm2, %v5005_v33, %v5007_v17 }
 0x6d1   :  { %v4592_v3 = vadd.f32 %v10316_v18, %v4541_v2  ;;  %v6156_v2 = vld [vmem:[%s10600_s8 + $0x10] sm:$0xff]  ;;  %v5106_v58 = vmax.f32 %v4869_v25, %v5010_v38  ;;  %v5105_v50 = vmax.f32 %v10502_v7, %v5008_v19  ;;  %v6155_v7 = vld [vmem:[%s10600_s8 + $0x8] sm:$0xff] }
 0x6d2   :  { %5236 = vmatpush.bf16.msrb.mxu2 %v6156_v2 }
 0x6d3   :  { %v4639_v43 = vmax.f32 %v4592_v3, 0.0  ;;  %v5133_v59 = vpack.c.bf16 %v5106_v58, %v5105_v50 }
 0x6d5   :  { %v4778_v63 = vrot.slane %v4639_v43, 1 }
 0x6d6   :  { %5237 = vmatpush.bf16.msrb.mxu2 %v6155_v7 }
 0x6d7   :  { %v4779_v12 = vsel %vm4688_vm4, %v4776_v20, %v4778_v63 }
 0x6d8   :  { %v4872_v11 = vmax.f32 %v4638_v26, %v4779_v12 }
 0x6da   :  { %v5013_v57 = vrot.slane %v4872_v11, 7 }
 0x6fb   :  { %v4232_v52 = vpop.f32.mrf.mxu2  ;;  %v4360_v35 = vpop.f32.mrf.mxu3 }
 0x6fc   :  { %v4361_v34 = vadd.f32 %v4360_v35, %v4232_v52  ;;  %v6165_v52 = vld [vmem:[%s10602_s10 + $0x38] sm:$0xff]  ;;  %v6163_v35 = vld [vmem:[%s10602_s10 + $0x28] sm:$0xff] }
 0x6fd   :  { %5314 = vmatpush.bf16.msrb.mxu3 %v6165_v52 }
 0x6fe   :  { %v4489_v51 = vadd.f32 %v4488_v27, %v4361_v34  ;;  %v4871_v27 = vmax.f32 %v4637_v37, %v4777_v0  ;;  %v6162_v37 = vld [vmem:[%s10602_s10 + $0x20] sm:$0xff] }
 0x700   :  { %v4542_v48 = vmul.f32 %v10297_v1, %v4489_v51  ;;  %v5011_v56 = vrot.slane %v4871_v27, 7  ;;  %v6160_v51 = vld [vmem:[%s10602_s10 + $0x10] sm:$0xff] }
 0x702   :  { %v4593_v14 = vadd.f32 %v10316_v18, %v4542_v48  ;;  %v5014_v31 = vsel %vm3006_vm2, %v5011_v56, %v5013_v57  ;;  %v5012_v29 = vsel %vm3006_vm2, %v5009_v45, %v5011_v56 }
 0x703   :  { %v4234_v6 = vpop.f32.mrf.mxu2  ;;  %v4362_v47 = vpop.f32.mrf.mxu3  ;;  %v5108_v13 = vmax.f32 %v4871_v27, %v5014_v31  ;;  %v5107_v49 = vmax.f32 %v4870_v16, %v5012_v29  ;;  %v6417_v27 = vld [vmem:[%s10603_s11] ss:$0 sm:$0xff] }
 0x704   :  { %v4640_v54 = vmax.f32 %v4593_v14, 0.0  ;;  %v6158_v6 = vld [vmem:[%s10602_s10] sm:$0xff] }
 0x705   :  { %v5134_v3 = vpack.c.bf16 %v5108_v13, %v5107_v49  ;;  %v6416_v47 = vld [vmem:[%s10601_s9] ss:$0 sm:$0xff] }
 0x706   :  { %v4780_v15 = vrot.slane %v4640_v54, 1 }
 0x708   :  { %v4877_v9 = vmax.f32 %v4640_v54, %v4780_v15  ;;  %v4781_v1 = vsel %vm4688_vm4, %v4778_v63, %v4780_v15  ;;  %v6161_v63 = vld [vmem:[%s10602_s10 + $0x18] sm:$0xff] }
 0x709   :  { %v4873_v18 = vmax.f32 %v4639_v43, %v4781_v1  ;;  %v5112_v43 = vld [vmem:[%s10599_s7 + $0x8] sm:$0xf] }
 0x70a   :  { %v5017_v42 = vrot.slane %v4877_v9, 7  ;;  %v5140_v10 = vunpack.c.l.b16 %v5112_v43 }
 0x70b   :  { %v5015_v23 = vrot.slane %v4873_v18, 7 }
 0x70c   :  { %v5143_v33 = vpack.c.b16 %v5140_v10, %v5140_v10 }
 0x70d   :  { %v5016_v36 = vsel %vm3006_vm2, %v5013_v57, %v5015_v23  ;;  %v5018_v30 = vsel %vm3006_vm2, %v5015_v23, %v5017_v42  ;;  %vm5227_vm2 = vcmask 523264  }
 0x70e   :  { %v5109_v62 = vmax.f32 %v4872_v11, %v5016_v36  ;;  %v5110_v46 = vmax.f32 %v4873_v18, %v5018_v30 }
 0x710   :  { %v5135_v22 = vpack.c.bf16 %v5110_v46, %v5109_v62 }
 0x712   :  { %5177 = vmatpush.bf16.msra.mxu0 %v5135_v22 }
 0x716   :  { %5178 = vmatpush.bf16.msra.mxu0 %v5134_v3 }
 0x71a   :  { %5179 = vmatpush.bf16.msra.mxu0 %v5133_v59 }
 0x71e   :  { %5180 = vmatpush.bf16.msra.mxu0 %v10508_v4 }
 0x722   :  { %5181 = vmatpush.bf16.msra.mxu0 %v10486_v39  ;;  %v6154_v39 = vld [vmem:[%s10600_s8] sm:$0xff] }
 0x723   :  { %5238 = vmatpush.bf16.msrb.mxu2 %v6154_v39 }
 0x726   :  { %5182 = vmatpush.bf16.msra.mxu0 %v10474_v61 }
 0x72a   :  { %5183 = vmatpush.bf16.msra.mxu0 %v10448_v21  ;;  %v6164_v21 = vld [vmem:[%s10602_s10 + $0x30] sm:$0xff] }
 0x72b   :  { %5315 = vmatpush.bf16.msrb.mxu3 %v6164_v21 }
 0x72d   :  { %5960 = vmatmul.msk.bf16.vlgmr.msra.gmra.mxu0 %vm5146_vm1, %v5143_v33 }
 0x72f   :  { %5316 = vmatpush.bf16.msrb.mxu3 %v6163_v35 }
 0x733   :  { %5317 = vmatpush.bf16.msrb.mxu3 %v6162_v37 }
 0x737   :  { %5318 = vmatpush.bf16.msrb.mxu3 %v6161_v63 }
 0x73b   :  { %5319 = vmatpush.bf16.msrb.mxu3 %v6160_v51 }
 0x73f   :  { %5320 = vmatpush.bf16.msrb.mxu3 %v6159_v24 }
 0x743   :  { %5321 = vmatpush.bf16.msrb.mxu3 %v6158_v6 }
 0x74a   :  { %v5172_v61 = vpop.f32.mrf.mxu3 }
 0x752   :  { %v5159_v4 = vpop.f32.mrf.mxu2  ;;  %v5174_v34 = vpop.f32.mrf.mxu3 }
 0x753   :  { %v5173_v8 = vadd.f32 %v5172_v61, %v5159_v4 }
 0x75a   :  { %v5161_v26 = vpop.f32.mrf.mxu2 }
 0x7aa   :  { %v5185_v20 = vpop.f32.mrf.mxu0 }
 0x7ab   :  { %v5186_v48 = vadd.f32 %v5185_v20, %v5173_v8 }
 0x7ad   :  { %v5189_v28 = vmul.f32 0.25, %v5186_v48 }
 0x7af   :  { %v5190_v14 = vpack.c.bf16 %v5189_v28, %v5189_v28 }
 0x7b1   :  { %5977 = vmatmul.msk.bf16.vlgmr.msrb.gmra.mxu2 %vm5227_vm2, %v5190_v14 }
 0x7b2   :  { %v5187_v12 = vpop.f32.mrf.mxu0 }
 0x834   :  { %v5240_v54 = vpop.f32.mrf.mxu2 }
 0x835   :  { %v5241_v0 = vadd.f32 %v6416_v47, %v5240_v54 }
 0x837   :  { %v5244_v11 = vmax.f32 %v5241_v0, 0.0 }
 0x839   :  { %v5245_v40 = vpack.c.bf16 %v5244_v11, %v5244_v11 }
 0x83b   :  { %5322 = vmatmul.bf16.vlgmr.msrb.gmra.mxu3 %v5245_v40 }
 0x83c   :  { %v5242_v15 = vpop.f32.mrf.mxu2 }
 0x8be   :  { %v5323_v44 = vpop.f32.mrf.mxu3 }
 0x8bf   :  { %v5324_v9 = vadd.f32 %v6417_v27, %v5323_v44 }
 0x8c1   :  { %5327 = vst [vmem:[%s10604_s12] sm:$0xff] %v5324_v9 }
 0x8c6   :  { %v5325_v1 = vpop.f32.mrf.mxu3 }

</bundles_post_ra>
